<compile_context>
chip_gen: v7x
topology: tpu7x:2x2x1
jax: 0.10.0
libtpu: 0.0.40
codegen_flags: <defaults>
</compile_context>

<pallas_src>
import jax
import jax.numpy as jnp
from jax.experimental import pallas as pl
from jax.experimental.pallas import tpu as pltpu

# Problem sizes implied by the module.
C = 1152          # channels (depthwise groups)
H = W = 7         # spatial
KH = KW = 5       # kernel
PAD = 2           # padding
C_BLK = 384       # channel tile (3 lane-groups) -> grid of 3 steps
HP = H + 2 * PAD  # 11
WP = W + 2 * PAD  # 11


def relu_dwconv_kernel(x_ref, w_ref, o_ref, xpad_ref, slab_ref):
    """Fused ReLU + depthwise 5x5 conv over one channel tile.

    x_ref:    (1, H, W, C_BLK)        un-padded input tile (VMEM)
    w_ref:    (KH*KW, C_BLK)          per-channel filter taps (VMEM)
    o_ref:    (1, H, W, C_BLK)        output tile (VMEM)
    xpad_ref: (HP, WP, C_BLK)         VMEM scratch: ReLU'd, zero-padded tile
    slab_ref: (KW, HP, W, C_BLK)      VMEM scratch: the 5 kw-shifted slabs
    """
    # 1) In-VMEM zero padding + fused ReLU (zeros are ReLU fixed points, so
    #    ReLU-then-pad == pad-then-ReLU).
    xpad_ref[...] = jnp.zeros_like(xpad_ref)
    xpad_ref[PAD:PAD + H, PAD:PAD + W, :] = jnp.maximum(
        x_ref[0], jnp.zeros((), x_ref.dtype)
    ).astype(jnp.float32)

    # 2) Hoist the kw (sublane-axis) shifts out of the tap loop: build the 5
    #    kw-shifted slabs once (5 sublane re-layouts instead of 25).
    for kw in range(KW):
        slab_ref[kw] = xpad_ref[:, kw:kw + W, :]

    # 3) 25-tap depthwise accumulation. Inside the loop we only slice leading
    #    (non-sublane) dims of the scratch ref, so only the fp32 accumulator and
    #    one (H, W, C_BLK) tap slice are live at a time.
    acc = jnp.zeros((H, W, C_BLK), jnp.float32)
    for kh in range(KH):
        for kw in range(KW):
            tap = w_ref[kh * KW + kw, :].astype(jnp.float32)      # (C_BLK,)
            acc = acc + slab_ref[kw, kh:kh + H, :, :] * tap[None, None, :]

    o_ref[0] = acc.astype(o_ref.dtype)


def relu_dwconv2d(x_nchw, weight):
    """x_nchw: (1, C, H, W) float32; weight: (C, 1, KH, KW) float32 (PyTorch layout)."""
    n, c, h, w = x_nchw.shape
    assert (n, c, h, w) == (1, C, H, W)

    # Glue: NCHW -> NHWC (channels on lanes); flatten filter taps to (KH*KW, C).
    # No jnp.pad here -- padding happens in VMEM inside the kernel.
    # TODO(synk): if the producer/consumer can live with NHWC, drop these transposes.
    x_nhwc = jnp.transpose(x_nchw, (0, 2, 3, 1))                # (1, H, W, C)
    w_taps = jnp.transpose(weight.reshape(C, KH * KW), (1, 0))  # (KH*KW, C)

    out_nhwc = pl.pallas_call(
        relu_dwconv_kernel,
        out_shape=jax.ShapeDtypeStruct((1, H, W, C), x_nchw.dtype),
        grid_spec=pltpu.PrefetchScalarGridSpec(
            num_scalar_prefetch=0,
            grid=(C // C_BLK,),                                   # 3 steps (was 9)
            in_specs=[
                pl.BlockSpec((1, H, W, C_BLK), lambda ci: (0, 0, 0, ci)),
                pl.BlockSpec((KH * KW, C_BLK), lambda ci: (0, ci)),
            ],
            out_specs=pl.BlockSpec((1, H, W, C_BLK), lambda ci: (0, 0, 0, ci)),
            scratch_shapes=[
                pltpu.VMEM((HP, WP, C_BLK), jnp.float32),         # padded + ReLU'd tile
                pltpu.VMEM((KW, HP, W, C_BLK), jnp.float32),      # 5 kw-shifted slabs
            ],
        ),
        compiler_params=pltpu.CompilerParams(
            dimension_semantics=("parallel",)),
    )(x_nhwc, w_taps)

    # Back to NCHW to match the PyTorch module's output convention.
    return jnp.transpose(out_nhwc, (0, 3, 1, 2))


def _reference(x_nchw, weight):
    """Pure-JAX reference (ReLU + depthwise conv) for correctness checking."""
    x = jnp.maximum(x_nchw, 0.0)
    x_nhwc = jnp.transpose(x, (0, 2, 3, 1))
    x_pad = jnp.pad(x_nhwc, ((0, 0), (PAD, PAD), (PAD, PAD), (0, 0)))
    acc = jnp.zeros((1, H, W, C), jnp.float32)
    for kh in range(KH):
        for kw in range(KW):
            acc = acc + x_pad[:, kh:kh + H, kw:kw + W, :] * weight[:, 0, kh, kw][None, None, None, :]
    return jnp.transpose(acc, (0, 3, 1, 2))


if __name__ == "__main__":
    key = jax.random.PRNGKey(0)
    kx, kw = jax.random.split(key)

    # Deterministic synthetic input & depthwise filter (PyTorch shapes).
    x113 = jax.random.normal(kx, (1, C, H, W), dtype=jnp.float32)
    weight = jax.random.normal(kw, (C, 1, KH, KW), dtype=jnp.float32) * 0.1

    out = jax.jit(relu_dwconv2d)(x113, weight)
    out = jax.block_until_ready(out)

    ref = _reference(x113, weight)
    assert out.shape == (1, C, H, W)
    assert jnp.allclose(out, ref, atol=1e-4, rtol=1e-4)

    print("KERNEL_OK")
</pallas_src>

<mosaic_0001>
module attributes {stable_mosaic.version = 11 : i64} {
  func.func @relu_dwconv_kernel(%arg0: i32, %arg1: memref<1x7x7x384xf32, #tpu.memory_space<vmem>>, %arg2: memref<25x384xf32, #tpu.memory_space<vmem>>, %arg3: memref<1x7x7x384xf32, #tpu.memory_space<vmem>>, %arg4: memref<11x11x384xf32, #tpu.memory_space<vmem>>, %arg5: memref<5x11x7x384xf32, #tpu.memory_space<vmem>>) attributes {dimension_semantics = [#tpu.dimension_semantics<parallel>], iteration_bounds = array<i64: 3>, scalar_prefetch = 0 : i64, scratch_operands = 2 : i64, tpu.core_type = #tpu.core_type<tc>, window_params = [{transform_indices = @transform_0, window_bounds = array<i64: 1, 7, 7, 384>}, {transform_indices = @transform_1, window_bounds = array<i64: 25, 384>}, {transform_indices = @transform_2, window_bounds = array<i64: 1, 7, 7, 384>}]} {
    %cst = arith.constant 0.000000e+00 : f32
    %0 = vector.broadcast %cst : f32 to vector<11x11x384xf32>
    %c0 = arith.constant 0 : index
    %c0_0 = arith.constant 0 : index
    %c0_1 = arith.constant 0 : index
    %1 = vector.load %arg4[%c0, %c0_0, %c0_1] : memref<11x11x384xf32, #tpu.memory_space<vmem>>, vector<11x11x384xf32>
    tpu.vector_store %arg4[%c0, %c0_0, %c0_1], %0 {strides = array<i32>} : memref<11x11x384xf32, #tpu.memory_space<vmem>>, vector<11x11x384xf32>,
    %c0_2 = arith.constant 0 : index
    %c0_3 = arith.constant 0 : index
    %c0_4 = arith.constant 0 : index
    %c0_5 = arith.constant 0 : index
    %2 = vector.load %arg1[%c0_2, %c0_3, %c0_4, %c0_5] : memref<1x7x7x384xf32, #tpu.memory_space<vmem>>, vector<1x7x7x384xf32>
    %3 = vector.shape_cast %2 : vector<1x7x7x384xf32> to vector<7x7x384xf32>
    %cst_6 = arith.constant 0.000000e+00 : f32
    %4 = vector.broadcast %cst_6 : f32 to vector<7x7x384xf32>
    %5 = arith.maximumf %3, %4 : vector<7x7x384xf32>
    %c2 = arith.constant 2 : index
    %c2_7 = arith.constant 2 : index
    %c0_8 = arith.constant 0 : index
    %6 = vector.load %arg4[%c2, %c2_7, %c0_8] : memref<11x11x384xf32, #tpu.memory_space<vmem>>, vector<7x7x384xf32>
    tpu.vector_store %arg4[%c2, %c2_7, %c0_8], %5 {strides = array<i32>} : memref<11x11x384xf32, #tpu.memory_space<vmem>>, vector<7x7x384xf32>,
    %c0_9 = arith.constant 0 : index
    %c0_10 = arith.constant 0 : index
    %c0_11 = arith.constant 0 : index
    %7 = vector.load %arg4[%c0_9, %c0_10, %c0_11] : memref<11x11x384xf32, #tpu.memory_space<vmem>>, vector<11x7x384xf32>
    %c0_12 = arith.constant 0 : index
    %c0_13 = arith.constant 0 : index
    %c0_14 = arith.constant 0 : index
    %c0_15 = arith.constant 0 : index
    %8 = vector.load %arg5[%c0_12, %c0_13, %c0_14, %c0_15] : memref<5x11x7x384xf32, #tpu.memory_space<vmem>>, vector<1x11x7x384xf32>
    %9 = vector.shape_cast %8 : vector<1x11x7x384xf32> to vector<11x7x384xf32>
    %10 = vector.shape_cast %7 : vector<11x7x384xf32> to vector<1x11x7x384xf32>
    tpu.vector_store %arg5[%c0_12, %c0_13, %c0_14, %c0_15], %10 {strides = array<i32>} : memref<5x11x7x384xf32, #tpu.memory_space<vmem>>, vector<1x11x7x384xf32>,
    %c0_16 = arith.constant 0 : index
    %c1 = arith.constant 1 : index
    %c0_17 = arith.constant 0 : index
    %11 = vector.load %arg4[%c0_16, %c1, %c0_17] : memref<11x11x384xf32, #tpu.memory_space<vmem>>, vector<11x7x384xf32>
    %c1_18 = arith.constant 1 : index
    %c0_19 = arith.constant 0 : index
    %c0_20 = arith.constant 0 : index
    %c0_21 = arith.constant 0 : index
    %12 = vector.load %arg5[%c1_18, %c0_19, %c0_20, %c0_21] : memref<5x11x7x384xf32, #tpu.memory_space<vmem>>, vector<1x11x7x384xf32>
    %13 = vector.shape_cast %12 : vector<1x11x7x384xf32> to vector<11x7x384xf32>
    %14 = vector.shape_cast %11 : vector<11x7x384xf32> to vector<1x11x7x384xf32>
    tpu.vector_store %arg5[%c1_18, %c0_19, %c0_20, %c0_21], %14 {strides = array<i32>} : memref<5x11x7x384xf32, #tpu.memory_space<vmem>>, vector<1x11x7x384xf32>,
    %c0_22 = arith.constant 0 : index
    %c2_23 = arith.constant 2 : index
    %c0_24 = arith.constant 0 : index
    %15 = vector.load %arg4[%c0_22, %c2_23, %c0_24] : memref<11x11x384xf32, #tpu.memory_space<vmem>>, vector<11x7x384xf32>
    %c2_25 = arith.constant 2 : index
    %c0_26 = arith.constant 0 : index
    %c0_27 = arith.constant 0 : index
    %c0_28 = arith.constant 0 : index
    %16 = vector.load %arg5[%c2_25, %c0_26, %c0_27, %c0_28] : memref<5x11x7x384xf32, #tpu.memory_space<vmem>>, vector<1x11x7x384xf32>
    %17 = vector.shape_cast %16 : vector<1x11x7x384xf32> to vector<11x7x384xf32>
    %18 = vector.shape_cast %15 : vector<11x7x384xf32> to vector<1x11x7x384xf32>
    tpu.vector_store %arg5[%c2_25, %c0_26, %c0_27, %c0_28], %18 {strides = array<i32>} : memref<5x11x7x384xf32, #tpu.memory_space<vmem>>, vector<1x11x7x384xf32>,
    %c0_29 = arith.constant 0 : index
    %c3 = arith.constant 3 : index
    %c0_30 = arith.constant 0 : index
    %19 = vector.load %arg4[%c0_29, %c3, %c0_30] : memref<11x11x384xf32, #tpu.memory_space<vmem>>, vector<11x7x384xf32>
    %c3_31 = arith.constant 3 : index
    %c0_32 = arith.constant 0 : index
    %c0_33 = arith.constant 0 : index
    %c0_34 = arith.constant 0 : index
    %20 = vector.load %arg5[%c3_31, %c0_32, %c0_33, %c0_34] : memref<5x11x7x384xf32, #tpu.memory_space<vmem>>, vector<1x11x7x384xf32>
    %21 = vector.shape_cast %20 : vector<1x11x7x384xf32> to vector<11x7x384xf32>
    %22 = vector.shape_cast %19 : vector<11x7x384xf32> to vector<1x11x7x384xf32>
    tpu.vector_store %arg5[%c3_31, %c0_32, %c0_33, %c0_34], %22 {strides = array<i32>} : memref<5x11x7x384xf32, #tpu.memory_space<vmem>>, vector<1x11x7x384xf32>,
    %c0_35 = arith.constant 0 : index
    %c4 = arith.constant 4 : index
    %c0_36 = arith.constant 0 : index
    %23 = vector.load %arg4[%c0_35, %c4, %c0_36] : memref<11x11x384xf32, #tpu.memory_space<vmem>>, vector<11x7x384xf32>
    %c4_37 = arith.constant 4 : index
    %c0_38 = arith.constant 0 : index
    %c0_39 = arith.constant 0 : index
    %c0_40 = arith.constant 0 : index
    %24 = vector.load %arg5[%c4_37, %c0_38, %c0_39, %c0_40] : memref<5x11x7x384xf32, #tpu.memory_space<vmem>>, vector<1x11x7x384xf32>
    %25 = vector.shape_cast %24 : vector<1x11x7x384xf32> to vector<11x7x384xf32>
    %26 = vector.shape_cast %23 : vector<11x7x384xf32> to vector<1x11x7x384xf32>
    tpu.vector_store %arg5[%c4_37, %c0_38, %c0_39, %c0_40], %26 {strides = array<i32>} : memref<5x11x7x384xf32, #tpu.memory_space<vmem>>, vector<1x11x7x384xf32>,
    %cst_41 = arith.constant 0.000000e+00 : f32
    %27 = vector.broadcast %cst_41 : f32 to vector<7x7x384xf32>
    %c0_42 = arith.constant 0 : index
    %c0_43 = arith.constant 0 : index
    %28 = vector.load %arg2[%c0_42, %c0_43] : memref<25x384xf32, #tpu.memory_space<vmem>>, vector<1x384xf32>
    %29 = vector.shape_cast %28 : vector<1x384xf32> to vector<384xf32>
    %c0_44 = arith.constant 0 : index
    %c0_45 = arith.constant 0 : index
    %c0_46 = arith.constant 0 : index
    %c0_47 = arith.constant 0 : index
    %30 = vector.load %arg5[%c0_44, %c0_45, %c0_46, %c0_47] : memref<5x11x7x384xf32, #tpu.memory_space<vmem>>, vector<1x7x7x384xf32>
    %31 = vector.shape_cast %30 : vector<1x7x7x384xf32> to vector<7x7x384xf32>
    %32 = vector.shape_cast %29 : vector<384xf32> to vector<1x1x384xf32>
    %33 = vector.broadcast %32 : vector<1x1x384xf32> to vector<7x7x384xf32>
    %34 = arith.mulf %31, %33 : vector<7x7x384xf32>
    %35 = arith.addf %27, %34 : vector<7x7x384xf32>
    %c1_48 = arith.constant 1 : index
    %c0_49 = arith.constant 0 : index
    %36 = vector.load %arg2[%c1_48, %c0_49] : memref<25x384xf32, #tpu.memory_space<vmem>>, vector<1x384xf32>
    %37 = vector.shape_cast %36 : vector<1x384xf32> to vector<384xf32>
    %c1_50 = arith.constant 1 : index
    %c0_51 = arith.constant 0 : index
    %c0_52 = arith.constant 0 : index
    %c0_53 = arith.constant 0 : index
    %38 = vector.load %arg5[%c1_50, %c0_51, %c0_52, %c0_53] : memref<5x11x7x384xf32, #tpu.memory_space<vmem>>, vector<1x7x7x384xf32>
    %39 = vector.shape_cast %38 : vector<1x7x7x384xf32> to vector<7x7x384xf32>
    %40 = vector.shape_cast %37 : vector<384xf32> to vector<1x1x384xf32>
    %41 = vector.broadcast %40 : vector<1x1x384xf32> to vector<7x7x384xf32>
    %42 = arith.mulf %39, %41 : vector<7x7x384xf32>
    %43 = arith.addf %35, %42 : vector<7x7x384xf32>
    %c2_54 = arith.constant 2 : index
    %c0_55 = arith.constant 0 : index
    %44 = vector.load %arg2[%c2_54, %c0_55] : memref<25x384xf32, #tpu.memory_space<vmem>>, vector<1x384xf32>
    %45 = vector.shape_cast %44 : vector<1x384xf32> to vector<384xf32>
    %c2_56 = arith.constant 2 : index
    %c0_57 = arith.constant 0 : index
    %c0_58 = arith.constant 0 : index
    %c0_59 = arith.constant 0 : index
    %46 = vector.load %arg5[%c2_56, %c0_57, %c0_58, %c0_59] : memref<5x11x7x384xf32, #tpu.memory_space<vmem>>, vector<1x7x7x384xf32>
    %47 = vector.shape_cast %46 : vector<1x7x7x384xf32> to vector<7x7x384xf32>
    %48 = vector.shape_cast %45 : vector<384xf32> to vector<1x1x384xf32>
    %49 = vector.broadcast %48 : vector<1x1x384xf32> to vector<7x7x384xf32>
    %50 = arith.mulf %47, %49 : vector<7x7x384xf32>
    %51 = arith.addf %43, %50 : vector<7x7x384xf32>
    %c3_60 = arith.constant 3 : index
    %c0_61 = arith.constant 0 : index
    %52 = vector.load %arg2[%c3_60, %c0_61] : memref<25x384xf32, #tpu.memory_space<vmem>>, vector<1x384xf32>
    %53 = vector.shape_cast %52 : vector<1x384xf32> to vector<384xf32>
    %c3_62 = arith.constant 3 : index
    %c0_63 = arith.constant 0 : index
    %c0_64 = arith.constant 0 : index
    %c0_65 = arith.constant 0 : index
    %54 = vector.load %arg5[%c3_62, %c0_63, %c0_64, %c0_65] : memref<5x11x7x384xf32, #tpu.memory_space<vmem>>, vector<1x7x7x384xf32>
    %55 = vector.shape_cast %54 : vector<1x7x7x384xf32> to vector<7x7x384xf32>
    %56 = vector.shape_cast %53 : vector<384xf32> to vector<1x1x384xf32>
    %57 = vector.broadcast %56 : vector<1x1x384xf32> to vector<7x7x384xf32>
    %58 = arith.mulf %55, %57 : vector<7x7x384xf32>
    %59 = arith.addf %51, %58 : vector<7x7x384xf32>
    %c4_66 = arith.constant 4 : index
    %c0_67 = arith.constant 0 : index
    %60 = vector.load %arg2[%c4_66, %c0_67] : memref<25x384xf32, #tpu.memory_space<vmem>>, vector<1x384xf32>
    %61 = vector.shape_cast %60 : vector<1x384xf32> to vector<384xf32>
    %c4_68 = arith.constant 4 : index
    %c0_69 = arith.constant 0 : index
    %c0_70 = arith.constant 0 : index
    %c0_71 = arith.constant 0 : index
    %62 = vector.load %arg5[%c4_68, %c0_69, %c0_70, %c0_71] : memref<5x11x7x384xf32, #tpu.memory_space<vmem>>, vector<1x7x7x384xf32>
    %63 = vector.shape_cast %62 : vector<1x7x7x384xf32> to vector<7x7x384xf32>
    %64 = vector.shape_cast %61 : vector<384xf32> to vector<1x1x384xf32>
    %65 = vector.broadcast %64 : vector<1x1x384xf32> to vector<7x7x384xf32>
    %66 = arith.mulf %63, %65 : vector<7x7x384xf32>
    %67 = arith.addf %59, %66 : vector<7x7x384xf32>
    %c5 = arith.constant 5 : index
    %c0_72 = arith.constant 0 : index
    %68 = vector.load %arg2[%c5, %c0_72] : memref<25x384xf32, #tpu.memory_space<vmem>>, vector<1x384xf32>
    %69 = vector.shape_cast %68 : vector<1x384xf32> to vector<384xf32>
    %c0_73 = arith.constant 0 : index
    %c1_74 = arith.constant 1 : index
    %c0_75 = arith.constant 0 : index
    %c0_76 = arith.constant 0 : index
    %70 = vector.load %arg5[%c0_73, %c1_74, %c0_75, %c0_76] : memref<5x11x7x384xf32, #tpu.memory_space<vmem>>, vector<1x7x7x384xf32>
    %71 = vector.shape_cast %70 : vector<1x7x7x384xf32> to vector<7x7x384xf32>
    %72 = vector.shape_cast %69 : vector<384xf32> to vector<1x1x384xf32>
    %73 = vector.broadcast %72 : vector<1x1x384xf32> to vector<7x7x384xf32>
    %74 = arith.mulf %71, %73 : vector<7x7x384xf32>
    %75 = arith.addf %67, %74 : vector<7x7x384xf32>
    %c6 = arith.constant 6 : index
    %c0_77 = arith.constant 0 : index
    %76 = vector.load %arg2[%c6, %c0_77] : memref<25x384xf32, #tpu.memory_space<vmem>>, vector<1x384xf32>
    %77 = vector.shape_cast %76 : vector<1x384xf32> to vector<384xf32>
    %c1_78 = arith.constant 1 : index
    %c1_79 = arith.constant 1 : index
    %c0_80 = arith.constant 0 : index
    %c0_81 = arith.constant 0 : index
    %78 = vector.load %arg5[%c1_78, %c1_79, %c0_80, %c0_81] : memref<5x11x7x384xf32, #tpu.memory_space<vmem>>, vector<1x7x7x384xf32>
    %79 = vector.shape_cast %78 : vector<1x7x7x384xf32> to vector<7x7x384xf32>
    %80 = vector.shape_cast %77 : vector<384xf32> to vector<1x1x384xf32>
    %81 = vector.broadcast %80 : vector<1x1x384xf32> to vector<7x7x384xf32>
    %82 = arith.mulf %79, %81 : vector<7x7x384xf32>
    %83 = arith.addf %75, %82 : vector<7x7x384xf32>
    %c7 = arith.constant 7 : index
    %c0_82 = arith.constant 0 : index
    %84 = vector.load %arg2[%c7, %c0_82] : memref<25x384xf32, #tpu.memory_space<vmem>>, vector<1x384xf32>
    %85 = vector.shape_cast %84 : vector<1x384xf32> to vector<384xf32>
    %c2_83 = arith.constant 2 : index
    %c1_84 = arith.constant 1 : index
    %c0_85 = arith.constant 0 : index
    %c0_86 = arith.constant 0 : index
    %86 = vector.load %arg5[%c2_83, %c1_84, %c0_85, %c0_86] : memref<5x11x7x384xf32, #tpu.memory_space<vmem>>, vector<1x7x7x384xf32>
    %87 = vector.shape_cast %86 : vector<1x7x7x384xf32> to vector<7x7x384xf32>
    %88 = vector.shape_cast %85 : vector<384xf32> to vector<1x1x384xf32>
    %89 = vector.broadcast %88 : vector<1x1x384xf32> to vector<7x7x384xf32>
    %90 = arith.mulf %87, %89 : vector<7x7x384xf32>
    %91 = arith.addf %83, %90 : vector<7x7x384xf32>
    %c8 = arith.constant 8 : index
    %c0_87 = arith.constant 0 : index
    %92 = vector.load %arg2[%c8, %c0_87] : memref<25x384xf32, #tpu.memory_space<vmem>>, vector<1x384xf32>
    %93 = vector.shape_cast %92 : vector<1x384xf32> to vector<384xf32>
    %c3_88 = arith.constant 3 : index
    %c1_89 = arith.constant 1 : index
    %c0_90 = arith.constant 0 : index
    %c0_91 = arith.constant 0 : index
    %94 = vector.load %arg5[%c3_88, %c1_89, %c0_90, %c0_91] : memref<5x11x7x384xf32, #tpu.memory_space<vmem>>, vector<1x7x7x384xf32>
    %95 = vector.shape_cast %94 : vector<1x7x7x384xf32> to vector<7x7x384xf32>
    %96 = vector.shape_cast %93 : vector<384xf32> to vector<1x1x384xf32>
    %97 = vector.broadcast %96 : vector<1x1x384xf32> to vector<7x7x384xf32>
    %98 = arith.mulf %95, %97 : vector<7x7x384xf32>
    %99 = arith.addf %91, %98 : vector<7x7x384xf32>
    %c9 = arith.constant 9 : index
    %c0_92 = arith.constant 0 : index
    %100 = vector.load %arg2[%c9, %c0_92] : memref<25x384xf32, #tpu.memory_space<vmem>>, vector<1x384xf32>
    %101 = vector.shape_cast %100 : vector<1x384xf32> to vector<384xf32>
    %c4_93 = arith.constant 4 : index
    %c1_94 = arith.constant 1 : index
    %c0_95 = arith.constant 0 : index
    %c0_96 = arith.constant 0 : index
    %102 = vector.load %arg5[%c4_93, %c1_94, %c0_95, %c0_96] : memref<5x11x7x384xf32, #tpu.memory_space<vmem>>, vector<1x7x7x384xf32>
    %103 = vector.shape_cast %102 : vector<1x7x7x384xf32> to vector<7x7x384xf32>
    %104 = vector.shape_cast %101 : vector<384xf32> to vector<1x1x384xf32>
    %105 = vector.broadcast %104 : vector<1x1x384xf32> to vector<7x7x384xf32>
    %106 = arith.mulf %103, %105 : vector<7x7x384xf32>
    %107 = arith.addf %99, %106 : vector<7x7x384xf32>
    %c10 = arith.constant 10 : index
    %c0_97 = arith.constant 0 : index
    %108 = vector.load %arg2[%c10, %c0_97] : memref<25x384xf32, #tpu.memory_space<vmem>>, vector<1x384xf32>
    %109 = vector.shape_cast %108 : vector<1x384xf32> to vector<384xf32>
    %c0_98 = arith.constant 0 : index
    %c2_99 = arith.constant 2 : index
    %c0_100 = arith.constant 0 : index
    %c0_101 = arith.constant 0 : index
    %110 = vector.load %arg5[%c0_98, %c2_99, %c0_100, %c0_101] : memref<5x11x7x384xf32, #tpu.memory_space<vmem>>, vector<1x7x7x384xf32>
    %111 = vector.shape_cast %110 : vector<1x7x7x384xf32> to vector<7x7x384xf32>
    %112 = vector.shape_cast %109 : vector<384xf32> to vector<1x1x384xf32>
    %113 = vector.broadcast %112 : vector<1x1x384xf32> to vector<7x7x384xf32>
    %114 = arith.mulf %111, %113 : vector<7x7x384xf32>
    %115 = arith.addf %107, %114 : vector<7x7x384xf32>
    %c11 = arith.constant 11 : index
    %c0_102 = arith.constant 0 : index
    %116 = vector.load %arg2[%c11, %c0_102] : memref<25x384xf32, #tpu.memory_space<vmem>>, vector<1x384xf32>
    %117 = vector.shape_cast %116 : vector<1x384xf32> to vector<384xf32>
    %c1_103 = arith.constant 1 : index
    %c2_104 = arith.constant 2 : index
    %c0_105 = arith.constant 0 : index
    %c0_106 = arith.constant 0 : index
    %118 = vector.load %arg5[%c1_103, %c2_104, %c0_105, %c0_106] : memref<5x11x7x384xf32, #tpu.memory_space<vmem>>, vector<1x7x7x384xf32>
    %119 = vector.shape_cast %118 : vector<1x7x7x384xf32> to vector<7x7x384xf32>
    %120 = vector.shape_cast %117 : vector<384xf32> to vector<1x1x384xf32>
    %121 = vector.broadcast %120 : vector<1x1x384xf32> to vector<7x7x384xf32>
    %122 = arith.mulf %119, %121 : vector<7x7x384xf32>
    %123 = arith.addf %115, %122 : vector<7x7x384xf32>
    %c12 = arith.constant 12 : index
    %c0_107 = arith.constant 0 : index
    %124 = vector.load %arg2[%c12, %c0_107] : memref<25x384xf32, #tpu.memory_space<vmem>>, vector<1x384xf32>
    %125 = vector.shape_cast %124 : vector<1x384xf32> to vector<384xf32>
    %c2_108 = arith.constant 2 : index
    %c2_109 = arith.constant 2 : index
    %c0_110 = arith.constant 0 : index
    %c0_111 = arith.constant 0 : index
    %126 = vector.load %arg5[%c2_108, %c2_109, %c0_110, %c0_111] : memref<5x11x7x384xf32, #tpu.memory_space<vmem>>, vector<1x7x7x384xf32>
    %127 = vector.shape_cast %126 : vector<1x7x7x384xf32> to vector<7x7x384xf32>
    %128 = vector.shape_cast %125 : vector<384xf32> to vector<1x1x384xf32>
    %129 = vector.broadcast %128 : vector<1x1x384xf32> to vector<7x7x384xf32>
    %130 = arith.mulf %127, %129 : vector<7x7x384xf32>
    %131 = arith.addf %123, %130 : vector<7x7x384xf32>
    %c13 = arith.constant 13 : index
    %c0_112 = arith.constant 0 : index
    %132 = vector.load %arg2[%c13, %c0_112] : memref<25x384xf32, #tpu.memory_space<vmem>>, vector<1x384xf32>
    %133 = vector.shape_cast %132 : vector<1x384xf32> to vector<384xf32>
    %c3_113 = arith.constant 3 : index
    %c2_114 = arith.constant 2 : index
    %c0_115 = arith.constant 0 : index
    %c0_116 = arith.constant 0 : index
    %134 = vector.load %arg5[%c3_113, %c2_114, %c0_115, %c0_116] : memref<5x11x7x384xf32, #tpu.memory_space<vmem>>, vector<1x7x7x384xf32>
    %135 = vector.shape_cast %134 : vector<1x7x7x384xf32> to vector<7x7x384xf32>
    %136 = vector.shape_cast %133 : vector<384xf32> to vector<1x1x384xf32>
    %137 = vector.broadcast %136 : vector<1x1x384xf32> to vector<7x7x384xf32>
    %138 = arith.mulf %135, %137 : vector<7x7x384xf32>
    %139 = arith.addf %131, %138 : vector<7x7x384xf32>
    %c14 = arith.constant 14 : index
    %c0_117 = arith.constant 0 : index
    %140 = vector.load %arg2[%c14, %c0_117] : memref<25x384xf32, #tpu.memory_space<vmem>>, vector<1x384xf32>
    %141 = vector.shape_cast %140 : vector<1x384xf32> to vector<384xf32>
    %c4_118 = arith.constant 4 : index
    %c2_119 = arith.constant 2 : index
    %c0_120 = arith.constant 0 : index
    %c0_121 = arith.constant 0 : index
    %142 = vector.load %arg5[%c4_118, %c2_119, %c0_120, %c0_121] : memref<5x11x7x384xf32, #tpu.memory_space<vmem>>, vector<1x7x7x384xf32>
    %143 = vector.shape_cast %142 : vector<1x7x7x384xf32> to vector<7x7x384xf32>
    %144 = vector.shape_cast %141 : vector<384xf32> to vector<1x1x384xf32>
    %145 = vector.broadcast %144 : vector<1x1x384xf32> to vector<7x7x384xf32>
    %146 = arith.mulf %143, %145 : vector<7x7x384xf32>
    %147 = arith.addf %139, %146 : vector<7x7x384xf32>
    %c15 = arith.constant 15 : index
    %c0_122 = arith.constant 0 : index
    %148 = vector.load %arg2[%c15, %c0_122] : memref<25x384xf32, #tpu.memory_space<vmem>>, vector<1x384xf32>
    %149 = vector.shape_cast %148 : vector<1x384xf32> to vector<384xf32>
    %c0_123 = arith.constant 0 : index
    %c3_124 = arith.constant 3 : index
    %c0_125 = arith.constant 0 : index
    %c0_126 = arith.constant 0 : index
    %150 = vector.load %arg5[%c0_123, %c3_124, %c0_125, %c0_126] : memref<5x11x7x384xf32, #tpu.memory_space<vmem>>, vector<1x7x7x384xf32>
    %151 = vector.shape_cast %150 : vector<1x7x7x384xf32> to vector<7x7x384xf32>
    %152 = vector.shape_cast %149 : vector<384xf32> to vector<1x1x384xf32>
    %153 = vector.broadcast %152 : vector<1x1x384xf32> to vector<7x7x384xf32>
    %154 = arith.mulf %151, %153 : vector<7x7x384xf32>
    %155 = arith.addf %147, %154 : vector<7x7x384xf32>
    %c16 = arith.constant 16 : index
    %c0_127 = arith.constant 0 : index
    %156 = vector.load %arg2[%c16, %c0_127] : memref<25x384xf32, #tpu.memory_space<vmem>>, vector<1x384xf32>
    %157 = vector.shape_cast %156 : vector<1x384xf32> to vector<384xf32>
    %c1_128 = arith.constant 1 : index
    %c3_129 = arith.constant 3 : index
    %c0_130 = arith.constant 0 : index
    %c0_131 = arith.constant 0 : index
    %158 = vector.load %arg5[%c1_128, %c3_129, %c0_130, %c0_131] : memref<5x11x7x384xf32, #tpu.memory_space<vmem>>, vector<1x7x7x384xf32>
    %159 = vector.shape_cast %158 : vector<1x7x7x384xf32> to vector<7x7x384xf32>
    %160 = vector.shape_cast %157 : vector<384xf32> to vector<1x1x384xf32>
    %161 = vector.broadcast %160 : vector<1x1x384xf32> to vector<7x7x384xf32>
    %162 = arith.mulf %159, %161 : vector<7x7x384xf32>
    %163 = arith.addf %155, %162 : vector<7x7x384xf32>
    %c17 = arith.constant 17 : index
    %c0_132 = arith.constant 0 : index
    %164 = vector.load %arg2[%c17, %c0_132] : memref<25x384xf32, #tpu.memory_space<vmem>>, vector<1x384xf32>
    %165 = vector.shape_cast %164 : vector<1x384xf32> to vector<384xf32>
    %c2_133 = arith.constant 2 : index
    %c3_134 = arith.constant 3 : index
    %c0_135 = arith.constant 0 : index
    %c0_136 = arith.constant 0 : index
    %166 = vector.load %arg5[%c2_133, %c3_134, %c0_135, %c0_136] : memref<5x11x7x384xf32, #tpu.memory_space<vmem>>, vector<1x7x7x384xf32>
    %167 = vector.shape_cast %166 : vector<1x7x7x384xf32> to vector<7x7x384xf32>
    %168 = vector.shape_cast %165 : vector<384xf32> to vector<1x1x384xf32>
    %169 = vector.broadcast %168 : vector<1x1x384xf32> to vector<7x7x384xf32>
    %170 = arith.mulf %167, %169 : vector<7x7x384xf32>
    %171 = arith.addf %163, %170 : vector<7x7x384xf32>
    %c18 = arith.constant 18 : index
    %c0_137 = arith.constant 0 : index
    %172 = vector.load %arg2[%c18, %c0_137] : memref<25x384xf32, #tpu.memory_space<vmem>>, vector<1x384xf32>
    %173 = vector.shape_cast %172 : vector<1x384xf32> to vector<384xf32>
    %c3_138 = arith.constant 3 : index
    %c3_139 = arith.constant 3 : index
    %c0_140 = arith.constant 0 : index
    %c0_141 = arith.constant 0 : index
    %174 = vector.load %arg5[%c3_138, %c3_139, %c0_140, %c0_141] : memref<5x11x7x384xf32, #tpu.memory_space<vmem>>, vector<1x7x7x384xf32>
    %175 = vector.shape_cast %174 : vector<1x7x7x384xf32> to vector<7x7x384xf32>
    %176 = vector.shape_cast %173 : vector<384xf32> to vector<1x1x384xf32>
    %177 = vector.broadcast %176 : vector<1x1x384xf32> to vector<7x7x384xf32>
    %178 = arith.mulf %175, %177 : vector<7x7x384xf32>
    %179 = arith.addf %171, %178 : vector<7x7x384xf32>
    %c19 = arith.constant 19 : index
    %c0_142 = arith.constant 0 : index
    %180 = vector.load %arg2[%c19, %c0_142] : memref<25x384xf32, #tpu.memory_space<vmem>>, vector<1x384xf32>
    %181 = vector.shape_cast %180 : vector<1x384xf32> to vector<384xf32>
    %c4_143 = arith.constant 4 : index
    %c3_144 = arith.constant 3 : index
    %c0_145 = arith.constant 0 : index
    %c0_146 = arith.constant 0 : index
    %182 = vector.load %arg5[%c4_143, %c3_144, %c0_145, %c0_146] : memref<5x11x7x384xf32, #tpu.memory_space<vmem>>, vector<1x7x7x384xf32>
    %183 = vector.shape_cast %182 : vector<1x7x7x384xf32> to vector<7x7x384xf32>
    %184 = vector.shape_cast %181 : vector<384xf32> to vector<1x1x384xf32>
    %185 = vector.broadcast %184 : vector<1x1x384xf32> to vector<7x7x384xf32>
    %186 = arith.mulf %183, %185 : vector<7x7x384xf32>
    %187 = arith.addf %179, %186 : vector<7x7x384xf32>
    %c20 = arith.constant 20 : index
    %c0_147 = arith.constant 0 : index
    %188 = vector.load %arg2[%c20, %c0_147] : memref<25x384xf32, #tpu.memory_space<vmem>>, vector<1x384xf32>
    %189 = vector.shape_cast %188 : vector<1x384xf32> to vector<384xf32>
    %c0_148 = arith.constant 0 : index
    %c4_149 = arith.constant 4 : index
    %c0_150 = arith.constant 0 : index
    %c0_151 = arith.constant 0 : index
    %190 = vector.load %arg5[%c0_148, %c4_149, %c0_150, %c0_151] : memref<5x11x7x384xf32, #tpu.memory_space<vmem>>, vector<1x7x7x384xf32>
    %191 = vector.shape_cast %190 : vector<1x7x7x384xf32> to vector<7x7x384xf32>
    %192 = vector.shape_cast %189 : vector<384xf32> to vector<1x1x384xf32>
    %193 = vector.broadcast %192 : vector<1x1x384xf32> to vector<7x7x384xf32>
    %194 = arith.mulf %191, %193 : vector<7x7x384xf32>
    %195 = arith.addf %187, %194 : vector<7x7x384xf32>
    %c21 = arith.constant 21 : index
    %c0_152 = arith.constant 0 : index
    %196 = vector.load %arg2[%c21, %c0_152] : memref<25x384xf32, #tpu.memory_space<vmem>>, vector<1x384xf32>
    %197 = vector.shape_cast %196 : vector<1x384xf32> to vector<384xf32>
    %c1_153 = arith.constant 1 : index
    %c4_154 = arith.constant 4 : index
    %c0_155 = arith.constant 0 : index
    %c0_156 = arith.constant 0 : index
    %198 = vector.load %arg5[%c1_153, %c4_154, %c0_155, %c0_156] : memref<5x11x7x384xf32, #tpu.memory_space<vmem>>, vector<1x7x7x384xf32>
    %199 = vector.shape_cast %198 : vector<1x7x7x384xf32> to vector<7x7x384xf32>
    %200 = vector.shape_cast %197 : vector<384xf32> to vector<1x1x384xf32>
    %201 = vector.broadcast %200 : vector<1x1x384xf32> to vector<7x7x384xf32>
    %202 = arith.mulf %199, %201 : vector<7x7x384xf32>
    %203 = arith.addf %195, %202 : vector<7x7x384xf32>
    %c22 = arith.constant 22 : index
    %c0_157 = arith.constant 0 : index
    %204 = vector.load %arg2[%c22, %c0_157] : memref<25x384xf32, #tpu.memory_space<vmem>>, vector<1x384xf32>
    %205 = vector.shape_cast %204 : vector<1x384xf32> to vector<384xf32>
    %c2_158 = arith.constant 2 : index
    %c4_159 = arith.constant 4 : index
    %c0_160 = arith.constant 0 : index
    %c0_161 = arith.constant 0 : index
    %206 = vector.load %arg5[%c2_158, %c4_159, %c0_160, %c0_161] : memref<5x11x7x384xf32, #tpu.memory_space<vmem>>, vector<1x7x7x384xf32>
    %207 = vector.shape_cast %206 : vector<1x7x7x384xf32> to vector<7x7x384xf32>
    %208 = vector.shape_cast %205 : vector<384xf32> to vector<1x1x384xf32>
    %209 = vector.broadcast %208 : vector<1x1x384xf32> to vector<7x7x384xf32>
    %210 = arith.mulf %207, %209 : vector<7x7x384xf32>
    %211 = arith.addf %203, %210 : vector<7x7x384xf32>
    %c23 = arith.constant 23 : index
    %c0_162 = arith.constant 0 : index
    %212 = vector.load %arg2[%c23, %c0_162] : memref<25x384xf32, #tpu.memory_space<vmem>>, vector<1x384xf32>
    %213 = vector.shape_cast %212 : vector<1x384xf32> to vector<384xf32>
    %c3_163 = arith.constant 3 : index
    %c4_164 = arith.constant 4 : index
    %c0_165 = arith.constant 0 : index
    %c0_166 = arith.constant 0 : index
    %214 = vector.load %arg5[%c3_163, %c4_164, %c0_165, %c0_166] : memref<5x11x7x384xf32, #tpu.memory_space<vmem>>, vector<1x7x7x384xf32>
    %215 = vector.shape_cast %214 : vector<1x7x7x384xf32> to vector<7x7x384xf32>
    %216 = vector.shape_cast %213 : vector<384xf32> to vector<1x1x384xf32>
    %217 = vector.broadcast %216 : vector<1x1x384xf32> to vector<7x7x384xf32>
    %218 = arith.mulf %215, %217 : vector<7x7x384xf32>
    %219 = arith.addf %211, %218 : vector<7x7x384xf32>
    %c24 = arith.constant 24 : index
    %c0_167 = arith.constant 0 : index
    %220 = vector.load %arg2[%c24, %c0_167] : memref<25x384xf32, #tpu.memory_space<vmem>>, vector<1x384xf32>
    %221 = vector.shape_cast %220 : vector<1x384xf32> to vector<384xf32>
    %c4_168 = arith.constant 4 : index
    %c4_169 = arith.constant 4 : index
    %c0_170 = arith.constant 0 : index
    %c0_171 = arith.constant 0 : index
    %222 = vector.load %arg5[%c4_168, %c4_169, %c0_170, %c0_171] : memref<5x11x7x384xf32, #tpu.memory_space<vmem>>, vector<1x7x7x384xf32>
    %223 = vector.shape_cast %222 : vector<1x7x7x384xf32> to vector<7x7x384xf32>
    %224 = vector.shape_cast %221 : vector<384xf32> to vector<1x1x384xf32>
    %225 = vector.broadcast %224 : vector<1x1x384xf32> to vector<7x7x384xf32>
    %226 = arith.mulf %223, %225 : vector<7x7x384xf32>
    %227 = arith.addf %219, %226 : vector<7x7x384xf32>
    %c0_172 = arith.constant 0 : index
    %c0_173 = arith.constant 0 : index
    %c0_174 = arith.constant 0 : index
    %c0_175 = arith.constant 0 : index
    %228 = vector.load %arg3[%c0_172, %c0_173, %c0_174, %c0_175] : memref<1x7x7x384xf32, #tpu.memory_space<vmem>>, vector<1x7x7x384xf32>
    %229 = vector.shape_cast %228 : vector<1x7x7x384xf32> to vector<7x7x384xf32>
    %230 = vector.shape_cast %227 : vector<7x7x384xf32> to vector<1x7x7x384xf32>
    tpu.vector_store %arg3[%c0_172, %c0_173, %c0_174, %c0_175], %230 {strides = array<i32>} : memref<1x7x7x384xf32, #tpu.memory_space<vmem>>, vector<1x7x7x384xf32>,
    return
  }
  func.func @transform_0(%arg0: i32) -> (i32, i32, i32, i32) {
    %c0_i32 = arith.constant 0 : i32
    %c0_i32_0 = arith.constant 0 : i32
    %c0_i32_1 = arith.constant 0 : i32
    %c0_i32_2 = arith.constant 0 : i32
    return %c0_i32, %c0_i32_0, %c0_i32_1, %arg0 : i32, i32, i32, i32
  }
  func.func @transform_1(%arg0: i32) -> (i32, i32) {
    %c0_i32 = arith.constant 0 : i32
    %c0_i32_0 = arith.constant 0 : i32
    return %c0_i32, %arg0 : i32, i32
  }
  func.func @transform_2(%arg0: i32) -> (i32, i32, i32, i32) {
    %c0_i32 = arith.constant 0 : i32
    %c0_i32_0 = arith.constant 0 : i32
    %c0_i32_1 = arith.constant 0 : i32
    %c0_i32_2 = arith.constant 0 : i32
    return %c0_i32, %c0_i32_0, %c0_i32_1, %arg0 : i32, i32, i32, i32
  }
}

</mosaic_0001>

<bundles_post_ra>
// kernel: relu_dwconv2d.1
= control target key start
LH: loop header
LB: loop body
LE: loop exit
PB: predicated region body
PF: predicated region fallthrough
CT: control target
= control target key end

     0   :  { %s3918_s9 = smov 0   ;;  %s3920_s10 = smov 0   ;;  %s5808_s0 = inlined_call_operand.vmem [shape: f32[1,7,7,1152], index: 0, kind: input, shape index: {}]   ;;  %s5809_s1 = inlined_call_operand.vmem [shape: f32[25,1152], index: 1, kind: input, shape index: {}]   ;;  %s5810_s2 = inlined_call_operand.vmem [shape: f32[1,7,7,1152], index: 2, kind: output, shape index: {}]  }
   0x1   :  { %s3922_s11 = smov 0  }
   0x2 LB: > { %s3812_s12 = sadd.s32 4294967295, %s3900_s11   ;;  %s3935_s13 = sadd.s32 1, %s3900_s11   ;;  %s3900_s11 = sphi %s3922_s11, %s6301_s11   ;;  %s3896_s10 = sphi %s3920_s10, %s6300_s10   ;;  %s3892_s9 = sphi %s3918_s9, %s6299_s9  }
   0x3   : > { %s16_s14 = ssub.s32 %s3900_s11, %s3935_s13  ;;  %s19_s15 = sadd.s32 1, %s3896_s10 }
   0x4   : > { %p17_p0 = scmp.eq.s32.totalorder %s16_s14, 0  ;;  %p26_p1 = scmp.ne.s32.totalorder %s3896_s10, %s3892_s9 }
   0x5   : > { %p27_p2 = scmp.eq.s32.totalorder %s3900_s11, 0  ;;  %p82_p3 = scmp.eq.s32.totalorder %s3812_s12, 2 }
   0x6   : > { %s3946_s16 = scalar_select %p17_p0, %s3896_s10, %s19_s15  }
   0x7   : > { %p3948_p4 = por %p27_p2, %p26_p1  ;;  %p3952_p5 = por %p82_p3, %p26_p1 }
   0x8   : > { %p3815_p6 = scmp.ge.s32.totalorder %s3900_s11, 3 }
   0xa   : > { %104 = sbr.rel (%p3815_p6) target bundleno = 44 (0x2c), region = 16 }
  0x11   : > { %107 = sbr.rel (!%p3948_p4) target bundleno = 33 (0x21), region = 20  ;;  %s109_s19 = sand.u32 (%p3948_p4), 1, %s3896_s10  }
  0x12   : > { %s3846_s20 = smul.u32 (%p3948_p4), 24, %s3900_s11 }
  0x13   : > { %s3849_s21 = smul.u32 (%p3948_p4), 168, %s109_s19 }
  0x14   : > { %s3964_s24 = scalar_lea.vmem (%p3948_p4), %s5808_s0, %s3846_s20 }
  0x15   : > { %v127_v0 = vld [vmem:[%s3964_s24] sm:$0xff] (%p3948_p4)  ;;  %v129_v1 = vld [vmem:[%s3964_s24 + $0x8] sm:$0xff] (%p3948_p4)  ;;  %v131_v2 = vld [vmem:[%s3964_s24 + $0x10] sm:$0xff] (%p3948_p4)  ;;  %s3969_s25 = scalar_lea.vmem (%p3948_p4), [#allocation4], %s3849_s21 }
  0x16   : > { %128 = vst [vmem:[%s3969_s25] sm:$0xff] (%p3948_p4), %v127_v0  ;;  %130 = vst [vmem:[%s3969_s25 + $0x8] sm:$0xff] (%p3948_p4), %v129_v1  ;;  %v133_v3 = vld [vmem:[%s3964_s24 + $0x48] sm:$0xff] (%p3948_p4)  ;;  %v135_v4 = vld [vmem:[%s3964_s24 + $0x50] sm:$0xff] (%p3948_p4) }
  0x17   : > { %132 = vst [vmem:[%s3969_s25 + $0x10] sm:$0xff] (%p3948_p4), %v131_v2  ;;  %v137_v5 = vld [vmem:[%s3964_s24 + $0x58] sm:$0xff] (%p3948_p4)  ;;  %134 = vst [vmem:[%s3969_s25 + $0x18] sm:$0xff] (%p3948_p4), %v133_v3  ;;  %v139_v6 = vld [vmem:[%s3964_s24 + $0x90] sm:$0xff] (%p3948_p4) }
  0x18   : > { %136 = vst [vmem:[%s3969_s25 + $0x20] sm:$0xff] %v135_v4  ;;  %138 = vst [vmem:[%s3969_s25 + $0x28] sm:$0xff] %v137_v5  ;;  %v141_v7 = vld [vmem:[%s3964_s24 + $0x98] sm:$0xff]  ;;  %v143_v8 = vld [vmem:[%s3964_s24 + $0xa0] sm:$0xff] }
  0x19   : > { %140 = vst [vmem:[%s3969_s25 + $0x30] sm:$0xff] %v139_v6  ;;  %142 = vst [vmem:[%s3969_s25 + $0x38] sm:$0xff] %v141_v7  ;;  %v145_v9 = vld [vmem:[%s3964_s24 + $0xd8] sm:$0xff]  ;;  %v147_v10 = vld [vmem:[%s3964_s24 + $0xe0] sm:$0xff] }
  0x1a   : > { %144 = vst [vmem:[%s3969_s25 + $0x40] sm:$0xff] %v143_v8  ;;  %v149_v11 = vld [vmem:[%s3964_s24 + $0xe8] sm:$0xff]  ;;  %146 = vst [vmem:[%s3969_s25 + $0x48] sm:$0xff] %v145_v9  ;;  %v151_v12 = vld [vmem:[%s3964_s24 + $0x120] sm:$0xff] }
  0x1b   : > { %148 = vst [vmem:[%s3969_s25 + $0x50] sm:$0xff] %v147_v10  ;;  %150 = vst [vmem:[%s3969_s25 + $0x58] sm:$0xff] %v149_v11  ;;  %v153_v13 = vld [vmem:[%s3964_s24 + $0x128] sm:$0xff]  ;;  %v155_v14 = vld [vmem:[%s3964_s24 + $0x130] sm:$0xff] }
  0x1c   : > { %152 = vst [vmem:[%s3969_s25 + $0x60] sm:$0xff] %v151_v12  ;;  %154 = vst [vmem:[%s3969_s25 + $0x68] sm:$0xff] %v153_v13  ;;  %v157_v15 = vld [vmem:[%s3964_s24 + $0x168] sm:$0xff]  ;;  %v159_v16 = vld [vmem:[%s3964_s24 + $0x170] sm:$0xff] }
  0x1d   : > { %156 = vst [vmem:[%s3969_s25 + $0x70] sm:$0xff] %v155_v14  ;;  %v161_v17 = vld [vmem:[%s3964_s24 + $0x178] sm:$0xff]  ;;  %158 = vst [vmem:[%s3969_s25 + $0x78] sm:$0xff] %v157_v15  ;;  %v163_v18 = vld [vmem:[%s3964_s24 + $0x1b0] sm:$0xff] }
  0x1e   : > { %160 = vst [vmem:[%s3969_s25 + $0x80] sm:$0xff] %v159_v16  ;;  %162 = vst [vmem:[%s3969_s25 + $0x88] sm:$0xff] %v161_v17  ;;  %v165_v19 = vld [vmem:[%s3964_s24 + $0x1b8] sm:$0xff]  ;;  %v167_v20 = vld [vmem:[%s3964_s24 + $0x1c0] sm:$0xff] }
  0x1f   : > { %164 = vst [vmem:[%s3969_s25 + $0x90] sm:$0xff] %v163_v18  ;;  %166 = vst [vmem:[%s3969_s25 + $0x98] sm:$0xff] %v165_v19 }
  0x20   : > { %168 = vst [vmem:[%s3969_s25 + $0xa0] sm:$0xff] %v167_v20 }
  0x21 PF: > { %174 = sbr.rel (!%p3948_p4) target bundleno = 44 (0x2c), region = 43  ;;  %s176_s26 = sand.u32 (%p3948_p4), 1, %s3896_s10  }
  0x22   : > { %s3847_s27 = smul.u32 (%p3948_p4), 24, %s3900_s11 }
  0x23   : > { %s3850_s28 = smul.u32 (%p3948_p4), 96, %s176_s26 }
  0x24   : > { %s181_s3 = scalar_lea.vmem (%p3948_p4), %s5809_s1, %s3847_s27 }
  0x25   : > { %v194_v21 = vld [vmem:[%s181_s3] sm:$0xff] (%p3948_p4)  ;;  %v196_v22 = vld [vmem:[%s181_s3 + $0x8] sm:$0xff] (%p3948_p4)  ;;  %v198_v23 = vld [vmem:[%s181_s3 + $0x10] sm:$0xff] (%p3948_p4)  ;;  %s178_s4 = scalar_lea.vmem (%p3948_p4), [#allocation5], %s3850_s28 }
  0x26   : > { %195 = vst [vmem:[%s178_s4] sm:$0xff] (%p3948_p4), %v194_v21  ;;  %197 = vst [vmem:[%s178_s4 + $0x8] sm:$0xff] (%p3948_p4), %v196_v22  ;;  %v200_v24 = vld [vmem:[%s181_s3 + $0x48] sm:$0xff] (%p3948_p4)  ;;  %v202_v25 = vld [vmem:[%s181_s3 + $0x50] sm:$0xff] (%p3948_p4) }
  0x27   : > { %199 = vst [vmem:[%s178_s4 + $0x10] sm:$0xff] (%p3948_p4), %v198_v23  ;;  %v204_v26 = vld [vmem:[%s181_s3 + $0x58] sm:$0xff] (%p3948_p4)  ;;  %201 = vst [vmem:[%s178_s4 + $0x18] sm:$0xff] (%p3948_p4), %v200_v24  ;;  %v206_v27 = vld [vmem:[%s181_s3 + $0x90] sm:$0xff] (%p3948_p4) }
  0x28   : > { %203 = vst [vmem:[%s178_s4 + $0x20] sm:$0xff] %v202_v25  ;;  %205 = vst [vmem:[%s178_s4 + $0x28] sm:$0xff] %v204_v26  ;;  %v208_v28 = vld [vmem:[%s181_s3 + $0x98] sm:$0xff]  ;;  %v210_v29 = vld [vmem:[%s181_s3 + $0xa0] sm:$0xff] }
  0x29   : > { %207 = vst [vmem:[%s178_s4 + $0x30] sm:$0xff] %v206_v27  ;;  %209 = vst [vmem:[%s178_s4 + $0x38] sm:$0xff] %v208_v28  ;;  %v212_v30 = vld [vmem:[%s181_s3 + $0xd8] sm:$0xff]  ;;  %v214_v31 = vld [vmem:[%s181_s3 + $0xe0] sm:$0xff] }
  0x2a   : > { %211 = vst [vmem:[%s178_s4 + $0x40] sm:$0xff] %v210_v29  ;;  %v216_v32 = vld [vmem:[%s181_s3 + $0xe8] sm:$0xff]  ;;  %213 = vst [vmem:[%s178_s4 + $0x48] sm:$0xff] %v212_v30 }
  0x2b   : > { %215 = vst [vmem:[%s178_s4 + $0x50] sm:$0xff] %v214_v31  ;;  %217 = vst [vmem:[%s178_s4 + $0x58] sm:$0xff] %v216_v32 }
  0x2c PF: > { %p3818_p7 = scmp.ge.s32.totalorder %s3900_s11, 1  ;;  %p222_p8 = scmp.lt.s32.totalorder %s3900_s11, 4 }
  0x2e   : > { %p223_p9 = pnand %p3818_p7, %p222_p8 }
  0x30   : > { %226 = sbr.rel (%p223_p9) target bundleno = 601 (0x259), region = 66 }
  0x37   : > { %s229_s5 = sand.u32 1, %s3892_s9   ;;  %v3902_v33 = vmov 0.0   ;;  %vm841_vm0 = vcmask 1045504   ;;  %vm1140_vm1 = vcmask 1044480   ;;  %vm1439_vm2 = vcmask 1043456   ;;  %s3848_s15 = smul.u32 (%p3952_p5), 24, %s3812_s12 }
  0x38   : > { %263 = vst [vmem:[#allocation2] sm:$0xff] %v3902_v33  ;;  %264 = vst [vmem:[#allocation2 + $0x8] sm:$0xff] %v3902_v33  ;;  %s4088_s6 = smul.u32 168, %s229_s5 }
  0x39   : > { %265 = vst [vmem:[#allocation2 + $0x10] sm:$0xff] %v3902_v33  ;;  %266 = vst [vmem:[#allocation2 + $0x18] sm:$0x7] %v3902_v33  ;;  %s3852_s8 = smul.u32 96, %s229_s5  ;;  %s5760_s18 = scalar_lea.vmem (%p3952_p5), %s5810_s2, %s3848_s15 }
  0x3a   : > { %267 = vst [vmem:[#allocation2 + $0x20] sm:$0x7] %v3902_v33  ;;  %268 = vst [vmem:[#allocation2 + $0x28] sm:$0x7] %v3902_v33  ;;  %s4091_s7 = scalar_lea.vmem [#allocation4], %s4088_s6  ;;  %s5388_s9 = scalar_lea.vmem [#allocation6], %s4088_s6 }
  0x3b   : > { %269 = vst [vmem:[#allocation2 + $0x30] sm:$0xff] %v3902_v33  ;;  %270 = vst [vmem:[#allocation2 + $0x38] sm:$0xff] %v3902_v33  ;;  %v329_v34 = vld [vmem:[%s4091_s7] sm:$0x7f]  ;;  %v330_v35 = vld [vmem:[%s4091_s7 + $0x8] sm:$0x7f] }
  0x3c   : > { %271 = vst [vmem:[#allocation2 + $0x40] sm:$0xff] %v3902_v33  ;;  %272 = vst [vmem:[#allocation2 + $0x48] sm:$0x7] %v3902_v33  ;;  %v350_v36 = vmax.f32 %v329_v34, 0.0  ;;  %v351_v37 = vmax.f32 %v330_v35, 0.0  ;;  %s4128_s14 = scalar_lea.vmem [#allocation5], %s3852_s8 }
  0x3d   : > { %273 = vst [vmem:[#allocation2 + $0x50] sm:$0x7] %v3902_v33  ;;  %274 = vst [vmem:[#allocation2 + $0x58] sm:$0x7] %v3902_v33  ;;  %v331_v38 = vld [vmem:[%s4091_s7 + $0x10] sm:$0x7f] }
  0x3e   : > { %275 = vst [vmem:[#allocation2 + $0x60] sm:$0xff] %v3902_v33  ;;  %276 = vst [vmem:[#allocation2 + $0x68] sm:$0xff] %v3902_v33  ;;  %v332_v39 = vld [vmem:[%s4091_s7 + $0x18] sm:$0x7f]  ;;  %v352_v40 = vmax.f32 %v331_v38, 0.0  ;;  %v392_v44 = vrot.slane %v350_v36, 6 }
  0x3f   : > { %277 = vst [vmem:[#allocation2 + $0x70] sm:$0xff] %v3902_v33  ;;  %278 = vst [vmem:[#allocation2 + $0x78] sm:$0x7] %v3902_v33  ;;  %v353_v41 = vmax.f32 %v332_v39, 0.0  ;;  %v333_v42 = vld [vmem:[%s4091_s7 + $0x20] sm:$0x7f] }
  0x40   : > { %279 = vst [vmem:[#allocation2 + $0x80] sm:$0x7] %v3902_v33  ;;  %280 = vst [vmem:[#allocation2 + $0x88] sm:$0x7] %v3902_v33  ;;  %v334_v43 = vld [vmem:[%s4091_s7 + $0x28] sm:$0x7f] }
  0x41   : > { %281 = vst [vmem:[#allocation2 + $0x90] sm:$0xff] %v3902_v33  ;;  %282 = vst [vmem:[#allocation2 + $0x98] sm:$0xff] %v3902_v33  ;;  %v393_v45 = vrot.slane %v351_v37, 6  ;;  %v354_v46 = vmax.f32 %v333_v42, 0.0  ;;  %v355_v47 = vmax.f32 %v334_v43, 0.0  ;;  %v394_v49 = vrot.slane %v352_v40, 6 }
  0x42   : > { %283 = vst [vmem:[#allocation2 + $0xa0] sm:$0xff] %v3902_v33  ;;  %284 = vst [vmem:[#allocation2 + $0xa8] sm:$0x7] %v3902_v33  ;;  %v335_v48 = vld [vmem:[%s4091_s7 + $0x30] sm:$0x7f]  ;;  %v395_v50 = vrot.slane %v353_v41, 6 }
  0x43   : > { %285 = vst [vmem:[#allocation2 + $0xb0] sm:$0x7] %v3902_v33  ;;  %286 = vst [vmem:[#allocation2 + $0xb8] sm:$0x7] %v3902_v33  ;;  %v356_v51 = vmax.f32 %v335_v48, 0.0  ;;  %v396_v53 = vrot.slane %v354_v46, 6 }
  0x44   : > { %287 = vst [vmem:[#allocation2 + $0xc0] sm:$0xff] %v3902_v33  ;;  %288 = vst [vmem:[#allocation2 + $0xc8] sm:$0xff] %v3902_v33  ;;  %v336_v52 = vld [vmem:[%s4091_s7 + $0x38] sm:$0x7f]  ;;  %v397_v54 = vrot.slane %v355_v47, 6 }
  0x45   : > { %289 = vst [vmem:[#allocation2 + $0xd0] sm:$0xff] %v3902_v33  ;;  %290 = vst [vmem:[#allocation2 + $0xd8] sm:$0x7] %v3902_v33  ;;  %v357_v55 = vmax.f32 %v336_v52, 0.0  ;;  %v337_v56 = vld [vmem:[%s4091_s7 + $0x40] sm:$0x7f] }
  0x46   : > { %291 = vst [vmem:[#allocation2 + $0xe0] sm:$0x7] %v3902_v33  ;;  %292 = vst [vmem:[#allocation2 + $0xe8] sm:$0x7] %v3902_v33  ;;  %v398_v57 = vrot.slane %v356_v51, 6  ;;  %v358_v58 = vmax.f32 %v337_v56, 0.0 }
  0x47   : > { %293 = vst [vmem:[#allocation2 + $0xf0] sm:$0xff] %v3902_v33  ;;  %294 = vst [vmem:[#allocation2 + $0xf8] sm:$0xff] %v3902_v33  ;;  %v338_v59 = vld [vmem:[%s4091_s7 + $0x48] sm:$0x7f]  ;;  %v339_v60 = vld [vmem:[%s4091_s7 + $0x50] sm:$0x7f] }
  0x48   : > { %295 = vst [vmem:[#allocation2 + $0x100] sm:$0xff] %v3902_v33  ;;  %296 = vst [vmem:[#allocation2 + $0x108] sm:$0x7] %v3902_v33  ;;  %v399_v61 = vrot.slane %v357_v55, 6  ;;  %v359_v62 = vmax.f32 %v338_v59, 0.0  ;;  %v360_v63 = vmax.f32 %v339_v60, 0.0 }
  0x49   : > { %297 = vst [vmem:[#allocation2 + $0x110] sm:$0x7] %v3902_v33  ;;  %298 = vst [vmem:[#allocation2 + $0x118] sm:$0x7] %v3902_v33  ;;  %v340_v0 = vld [vmem:[%s4091_s7 + $0x58] sm:$0x7f] }
  0x4a   : > { %299 = vst [vmem:[#allocation2 + $0x120] sm:$0xff] %v3902_v33  ;;  %300 = vst [vmem:[#allocation2 + $0x128] sm:$0xff] %v3902_v33  ;;  %v400_v1 = vrot.slane %v358_v58, 6  ;;  %v361_v2 = vmax.f32 %v340_v0, 0.0  ;;  %v341_v3 = vld [vmem:[%s4091_s7 + $0x60] sm:$0x7f] }
  0x4b   : > { %301 = vst [vmem:[#allocation2 + $0x130] sm:$0xff] %v3902_v33  ;;  %302 = vst [vmem:[#allocation2 + $0x138] sm:$0x7] %v3902_v33  ;;  %v342_v4 = vld [vmem:[%s4091_s7 + $0x68] sm:$0x7f]  ;;  %v401_v5 = vrot.slane %v359_v62, 6 }
  0x4c   : > { %303 = vst [vmem:[#allocation2 + $0x140] sm:$0x7] %v3902_v33  ;;  %304 = vst [vmem:[#allocation2 + $0x148] sm:$0x7] %v3902_v33  ;;  %v402_v6 = vrot.slane %v360_v63, 6  ;;  %v362_v7 = vmax.f32 %v341_v3, 0.0 }
  0x4d   : > { %305 = vst [vmem:[#allocation2 + $0x150] sm:$0xff] %v3902_v33  ;;  %306 = vst [vmem:[#allocation2 + $0x158] sm:$0xff] %v3902_v33  ;;  %v363_v8 = vmax.f32 %v342_v4, 0.0  ;;  %v343_v9 = vld [vmem:[%s4091_s7 + $0x70] sm:$0x7f]  ;;  %v403_v10 = vrot.slane %v361_v2, 6 }
  0x4e   : > { %307 = vst [vmem:[#allocation2 + $0x160] sm:$0xff] %v3902_v33  ;;  %308 = vst [vmem:[#allocation2 + $0x168] sm:$0x7] %v3902_v33  ;;  %v364_v11 = vmax.f32 %v343_v9, 0.0  ;;  %v477_v12 = vld [vmem:[#allocation2] sm:$0x7f] }
  0x4f   : > { %309 = vst [vmem:[#allocation2 + $0x170] sm:$0x7] %v3902_v33  ;;  %310 = vst [vmem:[#allocation2 + $0x178] sm:$0x7] %v3902_v33  ;;  %v478_v13 = vld [vmem:[#allocation2 + $0x8] sm:$0x7f] }
  0x50   : > { %311 = vst [vmem:[#allocation2 + $0x180] sm:$0xff] %v3902_v33  ;;  %312 = vst [vmem:[#allocation2 + $0x188] sm:$0xff] %v3902_v33  ;;  %v404_v14 = vrot.slane %v362_v7, 6  ;;  %v405_v15 = vrot.slane %v363_v8, 6  ;;  %v406_v16 = vrot.slane %v364_v11, 6 }
  0x51   : > { %313 = vst [vmem:[#allocation2 + $0x190] sm:$0xff] %v3902_v33  ;;  %314 = vst [vmem:[#allocation2 + $0x198] sm:$0x7] %v3902_v33  ;;  %v479_v17 = vld [vmem:[#allocation2 + $0x10] sm:$0x7f] }
  0x52   : > { %315 = vst [vmem:[#allocation2 + $0x1a0] sm:$0x7] %v3902_v33  ;;  %316 = vst [vmem:[#allocation2 + $0x1a8] sm:$0x7] %v3902_v33  ;;  %v480_v18 = vld [vmem:[#allocation2 + $0x30] sm:$0x7f] }
  0x53   : > { %317 = vst [vmem:[#allocation2 + $0x1b0] sm:$0xff] %v3902_v33  ;;  %318 = vst [vmem:[#allocation2 + $0x1b8] sm:$0xff] %v3902_v33  ;;  %v481_v19 = vld [vmem:[#allocation2 + $0x38] sm:$0x7f]  ;;  %v482_v20 = vld [vmem:[#allocation2 + $0x40] sm:$0x7f] }
  0x54   : > { %319 = vst [vmem:[#allocation2 + $0x1c0] sm:$0xff] %v3902_v33  ;;  %320 = vst [vmem:[#allocation2 + $0x1c8] sm:$0x7] %v3902_v33  ;;  %v543_v21 = vld [vmem:[#allocation2] sm:$0xfe] }
  0x55   : > { %321 = vst [vmem:[#allocation2 + $0x1d0] sm:$0x7] %v3902_v33  ;;  %322 = vst [vmem:[#allocation2 + $0x1d8] sm:$0x7] %v3902_v33  ;;  %v544_v22 = vld [vmem:[#allocation2 + $0x8] sm:$0xfe] }
  0x56   : > { %323 = vst [vmem:[#allocation2 + $0x1e0] sm:$0xff] %v3902_v33  ;;  %324 = vst [vmem:[#allocation2 + $0x1e8] sm:$0xff] %v3902_v33  ;;  %v609_v23 = vrot.slane %v543_v21, 1  ;;  %v610_v24 = vrot.slane %v544_v22, 1  ;;  %v545_v25 = vld [vmem:[#allocation2 + $0x10] sm:$0xfe] }
  0x57   : > { %325 = vst [vmem:[#allocation2 + $0x1f0] sm:$0xff] %v3902_v33  ;;  %326 = vst [vmem:[#allocation2 + $0x1f8] sm:$0x7] %v3902_v33  ;;  %v546_v26 = vld [vmem:[#allocation2 + $0x30] sm:$0xfe]  ;;  %v611_v28 = vrot.slane %v545_v25, 1 }
  0x58   : > { %327 = vst [vmem:[#allocation2 + $0x200] sm:$0x7] %v3902_v33  ;;  %328 = vst [vmem:[#allocation2 + $0x208] sm:$0x7] %v3902_v33  ;;  %v547_v27 = vld [vmem:[#allocation2 + $0x38] sm:$0xfe] }
  0x59   : > { %435 = vst [vmem:[#allocation2 + $0x60] sm:$0xfc] %v392_v44  ;;  %438 = vst [vmem:[#allocation2 + $0x78] sm:$0x1] %v392_v44  ;;  %v612_v29 = vrot.slane %v546_v26, 1  ;;  %v613_v30 = vrot.slane %v547_v27, 1 }
  0x5a   : > { %436 = vst [vmem:[#allocation2 + $0x68] sm:$0xfc] %v393_v45  ;;  %439 = vst [vmem:[#allocation2 + $0x80] sm:$0x1] %v393_v45  ;;  %v548_v31 = vld [vmem:[#allocation2 + $0x40] sm:$0xfe] }
  0x5b   : > { %437 = vst [vmem:[#allocation2 + $0x70] sm:$0xfc] %v394_v49  ;;  %440 = vst [vmem:[#allocation2 + $0x88] sm:$0x1] %v394_v49  ;;  %v614_v32 = vrot.slane %v548_v31, 1 }
  0x5c   : > { %441 = vst [vmem:[#allocation2 + $0x90] sm:$0xfc] %v395_v50  ;;  %444 = vst [vmem:[#allocation2 + $0xa8] sm:$0x1] %v395_v50  ;;  %v709_v33 = vld [vmem:[#allocation2] sm:$0xfc] }
  0x5d   : > { %442 = vst [vmem:[#allocation2 + $0x98] sm:$0xfc] %v396_v53  ;;  %445 = vst [vmem:[#allocation2 + $0xb0] sm:$0x1] %v396_v53  ;;  %v712_v34 = vld [vmem:[#allocation2 + $0x18] sm:$0x1] }
  0x5e   : > { %443 = vst [vmem:[#allocation2 + $0xa0] sm:$0xfc] %v397_v54  ;;  %446 = vst [vmem:[#allocation2 + $0xb8] sm:$0x1] %v397_v54  ;;  %v842_v35 = vrot.slane %v709_v33, 2  ;;  %v843_v36 = vrot.slane %v712_v34, 2 }
  0x5f   : > { %447 = vst [vmem:[#allocation2 + $0xc0] sm:$0xfc] %v398_v57  ;;  %450 = vst [vmem:[#allocation2 + $0xd8] sm:$0x1] %v398_v57  ;;  %v710_v37 = vld [vmem:[#allocation2 + $0x8] sm:$0xfc] }
  0x60   : > { %448 = vst [vmem:[#allocation2 + $0xc8] sm:$0xfc] %v399_v61  ;;  %451 = vst [vmem:[#allocation2 + $0xe0] sm:$0x1] %v399_v61  ;;  %v844_v38 = vsel %vm841_vm0, %v842_v35, %v843_v36  ;;  %v713_v39 = vld [vmem:[#allocation2 + $0x20] sm:$0x1] }
  0x61   : > { %449 = vst [vmem:[#allocation2 + $0xd0] sm:$0xfc] %v400_v1  ;;  %452 = vst [vmem:[#allocation2 + $0xe8] sm:$0x1] %v400_v1  ;;  %v845_v40 = vrot.slane %v710_v37, 2  ;;  %v846_v41 = vrot.slane %v713_v39, 2 }
  0x62   : > { %453 = vst [vmem:[#allocation2 + $0xf0] sm:$0xfc] %v401_v5  ;;  %456 = vst [vmem:[#allocation2 + $0x108] sm:$0x1] %v401_v5  ;;  %v711_v42 = vld [vmem:[#allocation2 + $0x10] sm:$0xfc] }
  0x63   : > { %454 = vst [vmem:[#allocation2 + $0xf8] sm:$0xfc] %v402_v6  ;;  %457 = vst [vmem:[#allocation2 + $0x110] sm:$0x1] %v402_v6  ;;  %v714_v43 = vld [vmem:[#allocation2 + $0x28] sm:$0x1]  ;;  %v847_v45 = vsel %vm841_vm0, %v845_v40, %v846_v41 }
  0x64   : > { %510 = vst [vmem:[#allocation3] sm:$0x7f] %v477_v12  ;;  %511 = vst [vmem:[#allocation3 + $0x8] sm:$0x7f] %v478_v13  ;;  %v715_v44 = vld [vmem:[#allocation2 + $0x30] sm:$0xfc] }
  0x65   : > { %455 = vst [vmem:[#allocation2 + $0x100] sm:$0xfc] %v403_v10  ;;  %458 = vst [vmem:[#allocation2 + $0x118] sm:$0x1] %v403_v10  ;;  %v718_v46 = vld [vmem:[#allocation2 + $0x48] sm:$0x1] }
  0x66   : > { %459 = vst [vmem:[#allocation2 + $0x120] sm:$0xfc] %v404_v14  ;;  %462 = vst [vmem:[#allocation2 + $0x138] sm:$0x1] %v404_v14  ;;  %v716_v47 = vld [vmem:[#allocation2 + $0x38] sm:$0xfc] }
  0x67   : > { %460 = vst [vmem:[#allocation2 + $0x128] sm:$0xfc] %v405_v15  ;;  %463 = vst [vmem:[#allocation2 + $0x140] sm:$0x1] %v405_v15  ;;  %v848_v48 = vrot.slane %v711_v42, 2  ;;  %v849_v49 = vrot.slane %v714_v43, 2  ;;  %v1629_v42 = vlaneseq }
  0x68   : > { %512 = vst [vmem:[#allocation3 + $0x10] sm:$0x7f] %v479_v17  ;;  %513 = vst [vmem:[#allocation3 + $0x18] sm:$0x7f] %v480_v18  ;;  %v851_v50 = vrot.slane %v715_v44, 2  ;;  %v852_v52 = vrot.slane %v718_v46, 2 }
  0x69   : > { %461 = vst [vmem:[#allocation2 + $0x130] sm:$0xfc] %v406_v16  ;;  %464 = vst [vmem:[#allocation2 + $0x148] sm:$0x1] %v406_v16  ;;  %v719_v51 = vld [vmem:[#allocation2 + $0x50] sm:$0x1]  ;;  %v850_v56 = vsel %vm841_vm0, %v848_v48, %v849_v49 }
  0x6a   : > { %514 = vst [vmem:[#allocation3 + $0x20] sm:$0x7f] %v481_v19  ;;  %515 = vst [vmem:[#allocation3 + $0x28] sm:$0x7f] %v482_v20  ;;  %v854_v53 = vrot.slane %v716_v47, 2  ;;  %v855_v57 = vrot.slane %v719_v51, 2  ;;  %v853_v60 = vsel %vm841_vm0, %v851_v50, %v852_v52 }
  0x6b   : > { %676 = vst [vmem:[#allocation3 + $0x108] sm:$0x7f] %v609_v23  ;;  %677 = vst [vmem:[#allocation3 + $0x110] sm:$0x7f] %v610_v24  ;;  %v717_v54 = vld [vmem:[#allocation2 + $0x40] sm:$0xfc] }
  0x6c   : > { %678 = vst [vmem:[#allocation3 + $0x118] sm:$0x7f] %v611_v28  ;;  %679 = vst [vmem:[#allocation3 + $0x120] sm:$0x7f] %v612_v29  ;;  %v720_v55 = vld [vmem:[#allocation2 + $0x58] sm:$0x1]  ;;  %v856_v63 = vsel %vm841_vm0, %v854_v53, %v855_v57 }
  0x6d   : > { %680 = vst [vmem:[#allocation3 + $0x128] sm:$0x7f] %v613_v30  ;;  %681 = vst [vmem:[#allocation3 + $0x130] sm:$0x7f] %v614_v32  ;;  %v857_v58 = vrot.slane %v717_v54, 2  ;;  %v858_v61 = vrot.slane %v720_v55, 2 }
  0x6e   : > { %975 = vst [vmem:[#allocation3 + $0x210] sm:$0x7f] %v844_v38  ;;  %976 = vst [vmem:[#allocation3 + $0x218] sm:$0x7f] %v847_v45  ;;  %v1008_v59 = vld [vmem:[#allocation2] sm:$0xf8] }
  0x6f   : > { %977 = vst [vmem:[#allocation3 + $0x220] sm:$0x7f] %v850_v56  ;;  %v1011_v62 = vld [vmem:[#allocation2 + $0x18] sm:$0x3]  ;;  %978 = vst [vmem:[#allocation3 + $0x228] sm:$0x7f] %v853_v60  ;;  %v859_v4 = vsel %vm841_vm0, %v857_v58, %v858_v61 }
  0x70   : > { %v1141_v0 = vrot.slane %v1008_v59, 3  ;;  %v1142_v1 = vrot.slane %v1011_v62, 3  ;;  %v1009_v2 = vld [vmem:[#allocation2 + $0x8] sm:$0xf8]  ;;  %v1012_v3 = vld [vmem:[#allocation2 + $0x20] sm:$0x3] }
  0x71   : > { %979 = vst [vmem:[#allocation3 + $0x230] sm:$0x7f] %v856_v63  ;;  %v1144_v5 = vrot.slane %v1009_v2, 3  ;;  %v1145_v6 = vrot.slane %v1012_v3, 3  ;;  %v1010_v7 = vld [vmem:[#allocation2 + $0x10] sm:$0xf8] }
  0x72   : > { %v1013_v8 = vld [vmem:[#allocation2 + $0x28] sm:$0x3]  ;;  %980 = vst [vmem:[#allocation3 + $0x238] sm:$0x7f] %v859_v4  ;;  %v1143_v9 = vsel %vm1140_vm1, %v1141_v0, %v1142_v1  ;;  %v1147_v10 = vrot.slane %v1010_v7, 3  ;;  %v1630_v43 = vshrl.u32 %v1629_v42, 7 }
  0x73   : > { %v1148_v11 = vrot.slane %v1013_v8, 3  ;;  %v1014_v12 = vld [vmem:[#allocation2 + $0x30] sm:$0xf8]  ;;  %1274 = vst [vmem:[#allocation3 + $0x318] sm:$0x7f] %v1143_v9  ;;  %v1146_v13 = vsel %vm1140_vm1, %v1144_v5, %v1145_v6 }
  0x74   : > { %v1017_v14 = vld [vmem:[#allocation2 + $0x48] sm:$0x3]  ;;  %v1150_v15 = vrot.slane %v1014_v12, 3  ;;  %1275 = vst [vmem:[#allocation3 + $0x320] sm:$0x7f] %v1146_v13  ;;  %v4122_v44 = vsub.s32 0, %v1630_v43 }
  0x75   : > { %v1149_v16 = vsel %vm1140_vm1, %v1147_v10, %v1148_v11  ;;  %v1151_v17 = vrot.slane %v1017_v14, 3  ;;  %v1015_v18 = vld [vmem:[#allocation2 + $0x38] sm:$0xf8]  ;;  %v1018_v19 = vld [vmem:[#allocation2 + $0x50] sm:$0x3]  ;;  %v4124_v45 = vsub.s32 1, %v1630_v43 }
  0x76   : > { %1276 = vst [vmem:[#allocation3 + $0x328] sm:$0x7f] %v1149_v16  ;;  %v1153_v20 = vrot.slane %v1015_v18, 3  ;;  %v1154_v21 = vrot.slane %v1018_v19, 3  ;;  %v1016_v22 = vld [vmem:[#allocation2 + $0x40] sm:$0xf8] }
  0x77   : > { %v1019_v23 = vld [vmem:[#allocation2 + $0x58] sm:$0x3]  ;;  %v1152_v24 = vsel %vm1140_vm1, %v1150_v15, %v1151_v17  ;;  %v1156_v25 = vrot.slane %v1016_v22, 3  ;;  %v483_v27 = vld [vmem:[#allocation2 + $0x60] sm:$0x7f]  ;;  %5961 = vst [vmem:[#allocation7_spill] sm:$0xff] %v4122_v44 }
  0x78   : > { %v1157_v26 = vrot.slane %v1019_v23, 3  ;;  %1277 = vst [vmem:[#allocation3 + $0x330] sm:$0x7f] %v1152_v24  ;;  %v1155_v28 = vsel %vm1140_vm1, %v1153_v20, %v1154_v21  ;;  %516 = vst [vmem:[#allocation3 + $0x30] sm:$0x7f] %v483_v27  ;;  %v4126_v46 = vsub.s32 2, %v1630_v43 }
  0x79   : > { %v484_v29 = vld [vmem:[#allocation2 + $0x68] sm:$0x7f]  ;;  %1278 = vst [vmem:[#allocation3 + $0x338] sm:$0x7f] %v1155_v28  ;;  %v485_v31 = vld [vmem:[#allocation2 + $0x70] sm:$0x7f] }
  0x7a   : > { %v1158_v30 = vsel %vm1140_vm1, %v1156_v25, %v1157_v26  ;;  %517 = vst [vmem:[#allocation3 + $0x38] sm:$0x7f] %v484_v29  ;;  %518 = vst [vmem:[#allocation3 + $0x40] sm:$0x7f] %v485_v31  ;;  %v486_v32 = vld [vmem:[#allocation2 + $0x90] sm:$0x7f] }
  0x7b   : > { %1279 = vst [vmem:[#allocation3 + $0x340] sm:$0x7f] %v1158_v30  ;;  %519 = vst [vmem:[#allocation3 + $0x48] sm:$0x7f] %v486_v32  ;;  %v487_v33 = vld [vmem:[#allocation2 + $0x98] sm:$0x7f] }
  0x7c   : > { %v488_v34 = vld [vmem:[#allocation2 + $0xa0] sm:$0x7f]  ;;  %520 = vst [vmem:[#allocation3 + $0x50] sm:$0x7f] %v487_v33  ;;  %v490_v36 = vld [vmem:[#allocation2 + $0xc8] sm:$0x7f] }
  0x7d   : > { %521 = vst [vmem:[#allocation3 + $0x58] sm:$0x7f] %v488_v34  ;;  %v489_v35 = vld [vmem:[#allocation2 + $0xc0] sm:$0x7f]  ;;  %523 = vst [vmem:[#allocation3 + $0x68] sm:$0x7f] %v490_v36 }
  0x7e   : > { %522 = vst [vmem:[#allocation3 + $0x60] sm:$0x7f] %v489_v35  ;;  %v491_v37 = vld [vmem:[#allocation2 + $0xd0] sm:$0x7f]  ;;  %v493_v39 = vld [vmem:[#allocation2 + $0xf8] sm:$0x7f] }
  0x7f   : > { %v492_v38 = vld [vmem:[#allocation2 + $0xf0] sm:$0x7f]  ;;  %524 = vst [vmem:[#allocation3 + $0x70] sm:$0x7f] %v491_v37  ;;  %v494_v40 = vld [vmem:[#allocation2 + $0x100] sm:$0x7f] }
  0x80   : > { %525 = vst [vmem:[#allocation3 + $0x78] sm:$0x7f] %v492_v38  ;;  %v495_v41 = vld [vmem:[#allocation2 + $0x120] sm:$0x7f]  ;;  %526 = vst [vmem:[#allocation3 + $0x80] sm:$0x7f] %v493_v39 }
  0x81   : > { %527 = vst [vmem:[#allocation3 + $0x88] sm:$0x7f] %v494_v40  ;;  %528 = vst [vmem:[#allocation3 + $0x90] sm:$0x7f] %v495_v41  ;;  %v1607_v51 = vld [vmem:[#allocation3] sm:$0x7f] }
  0x82   : > { %5962 = vst [vmem:[#allocation8_spill] sm:$0xff] %v4124_v45  ;;  %5963 = vst [vmem:[#allocation9_spill] sm:$0xff] %v4126_v46  ;;  %v1606_v47 = vld [vmem:[%s4128_s14] ss:$8 sm:$0x7] }
  0x83   : > { %v3823_v48 = vld [vmem:[%s4128_s14 + $0x5] ss:$8 sm:$0x7]  ;;  %v3819_v49 = vld [vmem:[%s4128_s14 + $0x1] ss:$8 sm:$0x7]  ;;  %v4135_v52 = vrot.slane %v1606_v47, %v4122_v44  ;;  %v4138_v54 = vrot.slane %v1606_v47, %v4124_v45  ;;  %v4141_v56 = vrot.slane %v1606_v47, %v4126_v46 }
  0x84   : > { %v3824_v50 = vld [vmem:[%s4128_s14 + $0x6] ss:$8 sm:$0x7]  ;;  %v1609_v55 = vld [vmem:[#allocation3 + $0x10] sm:$0x7f]  ;;  %v4144_v59 = vrot.slane %v3823_v48, %v4122_v44  ;;  %v4147_v60 = vrot.slane %v3823_v48, %v4124_v45  ;;  %v4150_v62 = vrot.slane %v3823_v48, %v4126_v46  ;;  %v4153_v63 = vrot.slane %v3819_v49, %v4122_v44 }
  0x85   : > { %v1608_v53 = vld [vmem:[#allocation3 + $0x8] sm:$0x7f]  ;;  %v1610_v57 = vld [vmem:[#allocation3 + $0x18] sm:$0x7f]  ;;  %v4156_v0 = vrot.slane %v3819_v49, %v4124_v45  ;;  %v4159_v1 = vrot.slane %v3819_v49, %v4126_v46  ;;  %v497_v3 = vld [vmem:[#allocation2 + $0x130] sm:$0x7f]  ;;  %v4162_v9 = vrot.slane %v3824_v50, %v4122_v44  ;;  %v4165_v10 = vrot.slane %v3824_v50, %v4124_v45 }
  0x86   : > { %v2013_v58 = vld [vmem:[#allocation3 + $0x18] sm:$0x7f]  ;;  %5964 = vst [vmem:[#allocation10_spill] sm:$0xff] %v4144_v59  ;;  %5965 = vst [vmem:[#allocation11_spill] sm:$0xff] %v4147_v60  ;;  %v1688_v61 = vld [vmem:[#allocation3 + $0x108] sm:$0x7f]  ;;  %v4168_v11 = vrot.slane %v3824_v50, %v4126_v46  ;;  %v1644_v14 = vmul.f32 %v4135_v52, %v1607_v51  ;;  %v1645_v15 = vmul.f32 %v4138_v54, %v1608_v53 }
  0x87   : > { %5966 = vst [vmem:[#allocation12_spill] sm:$0xff] %v4150_v62  ;;  %v496_v2 = vld [vmem:[#allocation2 + $0x128] sm:$0x7f]  ;;  %v1307_v4 = vld [vmem:[#allocation2] sm:$0xf0]  ;;  %5967 = vst [vmem:[#allocation13_spill] sm:$0xff] %v4162_v9  ;;  %v4173_v16 = vmul.f32 %v4141_v56, %v1609_v55  ;;  %v4176_v21 = vmul.f32 %v4135_v52, %v1610_v57  ;;  %v4179_v22 = vmul.f32 %v4144_v59, %v2013_v58 }
  0x88   : > { %v1611_v5 = vld [vmem:[#allocation3 + $0x20] sm:$0x7f]  ;;  %v1612_v7 = vld [vmem:[#allocation3 + $0x28] sm:$0x7f]  ;;  %v1689_v8 = vld [vmem:[#allocation3 + $0x110] sm:$0x7f]  ;;  %v1725_v28 = vmul.f32 %v4153_v63, %v1688_v61 }
  0x89   : > { %v2014_v6 = vld [vmem:[#allocation3 + $0x20] sm:$0x7f]  ;;  %5968 = vst [vmem:[#allocation14_spill] sm:$0xff] %v4165_v10  ;;  %5969 = vst [vmem:[#allocation15_spill] sm:$0xff] %v4168_v11  ;;  %v1310_v12 = vld [vmem:[#allocation2 + $0x18] sm:$0x7]  ;;  %v1726_v35 = vmul.f32 %v4156_v0, %v1689_v8  ;;  %v1648_v41 = vmul.f32 %v4138_v54, %v1611_v5  ;;  %v1649_v43 = vmul.f32 %v4141_v56, %v1612_v7 }
  0x8a   : > { %529 = vst [vmem:[#allocation3 + $0x98] sm:$0x7f] %v496_v2  ;;  %530 = vst [vmem:[#allocation3 + $0xa0] sm:$0x7f] %v497_v3  ;;  %v1440_v13 = vrot.slane %v1307_v4, 4  ;;  %v1441_v18 = vrot.slane %v1310_v12, 4  ;;  %v4188_v42 = vmul.f32 %v4147_v60, %v2014_v6  ;;  %v1746_v8 = vadd.f32 %v1725_v28, %v1644_v14 }
  0x8b   : > { %v2015_v17 = vld [vmem:[#allocation3 + $0x28] sm:$0x7f]  ;;  %v1308_v19 = vld [vmem:[#allocation2 + $0x8] sm:$0xf0]  ;;  %v1311_v20 = vld [vmem:[#allocation2 + $0x20] sm:$0x7]  ;;  %v4205_v12 = vadd.f32 %v1726_v35, %v1645_v15 }
  0x8c   : > { %v3820_v23 = vld [vmem:[%s4128_s14 + $0x2] ss:$8 sm:$0x7]  ;;  %v1443_v24 = vrot.slane %v1308_v19, 4  ;;  %v1444_v25 = vrot.slane %v1311_v20, 4  ;;  %v1442_v30 = vsel %vm1439_vm2, %v1440_v13, %v1441_v18  ;;  %v4193_v51 = vmul.f32 %v4150_v62, %v2015_v17 }
  0x8d   : > { %v1309_v26 = vld [vmem:[#allocation2 + $0x10] sm:$0xf0]  ;;  %v1312_v27 = vld [vmem:[#allocation2 + $0x28] sm:$0x7]  ;;  %1573 = vst [vmem:[#allocation3 + $0x420] sm:$0x7f] %v1442_v30  ;;  %v4197_v4 = vrot.slane %v3820_v23, %v4122_v44  ;;  %v4200_v5 = vrot.slane %v3820_v23, %v4124_v45  ;;  %v4203_v6 = vrot.slane %v3820_v23, %v4126_v46 }
  0x8e   : > { %v1690_v29 = vld [vmem:[#allocation3 + $0x118] sm:$0x7f]  ;;  %v1446_v31 = vrot.slane %v1309_v26, 4  ;;  %v1447_v32 = vrot.slane %v1312_v27, 4  ;;  %v1313_v33 = vld [vmem:[#allocation2 + $0x30] sm:$0xf0]  ;;  %v1445_v38 = vsel %vm1439_vm2, %v1443_v24, %v1444_v25 }
  0x8f   : > { %v1316_v34 = vld [vmem:[#allocation2 + $0x48] sm:$0x7]  ;;  %v1691_v36 = vld [vmem:[#allocation3 + $0x120] sm:$0x7f]  ;;  %v1449_v39 = vrot.slane %v1313_v33, 4  ;;  %5970 = vst [vmem:[#allocation16_spill] sm:$0xff] %v4197_v4  ;;  %v1727_v13 = vmul.f32 %v4159_v1, %v1690_v29 }
  0x90   : > { %v2095_v37 = vld [vmem:[#allocation3 + $0x120] sm:$0x7f]  ;;  %v1450_v40 = vrot.slane %v1316_v34, 4  ;;  %1574 = vst [vmem:[#allocation3 + $0x428] sm:$0x7f] %v1445_v38  ;;  %v1448_v47 = vsel %vm1439_vm2, %v1446_v31, %v1447_v32  ;;  %5971 = vst [vmem:[#allocation17_spill] sm:$0xff] %v4200_v5  ;;  %v1728_v20 = vmul.f32 %v4153_v63, %v1691_v36 }
  0x91   : > { %v1314_v48 = vld [vmem:[#allocation2 + $0x38] sm:$0xf0]  ;;  %v1317_v49 = vld [vmem:[#allocation2 + $0x50] sm:$0x7]  ;;  %v1315_v50 = vld [vmem:[#allocation2 + $0x40] sm:$0xf0]  ;;  %v4211_v24 = vmul.f32 %v4162_v9, %v2095_v37 }
  0x92   : > { %v1692_v53 = vld [vmem:[#allocation3 + $0x128] sm:$0x7f]  ;;  %1575 = vst [vmem:[#allocation3 + $0x430] sm:$0x7f] %v1448_v47  ;;  %v1451_v55 = vsel %vm1439_vm2, %v1449_v39, %v1450_v40  ;;  %v1452_v57 = vrot.slane %v1314_v48, 4  ;;  %v1453_v58 = vrot.slane %v1317_v49, 4  ;;  %v4226_v40 = vadd.f32 %v1727_v13, %v4173_v16 }
  0x93   : > { %v1318_v61 = vld [vmem:[#allocation2 + $0x58] sm:$0x7]  ;;  %v1693_v3 = vld [vmem:[#allocation3 + $0x130] sm:$0x7f]  ;;  %5972 = vst [vmem:[#allocation18_spill] sm:$0xff] %v4203_v6  ;;  %v1455_v7 = vrot.slane %v1315_v50, 4  ;;  %v1729_v23 = vmul.f32 %v4156_v0, %v1692_v53 }
  0x94   : > { %v2096_v2 = vld [vmem:[#allocation3 + $0x128] sm:$0x7f]  ;;  %1576 = vst [vmem:[#allocation3 + $0x438] sm:$0x7f] %v1451_v55  ;;  %v2097_v17 = vld [vmem:[#allocation3 + $0x130] sm:$0x7f]  ;;  %v1454_v19 = vsel %vm1439_vm2, %v1452_v57, %v1453_v58  ;;  %v1730_v28 = vmul.f32 %v4159_v1, %v1693_v3  ;;  %v4232_v55 = vadd.f32 %v1728_v20, %v4176_v21 }
  0x95   : > { %v1769_v18 = vld [vmem:[#allocation3 + $0x210] sm:$0x7f]  ;;  %v3825_v25 = vld [vmem:[%s4128_s14 + $0x7] ss:$8 sm:$0x7]  ;;  %v1456_v14 = vrot.slane %v1318_v61, 4  ;;  %v4218_v27 = vmul.f32 %v4165_v10, %v2096_v2  ;;  %v4234_v57 = vadd.f32 %v1729_v23, %v1648_v41  ;;  %v4237_v58 = vmul.f32 %v4168_v11, %v2097_v17 }
  0x96   : > { %1577 = vst [vmem:[#allocation3 + $0x440] sm:$0x7f] %v1454_v19  ;;  %v344_v26 = vld [vmem:[%s4091_s7 + $0x78] sm:$0x7f]  ;;  %v345_v15 = vld [vmem:[%s4091_s7 + $0x80] sm:$0x7f]  ;;  %v1806_v34 = vmul.f32 %v4197_v4, %v1769_v18  ;;  %v4239_v3 = vadd.f32 %v1730_v28, %v1649_v43  ;;  %v4245_v18 = vrot.slane %v3825_v25, %v4124_v45  ;;  %v4251_v20 = vrot.slane %v3825_v25, %v4126_v46 }
  0x97   : > { %5973 = vst [vmem:[#allocation19_spill] sm:$0xff] %v4218_v27  ;;  %v3821_v29 = vld [vmem:[%s4128_s14 + $0x3] ss:$8 sm:$0x7]  ;;  %v365_v30 = vmax.f32 %v344_v26, 0.0  ;;  %v366_v31 = vmax.f32 %v345_v15, 0.0  ;;  %v1457_v36 = vsel %vm1439_vm2, %v1455_v7, %v1456_v14  ;;  %v4242_v7 = vrot.slane %v3825_v25, %v4122_v44 }
  0x98   : > { %v346_v32 = vld [vmem:[%s4091_s7 + $0x88] sm:$0x7f]  ;;  %v1771_v47 = vld [vmem:[#allocation3 + $0x220] sm:$0x7f]  ;;  %1578 = vst [vmem:[#allocation3 + $0x448] sm:$0x7f] %v1457_v36  ;;  %v4247_v17 = vadd.f32 %v1806_v34, %v1746_v8  ;;  %v4254_v14 = vrot.slane %v3821_v29, %v4122_v44 }
  0x99   : > { %v549_v33 = vld [vmem:[#allocation2 + $0x60] sm:$0xfe]  ;;  %v1770_v35 = vld [vmem:[#allocation3 + $0x218] sm:$0x7f]  ;;  %v367_v37 = vmax.f32 %v346_v32, 0.0  ;;  %v407_v49 = vrot.slane %v365_v30, 6  ;;  %v4260_v32 = vrot.slane %v3821_v29, %v4126_v46  ;;  %v1808_v34 = vmul.f32 %v4203_v6, %v1771_v47 }
  0x9a   : > { %v615_v38 = vrot.slane %v549_v33, 1  ;;  %v550_v39 = vld [vmem:[#allocation2 + $0x68] sm:$0xfe]  ;;  %v4229_v48 = vld [vmem:[%s4128_s14 + $0x18] ss:$8 sm:$0x7]  ;;  %v1807_v19 = vmul.f32 %v4200_v5, %v1770_v35 }
  0x9b   : > { %v408_v50 = vrot.slane %v366_v31, 6  ;;  %v616_v53 = vrot.slane %v550_v39, 1  ;;  %5974 = vst [vmem:[#allocation20_spill] sm:$0xff] %v4237_v58  ;;  %v1772_v61 = vld [vmem:[#allocation3 + $0x228] sm:$0x7f]  ;;  %v409_v2 = vrot.slane %v367_v37, 6  ;;  %v4257_v31 = vrot.slane %v3821_v29, %v4124_v45 }
  0x9c   : > { %682 = vst [vmem:[#allocation3 + $0x138] sm:$0x7f] %v615_v38  ;;  %v551_v16 = vld [vmem:[#allocation2 + $0x70] sm:$0xfe]  ;;  %5975 = vst [vmem:[#allocation21_spill] sm:$0xff] %v4242_v7  ;;  %v1809_v35 = vmul.f32 %v4197_v4, %v1772_v61  ;;  %v4267_v38 = vrot.slane %v4229_v48, %v4122_v44  ;;  %v1828_v61 = vadd.f32 %v1807_v19, %v4205_v12 }
  0x9d   : > { %v1773_v13 = vld [vmem:[#allocation3 + $0x230] sm:$0x7f]  ;;  %5976 = vst [vmem:[#allocation22_spill] sm:$0xff] %v4245_v18  ;;  %v1774_v21 = vld [vmem:[#allocation3 + $0x238] sm:$0x7f]  ;;  %v617_v41 = vrot.slane %v551_v16, 1  ;;  %v4282_v12 = vrot.slane %v4229_v48, %v4126_v46 }
  0x9e   : > { %465 = vst [vmem:[#allocation2 + $0x150] sm:$0xfc] %v407_v49  ;;  %468 = vst [vmem:[#allocation2 + $0x168] sm:$0x1] %v407_v49  ;;  %v2177_v43 = vld [vmem:[#allocation3 + $0x228] sm:$0x7f]  ;;  %v1810_v36 = vmul.f32 %v4200_v5, %v1773_v13  ;;  %v1811_v29 = vmul.f32 %v4203_v6, %v1774_v21 }
  0x9f   : > { %466 = vst [vmem:[#allocation2 + $0x158] sm:$0xfc] %v408_v50  ;;  %469 = vst [vmem:[#allocation2 + $0x170] sm:$0x1] %v408_v50  ;;  %v1850_v23 = vld [vmem:[#allocation3 + $0x318] sm:$0x7f]  ;;  %v4276_v21 = vmul.f32 %v4242_v7, %v2177_v43  ;;  %v1829_v43 = vadd.f32 %v1808_v34, %v4226_v40 }
  0xa0   : > { %683 = vst [vmem:[#allocation3 + $0x140] sm:$0x7f] %v616_v53  ;;  %5977 = vst [vmem:[#allocation23_spill] sm:$0xff] %v4251_v20  ;;  %v552_v26 = vld [vmem:[#allocation2 + $0x90] sm:$0xfe]  ;;  %v1832_v4 = vadd.f32 %v1811_v29, %v4239_v3 }
  0xa1   : > { %5978 = vst [vmem:[#allocation24_spill] sm:$0xff] %v4254_v14  ;;  %467 = vst [vmem:[#allocation2 + $0x160] sm:$0xfc] %v409_v2  ;;  %v553_v15 = vld [vmem:[#allocation2 + $0x98] sm:$0xfe]  ;;  %v618_v25 = vrot.slane %v552_v26, 1 }
  0xa2   : > { %470 = vst [vmem:[#allocation2 + $0x178] sm:$0x1] %v409_v2  ;;  %v554_v28 = vld [vmem:[#allocation2 + $0xa0] sm:$0xfe]  ;;  %v1851_v30 = vld [vmem:[#allocation3 + $0x320] sm:$0x7f] }
  0xa3   : > { %5979 = vst [vmem:[#allocation25_spill] sm:$0xff] %v4257_v31  ;;  %v1852_v8 = vld [vmem:[#allocation3 + $0x328] sm:$0x7f]  ;;  %5980 = vst [vmem:[#allocation26_spill] sm:$0xff] %v4260_v32  ;;  %v619_v33 = vrot.slane %v553_v15, 1  ;;  %v620_v53 = vrot.slane %v554_v28, 1  ;;  %v4273_v15 = vrot.slane %v4229_v48, %v4124_v45  ;;  %v1887_v28 = vmul.f32 %v4254_v14, %v1850_v23 }
  0xa4   : > { %684 = vst [vmem:[#allocation3 + $0x148] sm:$0x7f] %v617_v41  ;;  %v1853_v37 = vld [vmem:[#allocation3 + $0x330] sm:$0x7f]  ;;  %5981 = vst [vmem:[#allocation27_spill] sm:$0xff] %v4267_v38  ;;  %v1889_v23 = vmul.f32 %v4260_v32, %v1852_v8  ;;  %v1831_v48 = vadd.f32 %v1810_v36, %v4234_v57 }
  0xa5   : > { %v555_v39 = vld [vmem:[#allocation2 + $0xc0] sm:$0xfe]  ;;  %v556_v49 = vld [vmem:[#allocation2 + $0xc8] sm:$0xfe]  ;;  %v557_v50 = vld [vmem:[#allocation2 + $0xd0] sm:$0xfe]  ;;  %v1908_v29 = vadd.f32 %v1887_v28, %v4247_v17 }
  0xa6   : > { %685 = vst [vmem:[#allocation3 + $0x150] sm:$0x7f] %v618_v25  ;;  %686 = vst [vmem:[#allocation3 + $0x158] sm:$0x7f] %v619_v33  ;;  %v621_v2 = vrot.slane %v555_v39, 1  ;;  %v622_v16 = vrot.slane %v556_v49, 1  ;;  %v1888_v25 = vmul.f32 %v4257_v31, %v1851_v30 }
  0xa7   : > { %v558_v47 = vld [vmem:[#allocation2 + $0xf0] sm:$0xfe]  ;;  %v2178_v13 = vld [vmem:[#allocation3 + $0x230] sm:$0x7f]  ;;  %v2179_v41 = vld [vmem:[#allocation3 + $0x238] sm:$0x7f] }
  0xa8   : > { %v1854_v26 = vld [vmem:[#allocation3 + $0x338] sm:$0x7f]  ;;  %5982 = vst [vmem:[#allocation28_spill] sm:$0xff] %v4273_v15  ;;  %v1855_v58 = vld [vmem:[#allocation3 + $0x340] sm:$0x7f]  ;;  %v623_v27 = vrot.slane %v557_v50, 1  ;;  %v4300_v36 = vmul.f32 %v4245_v18, %v2178_v13 }
  0xa9   : > { %v624_v5 = vrot.slane %v558_v47, 1  ;;  %v2259_v33 = vld [vmem:[#allocation3 + $0x330] sm:$0x7f]  ;;  %v2260_v39 = vld [vmem:[#allocation3 + $0x338] sm:$0x7f]  ;;  %5983 = vst [vmem:[#allocation29_spill] sm:$0xff] %v4282_v12  ;;  %v1830_v47 = vadd.f32 %v1809_v35, %v4232_v55  ;;  %v1892_v55 = vmul.f32 %v4260_v32, %v1855_v58  ;;  %v4306_v58 = vadd.f32 %v1888_v25, %v1828_v61 }
  0xaa   : > { %v1613_v19 = vld [vmem:[#allocation3 + $0x30] sm:$0x7f]  ;;  %v4285_v49 = vld [vmem:[%s4128_s14 + $0x4] ss:$8 sm:$0x7]  ;;  %5985 = vst [vmem:[#allocation31_spill] sm:$0xff] %v4300_v36 }
  0xab   : > { %687 = vst [vmem:[#allocation3 + $0x160] sm:$0x7f] %v620_v53  ;;  %688 = vst [vmem:[#allocation3 + $0x168] sm:$0x7f] %v621_v2  ;;  %v559_v50 = vld [vmem:[#allocation2 + $0xf8] sm:$0xfe]  ;;  %v1890_v53 = vmul.f32 %v4254_v14, %v1853_v37  ;;  %v1891_v2 = vmul.f32 %v4257_v31, %v1854_v26  ;;  %v4303_v37 = vmul.f32 %v4251_v20, %v2179_v41 }
  0xac   : > { %689 = vst [vmem:[#allocation3 + $0x170] sm:$0x7f] %v622_v16  ;;  %v2261_v30 = vld [vmem:[#allocation3 + $0x340] sm:$0x7f]  ;;  %v2016_v7 = vld [vmem:[#allocation3 + $0x30] sm:$0x7f]  ;;  %v4308_v14 = vadd.f32 %v1889_v23, %v1829_v43  ;;  %v4317_v13 = vmul.f32 %v4135_v52, %v1613_v19  ;;  %v4329_v19 = vadd.f32 %v1892_v55, %v1832_v4 }
  0xad   : > { %690 = vst [vmem:[#allocation3 + $0x178] sm:$0x7f] %v623_v27  ;;  %691 = vst [vmem:[#allocation3 + $0x180] sm:$0x7f] %v624_v5  ;;  %v625_v6 = vrot.slane %v559_v50, 1  ;;  %v4297_v5 = vrot.slane %v4285_v49, %v4122_v44  ;;  %v4319_v61 = vadd.f32 %v1890_v53, %v1830_v47  ;;  %v4321_v28 = vadd.f32 %v1891_v2, %v1831_v48 }
  0xae   : > { %v1614_v16 = vld [vmem:[#allocation3 + $0x38] sm:$0x7f]  ;;  %v560_v40 = vld [vmem:[#allocation2 + $0x100] sm:$0xfe]  ;;  %v1615_v8 = vld [vmem:[#allocation3 + $0x40] sm:$0x7f]  ;;  %v4324_v25 = vmul.f32 %v4282_v12, %v2261_v30 }
  0xaf   : > { %v2017_v11 = vld [vmem:[#allocation3 + $0x38] sm:$0x7f]  ;;  %v561_v34 = vld [vmem:[#allocation2 + $0x120] sm:$0xfe]  ;;  %v2018_v35 = vld [vmem:[#allocation3 + $0x40] sm:$0x7f]  ;;  %v4339_v2 = vmul.f32 %v4141_v56, %v1615_v8 }
  0xb0   : > { %v1616_v10 = vld [vmem:[#allocation3 + $0x48] sm:$0x7f]  ;;  %5984 = vst [vmem:[#allocation30_spill] sm:$0xff] %v4297_v5  ;;  %692 = vst [vmem:[#allocation3 + $0x188] sm:$0x7f] %v625_v6  ;;  %v626_v57 = vrot.slane %v560_v40, 1  ;;  %v4311_v6 = vmul.f32 %v4267_v38, %v2259_v33  ;;  %v4314_v40 = vmul.f32 %v4273_v15, %v2260_v39  ;;  %v4327_v33 = vmul.f32 %v4144_v59, %v2016_v7 }
  0xb1   : > { %v2019_v27 = vld [vmem:[#allocation3 + $0x48] sm:$0x7f]  ;;  %v627_v3 = vrot.slane %v561_v34, 1  ;;  %5986 = vst [vmem:[#allocation32_spill] sm:$0xff] %v4303_v37  ;;  %v1617_v26 = vld [vmem:[#allocation3 + $0x50] sm:$0x7f]  ;;  %v4332_v37 = vmul.f32 %v4138_v54, %v1614_v16  ;;  %v4342_v7 = vmul.f32 %v4150_v62, %v2018_v35  ;;  %v4345_v4 = vmul.f32 %v4135_v52, %v1616_v10 }
  0xb2   : > { %v2020_v50 = vld [vmem:[#allocation3 + $0x50] sm:$0x7f]  ;;  %v1618_v32 = vld [vmem:[#allocation3 + $0x58] sm:$0x7f]  ;;  %v1931_v31 = vld [vmem:[#allocation3 + $0x420] sm:$0x7f]  ;;  %v4348_v16 = vmul.f32 %v4144_v59, %v2019_v27  ;;  %v4361_v10 = vrot.slane %v4285_v49, %v4124_v45 }
  0xb3   : > { %5987 = vst [vmem:[#allocation33_spill] sm:$0xff] %v4314_v40  ;;  %v2021_v41 = vld [vmem:[#allocation3 + $0x58] sm:$0x7f]  ;;  %v1619_v34 = vld [vmem:[#allocation3 + $0x60] sm:$0x7f]  ;;  %5988 = vst [vmem:[#allocation34_spill] sm:$0xff] %v4324_v25  ;;  %v1968_v30 = vmul.f32 %v4297_v5, %v1931_v31  ;;  %v4351_v25 = vmul.f32 %v4138_v54, %v1617_v26  ;;  %v4354_v31 = vmul.f32 %v4147_v60, %v2020_v50 }
  0xb4   : > { %v2022_v17 = vld [vmem:[#allocation3 + $0x60] sm:$0x7f]  ;;  %693 = vst [vmem:[#allocation3 + $0x190] sm:$0x7f] %v626_v57  ;;  %694 = vst [vmem:[#allocation3 + $0x198] sm:$0x7f] %v627_v3  ;;  %v4335_v57 = vmul.f32 %v4147_v60, %v2017_v11  ;;  %v4357_v8 = vmul.f32 %v4141_v56, %v1618_v32  ;;  %v4367_v15 = vmul.f32 %v4135_v52, %v1619_v34 }
  0xb5   : > { %v1620_v39 = vld [vmem:[#allocation3 + $0x68] sm:$0x7f]  ;;  %v1621_v23 = vld [vmem:[#allocation3 + $0x70] sm:$0x7f]  ;;  %v1622_v48 = vld [vmem:[#allocation3 + $0x78] sm:$0x7f]  ;;  %v4370_v26 = vmul.f32 %v4144_v59, %v2022_v17  ;;  %v4374_v32 = vrot.slane %v4285_v49, %v4126_v46  ;;  %v1989_v34 = vadd.f32 %v1968_v30, %v1908_v29 }
  0xb6   : > { %v2023_v43 = vld [vmem:[#allocation3 + $0x68] sm:$0x7f]  ;;  %v2024_v47 = vld [vmem:[#allocation3 + $0x70] sm:$0x7f]  ;;  %v2025_v53 = vld [vmem:[#allocation3 + $0x78] sm:$0x7f]  ;;  %v4377_v40 = vmul.f32 %v4138_v54, %v1620_v39  ;;  %v4389_v49 = vmul.f32 %v4135_v52, %v1622_v48 }
  0xb7   : > { %5989 = vst [vmem:[#allocation35_spill] sm:$0xff] %v4339_v2  ;;  %5990 = vst [vmem:[#allocation36_spill] sm:$0xff] %v4345_v4  ;;  %v1623_v55 = vld [vmem:[#allocation3 + $0x80] sm:$0x7f]  ;;  %v1624_v3 = vld [vmem:[#allocation3 + $0x88] sm:$0x7f]  ;;  %v4380_v36 = vmul.f32 %v4147_v60, %v2023_v43  ;;  %v4386_v20 = vmul.f32 %v4150_v62, %v2024_v47  ;;  %v4392_v18 = vmul.f32 %v4144_v59, %v2025_v53 }
  0xb8   : > { %5991 = vst [vmem:[#allocation37_spill] sm:$0xff] %v4348_v16  ;;  %v2026_v11 = vld [vmem:[#allocation3 + $0x80] sm:$0x7f]  ;;  %5992 = vst [vmem:[#allocation38_spill] sm:$0xff] %v4351_v25  ;;  %v2027_v35 = vld [vmem:[#allocation3 + $0x88] sm:$0x7f]  ;;  %v4364_v16 = vmul.f32 %v4150_v62, %v2021_v41  ;;  %v4383_v41 = vmul.f32 %v4141_v56, %v1621_v23  ;;  %v4395_v39 = vmul.f32 %v4138_v54, %v1623_v55 }
  0xb9   : > { %5993 = vst [vmem:[#allocation39_spill] sm:$0xff] %v4354_v31  ;;  %5994 = vst [vmem:[#allocation40_spill] sm:$0xff] %v4357_v8  ;;  %v1932_v12 = vld [vmem:[#allocation3 + $0x428] sm:$0x7f]  ;;  %v1933_v27 = vld [vmem:[#allocation3 + $0x430] sm:$0x7f]  ;;  %v4398_v29 = vmul.f32 %v4147_v60, %v2026_v11  ;;  %v4401_v30 = vmul.f32 %v4141_v56, %v1624_v3  ;;  %v4404_v47 = vmul.f32 %v4150_v62, %v2027_v35 }
  0xba   : > { %5995 = vst [vmem:[#allocation41_spill] sm:$0xff] %v4364_v16  ;;  %5996 = vst [vmem:[#allocation42_spill] sm:$0xff] %v4367_v15  ;;  %v1934_v50 = vld [vmem:[#allocation3 + $0x438] sm:$0x7f]  ;;  %v563_v38 = vld [vmem:[#allocation2 + $0x130] sm:$0xfe]  ;;  %v4407_v48 = vmul.f32 %v4361_v10, %v1932_v12  ;;  %v4410_v55 = vmul.f32 %v4374_v32, %v1933_v27 }
  0xbb   : > { %5997 = vst [vmem:[#allocation43_spill] sm:$0xff] %v4370_v26  ;;  %v562_v31 = vld [vmem:[#allocation2 + $0x128] sm:$0xfe]  ;;  %5998 = vst [vmem:[#allocation44_spill] sm:$0xff] %v4377_v40  ;;  %v721_v16 = vld [vmem:[#allocation2 + $0x60] sm:$0xfc]  ;;  %v4414_v3 = vmul.f32 %v4297_v5, %v1934_v50 }
  0xbc   : > { %5999 = vst [vmem:[#allocation45_spill] sm:$0xff] %v4380_v36  ;;  %6000 = vst [vmem:[#allocation46_spill] sm:$0xff] %v4383_v41  ;;  %v724_v17 = vld [vmem:[#allocation2 + $0x78] sm:$0x1]  ;;  %v722_v26 = vld [vmem:[#allocation2 + $0x68] sm:$0xfc] }
  0xbd   : > { %6001 = vst [vmem:[#allocation47_spill] sm:$0xff] %v4386_v20  ;;  %6002 = vst [vmem:[#allocation48_spill] sm:$0xff] %v4389_v49  ;;  %v725_v43 = vld [vmem:[#allocation2 + $0x80] sm:$0x1]  ;;  %v723_v36 = vld [vmem:[#allocation2 + $0x70] sm:$0xfc] }
  0xbe   : > { %6003 = vst [vmem:[#allocation49_spill] sm:$0xff] %v4392_v18  ;;  %6004 = vst [vmem:[#allocation50_spill] sm:$0xff] %v4395_v39  ;;  %v726_v23 = vld [vmem:[#allocation2 + $0x88] sm:$0x1]  ;;  %v727_v53 = vld [vmem:[#allocation2 + $0x90] sm:$0xfc] }
  0xbf   : > { %6005 = vst [vmem:[#allocation51_spill] sm:$0xff] %v4398_v29  ;;  %6006 = vst [vmem:[#allocation52_spill] sm:$0xff] %v4401_v30  ;;  %v730_v18 = vld [vmem:[#allocation2 + $0xa8] sm:$0x1]  ;;  %v728_v20 = vld [vmem:[#allocation2 + $0x98] sm:$0xfc]  ;;  %v2071_v29 = vadd.f32 %v4179_v22, %v1989_v34 }
  0xc0   : > { %6007 = vst [vmem:[#allocation53_spill] sm:$0xff] %v4404_v47  ;;  %v628_v39 = vrot.slane %v562_v31, 1  ;;  %v629_v49 = vrot.slane %v563_v38, 1  ;;  %v860_v41 = vrot.slane %v721_v16, 2  ;;  %v731_v11 = vld [vmem:[#allocation2 + $0xb0] sm:$0x1] }
  0xc1   : > { %v861_v35 = vrot.slane %v724_v17, 2  ;;  %v863_v47 = vrot.slane %v722_v26, 2  ;;  %v729_v30 = vld [vmem:[#allocation2 + $0xa0] sm:$0xfc]  ;;  %v732_v12 = vld [vmem:[#allocation2 + $0xb8] sm:$0x1] }
  0xc2   : > { %v1935_v40 = vld [vmem:[#allocation3 + $0x440] sm:$0x7f]  ;;  %695 = vst [vmem:[#allocation3 + $0x1a0] sm:$0x7f] %v628_v39  ;;  %696 = vst [vmem:[#allocation3 + $0x1a8] sm:$0x7f] %v629_v49 }
  0xc3   : > { %v864_v15 = vrot.slane %v725_v43, 2  ;;  %v866_v8 = vrot.slane %v723_v36, 2  ;;  %v867_v27 = vrot.slane %v726_v23, 2  ;;  %v869_v25 = vrot.slane %v727_v53, 2  ;;  %v733_v31 = vld [vmem:[#allocation2 + $0xc0] sm:$0xfc] }
  0xc4   : > { %v1936_v38 = vld [vmem:[#allocation3 + $0x448] sm:$0x7f]  ;;  %v862_v16 = vsel %vm841_vm0, %v860_v41, %v861_v35  ;;  %v870_v22 = vrot.slane %v730_v18, 2  ;;  %v872_v34 = vrot.slane %v728_v20, 2  ;;  %v873_v50 = vrot.slane %v731_v11, 2 }
  0xc5   : > { %v736_v5 = vld [vmem:[#allocation2 + $0xd8] sm:$0x1]  ;;  %v1625_v17 = vld [vmem:[#allocation3 + $0x90] sm:$0x7f]  ;;  %981 = vst [vmem:[#allocation3 + $0x240] sm:$0x7f] %v862_v16  ;;  %v865_v4 = vsel %vm841_vm0, %v863_v47, %v864_v15  ;;  %v868_v49 = vsel %vm841_vm0, %v866_v8, %v867_v27  ;;  %v1972_v27 = vmul.f32 %v4361_v10, %v1935_v40 }
  0xc6   : > { %v2028_v26 = vld [vmem:[#allocation3 + $0x90] sm:$0x7f]  ;;  %v875_v39 = vrot.slane %v729_v30, 2  ;;  %v876_v36 = vrot.slane %v732_v12, 2  ;;  %v734_v43 = vld [vmem:[#allocation2 + $0xc8] sm:$0xfc]  ;;  %v871_v41 = vsel %vm841_vm0, %v869_v25, %v870_v22  ;;  %v874_v18 = vsel %vm841_vm0, %v872_v34, %v873_v50 }
  0xc7   : > { %v737_v23 = vld [vmem:[#allocation2 + $0xe0] sm:$0x1]  ;;  %v3827_v53 = vld [vmem:[%s4128_s14 + $0x19] ss:$8 sm:$0x7]  ;;  %v878_v20 = vrot.slane %v733_v31, 2  ;;  %v4432_v40 = vmul.f32 %v4144_v59, %v2028_v26  ;;  %v1993_v26 = vadd.f32 %v1972_v27, %v4321_v28 }
  0xc8   : > { %982 = vst [vmem:[#allocation3 + $0x248] sm:$0x7f] %v865_v4  ;;  %983 = vst [vmem:[#allocation3 + $0x250] sm:$0x7f] %v868_v49  ;;  %v879_v11 = vrot.slane %v736_v5, 2  ;;  %v877_v15 = vsel %vm841_vm0, %v875_v39, %v876_v36  ;;  %v881_v8 = vrot.slane %v734_v43, 2  ;;  %v1973_v5 = vmul.f32 %v4374_v32, %v1936_v38 }
  0xc9   : > { %v735_v35 = vld [vmem:[#allocation2 + $0xd0] sm:$0xfc]  ;;  %v738_v2 = vld [vmem:[#allocation2 + $0xe8] sm:$0x1]  ;;  %984 = vst [vmem:[#allocation3 + $0x258] sm:$0x7f] %v871_v41  ;;  %v2153_v39 = vadd.f32 %v4211_v24, %v2071_v29  ;;  %v4429_v36 = vmul.f32 %v4135_v52, %v1625_v17  ;;  %v1992_v24 = vadd.f32 %v4414_v3, %v4319_v61  ;;  %v4440_v52 = vrot.slane %v3827_v53, %v4122_v44 }
  0xca   : > { %985 = vst [vmem:[#allocation3 + $0x260] sm:$0x7f] %v874_v18  ;;  %v882_v30 = vrot.slane %v737_v23, 2  ;;  %v884_v47 = vrot.slane %v735_v35, 2  ;;  %v739_v12 = vld [vmem:[#allocation2 + $0xf0] sm:$0xfc]  ;;  %v880_v4 = vsel %vm841_vm0, %v878_v20, %v879_v11  ;;  %v1990_v20 = vadd.f32 %v4407_v48, %v4306_v58 }
  0xcb   : > { %986 = vst [vmem:[#allocation3 + $0x268] sm:$0x7f] %v877_v15  ;;  %v885_v25 = vrot.slane %v738_v2, 2  ;;  %v742_v16 = vld [vmem:[#allocation2 + $0x108] sm:$0x1]  ;;  %v887_v22 = vrot.slane %v739_v12, 2  ;;  %v4445_v11 = vrot.slane %v3827_v53, %v4124_v45  ;;  %v4448_v35 = vrot.slane %v3827_v53, %v4126_v46 }
  0xcc   : > { %v740_v31 = vld [vmem:[#allocation2 + $0xf8] sm:$0xfc]  ;;  %987 = vst [vmem:[#allocation3 + $0x270] sm:$0x7f] %v880_v4  ;;  %v883_v34 = vsel %vm841_vm0, %v881_v8, %v882_v30  ;;  %v888_v50 = vrot.slane %v742_v16, 2  ;;  %6008 = vst [vmem:[#allocation54_spill] sm:$0xff] %v4432_v40  ;;  %v1991_v48 = vadd.f32 %v4410_v55, %v4308_v14  ;;  %v1994_v8 = vadd.f32 %v1973_v5, %v4329_v19 }
  0xcd   : > { %v743_v49 = vld [vmem:[#allocation2 + $0x110] sm:$0x1]  ;;  %v1626_v43 = vld [vmem:[#allocation3 + $0x98] sm:$0x7f]  ;;  %988 = vst [vmem:[#allocation3 + $0x278] sm:$0x7f] %v883_v34  ;;  %v886_v2 = vsel %vm841_vm0, %v884_v47, %v885_v25  ;;  %v2235_v47 = vadd.f32 %v4276_v21, %v2153_v39  ;;  %v4468_v55 = vadd.f32 %v4188_v42, %v1990_v20  ;;  %v2074_v25 = vadd.f32 %v4327_v33, %v1992_v24 }
  0xce   : > { %v890_v23 = vrot.slane %v740_v31, 2  ;;  %v2029_v41 = vld [vmem:[#allocation3 + $0x98] sm:$0x7f]  ;;  %v1627_v38 = vld [vmem:[#allocation3 + $0xa0] sm:$0x7f]  ;;  %v889_v29 = vsel %vm841_vm0, %v887_v22, %v888_v50  ;;  %v891_v58 = vrot.slane %v743_v49, 2  ;;  %v4451_v61 = vmul.f32 %v4138_v54, %v1626_v43 }
  0xcf   : > { %v2030_v18 = vld [vmem:[#allocation3 + $0xa0] sm:$0x7f]  ;;  %989 = vst [vmem:[#allocation3 + $0x280] sm:$0x7f] %v886_v2  ;;  %v2341_v17 = vld [vmem:[#allocation3 + $0x438] sm:$0x7f]  ;;  %v4458_v12 = vmul.f32 %v4147_v60, %v2029_v41  ;;  %v4461_v53 = vmul.f32 %v4141_v56, %v1627_v38  ;;  %v2075_v34 = vadd.f32 %v4335_v57, %v1993_v26  ;;  %v4480_v39 = vadd.f32 %v4193_v51, %v1991_v48 }
  0xd0   : > { %v1694_v15 = vld [vmem:[#allocation3 + $0x138] sm:$0x7f]  ;;  %990 = vst [vmem:[#allocation3 + $0x288] sm:$0x7f] %v889_v29  ;;  %v2342_v3 = vld [vmem:[#allocation3 + $0x440] sm:$0x7f]  ;;  %v4464_v27 = vmul.f32 %v4150_v62, %v2030_v18  ;;  %v892_v14 = vsel %vm841_vm0, %v890_v23, %v891_v58  ;;  %v2378_v19 = vmul.f32 %v4440_v52, %v2341_v17  ;;  %v2076_v43 = vadd.f32 %v4342_v7, %v1994_v8 }
  0xd1   : > { %v1695_v30 = vld [vmem:[#allocation3 + $0x140] sm:$0x7f]  ;;  %v1696_v28 = vld [vmem:[#allocation3 + $0x148] sm:$0x7f]  ;;  %6009 = vst [vmem:[#allocation55_spill] sm:$0xff] %v4458_v12  ;;  %v1731_v21 = vmul.f32 %v4153_v63, %v1694_v15  ;;  %v4474_v31 = vmul.f32 %v4445_v11, %v2342_v3  ;;  %v2317_v41 = vadd.f32 %v4311_v6, %v2235_v47 }
  0xd2   : > { %6010 = vst [vmem:[#allocation56_spill] sm:$0xff] %v4464_v27  ;;  %v2343_v54 = vld [vmem:[#allocation3 + $0x448] sm:$0x7f]  ;;  %v2098_v4 = vld [vmem:[#allocation3 + $0x138] sm:$0x7f]  ;;  %v1732_v5 = vmul.f32 %v4156_v0, %v1695_v30  ;;  %v1733_v42 = vmul.f32 %v4159_v1, %v1696_v28  ;;  %v6011_v18 = vld [vmem:[#allocation14_spill] sm:$0xff] }
  0xd3   : > { %v2099_v16 = vld [vmem:[#allocation3 + $0x140] sm:$0x7f]  ;;  %v1697_v22 = vld [vmem:[#allocation3 + $0x150] sm:$0x7f]  ;;  %v1698_v56 = vld [vmem:[#allocation3 + $0x158] sm:$0x7f]  ;;  %v2135_v33 = vmul.f32 %v4162_v9, %v2098_v4  ;;  %v4486_v38 = vmul.f32 %v4448_v35, %v2343_v54  ;;  %v4492_v26 = vadd.f32 %v1731_v21, %v4317_v13 }
  0xd4   : > { %991 = vst [vmem:[#allocation3 + $0x290] sm:$0x7f] %v892_v14  ;;  %v2100_v50 = vld [vmem:[#allocation3 + $0x148] sm:$0x7f]  ;;  %v741_v49 = vld [vmem:[#allocation2 + $0x100] sm:$0xfc]  ;;  %v2136_v57 = vmul.f32 %v6011_v18, %v2099_v16  ;;  %v1734_v20 = vmul.f32 %v4153_v63, %v1697_v22  ;;  %v1735_v24 = vmul.f32 %v4156_v0, %v1698_v56  ;;  %v4498_v8 = vadd.f32 %v1732_v5, %v4332_v37 }
  0xd5   : > { %v2101_v2 = vld [vmem:[#allocation3 + $0x150] sm:$0x7f]  ;;  %v2102_v23 = vld [vmem:[#allocation3 + $0x158] sm:$0x7f]  ;;  %v1699_v29 = vld [vmem:[#allocation3 + $0x160] sm:$0x7f]  ;;  %v4494_v7 = vadd.f32 %v2135_v33, %v2074_v25  ;;  %v4513_v5 = vadd.f32 %v2378_v19, %v2317_v41 }
  0xd6   : > { %v1700_v51 = vld [vmem:[#allocation3 + $0x168] sm:$0x7f]  ;;  %v893_v6 = vrot.slane %v741_v49, 2  ;;  %v745_v48 = vld [vmem:[#allocation2 + $0x120] sm:$0xfc]  ;;  %v4500_v30 = vadd.f32 %v2136_v57, %v2075_v34  ;;  %v4506_v54 = vmul.f32 %v4162_v9, %v2101_v2  ;;  %v4511_v16 = vmul.f32 %v6011_v18, %v2102_v23 }
  0xd7   : > { %v744_v17 = vld [vmem:[#allocation2 + $0x118] sm:$0x1]  ;;  %v1701_v13 = vld [vmem:[#allocation3 + $0x170] sm:$0x7f]  ;;  %v746_v4 = vld [vmem:[#allocation2 + $0x128] sm:$0xfc]  ;;  %v4525_v23 = vmul.f32 %v4153_v63, %v1700_v51 }
  0xd8   : > { %v6012_v15 = vld [vmem:[#allocation15_spill] sm:$0xff]  ;;  %v749_v14 = vld [vmem:[#allocation2 + $0x140] sm:$0x1]  ;;  %v747_v21 = vld [vmem:[#allocation2 + $0x130] sm:$0xfc]  ;;  %v894_v22 = vrot.slane %v744_v17, 2  ;;  %v4530_v46 = vmul.f32 %v4156_v0, %v1701_v13 }
  0xd9   : > { %v2137_v58 = vmul.f32 %v6012_v15, %v2100_v50  ;;  %v748_v3 = vld [vmem:[#allocation2 + $0x138] sm:$0x1]  ;;  %v750_v37 = vld [vmem:[#allocation2 + $0x148] sm:$0x1]  ;;  %v1020_v56 = vld [vmem:[#allocation2 + $0x60] sm:$0xf8] }
  0xda   : > { %v6013_v28 = vld [vmem:[#allocation35_spill] sm:$0xff]  ;;  %6015 = vst [vmem:[#allocation57_spill] sm:$0xff] %v4513_v5  ;;  %v6016_v34 = vld [vmem:[#allocation36_spill] sm:$0xff]  ;;  %v6017_v50 = vld [vmem:[#allocation38_spill] sm:$0xff]  ;;  %v896_v33 = vrot.slane %v745_v48, 2  ;;  %v897_v2 = vrot.slane %v748_v3, 2  ;;  %v895_v19 = vsel %vm841_vm0, %v893_v6, %v894_v22 }
  0xdb   : > { %v4503_v47 = vadd.f32 %v1733_v42, %v6013_v28  ;;  %v4508_v25 = vadd.f32 %v2137_v58, %v2076_v43  ;;  %6014 = vst [vmem:[#allocation35_spill] sm:$0xff] %v4511_v16  ;;  %v4516_v42 = vadd.f32 %v1734_v20, %v6016_v34  ;;  %v4519_v49 = vadd.f32 %v1735_v24, %v6017_v50  ;;  %v1023_v57 = vld [vmem:[#allocation2 + $0x78] sm:$0x3]  ;;  %v1021_v28 = vld [vmem:[#allocation2 + $0x68] sm:$0xf8] }
  0xdc   : > { %v4522_v43 = vmul.f32 %v4159_v1, %v1699_v29  ;;  %v1702_v17 = vld [vmem:[#allocation3 + $0x178] sm:$0x7f]  ;;  %v899_v41 = vrot.slane %v746_v4, 2  ;;  %v1024_v58 = vld [vmem:[#allocation2 + $0x80] sm:$0x3]  ;;  %v898_v24 = vsel %vm841_vm0, %v896_v33, %v897_v2  ;;  %v900_v34 = vrot.slane %v749_v14, 2 }
  0xdd   : > { %v1022_v20 = vld [vmem:[#allocation2 + $0x70] sm:$0xf8]  ;;  %992 = vst [vmem:[#allocation3 + $0x298] sm:$0x7f] %v895_v19  ;;  %v902_v48 = vrot.slane %v747_v21, 2  ;;  %v903_v3 = vrot.slane %v750_v37, 2  ;;  %v1739_v62 = vmul.f32 %v4159_v1, %v1702_v17 }
  0xde   : > { %v1025_v50 = vld [vmem:[#allocation2 + $0x88] sm:$0x3]  ;;  %v1703_v29 = vld [vmem:[#allocation3 + $0x180] sm:$0x7f]  ;;  %993 = vst [vmem:[#allocation3 + $0x2a0] sm:$0x7f] %v898_v24  ;;  %v901_v4 = vsel %vm841_vm0, %v899_v41, %v900_v34 }
  0xdf   : > { %v1159_v51 = vrot.slane %v1020_v56, 3  ;;  %v1160_v45 = vrot.slane %v1023_v57, 3  ;;  %v1162_v5 = vrot.slane %v1021_v28, 3  ;;  %v1026_v44 = vld [vmem:[#allocation2 + $0x90] sm:$0xf8]  ;;  %v904_v22 = vsel %vm841_vm0, %v902_v48, %v903_v3 }
  0xe0   : > { %v1704_v6 = vld [vmem:[#allocation3 + $0x188] sm:$0x7f]  ;;  %v1163_v19 = vrot.slane %v1024_v58, 3  ;;  %v1165_v33 = vrot.slane %v1022_v20, 3  ;;  %v1029_v14 = vld [vmem:[#allocation2 + $0xa8] sm:$0x3]  ;;  %v1740_v17 = vmul.f32 %v4153_v63, %v1703_v29 }
  0xe1   : > { %v1027_v21 = vld [vmem:[#allocation2 + $0x98] sm:$0xf8]  ;;  %v2103_v37 = vld [vmem:[#allocation3 + $0x160] sm:$0x7f]  ;;  %v2105_v16 = vld [vmem:[#allocation3 + $0x170] sm:$0x7f]  ;;  %v1161_v13 = vsel %vm1140_vm1, %v1159_v51, %v1160_v45 }
  0xe2   : > { %v2104_v2 = vld [vmem:[#allocation3 + $0x168] sm:$0x7f]  ;;  %994 = vst [vmem:[#allocation3 + $0x2a8] sm:$0x7f] %v901_v4  ;;  %995 = vst [vmem:[#allocation3 + $0x2b0] sm:$0x7f] %v904_v22  ;;  %v1164_v58 = vsel %vm1140_vm1, %v1162_v5, %v1163_v19 }
  0xe3   : > { %v1166_v56 = vrot.slane %v1025_v50, 3  ;;  %v1168_v57 = vrot.slane %v1026_v44, 3  ;;  %v1169_v28 = vrot.slane %v1029_v14, 3  ;;  %v1030_v24 = vld [vmem:[#allocation2 + $0xb0] sm:$0x3]  ;;  %v1171_v20 = vrot.slane %v1027_v21, 3 }
  0xe4   : > { %v2106_v41 = vld [vmem:[#allocation3 + $0x178] sm:$0x7f]  ;;  %1280 = vst [vmem:[#allocation3 + $0x348] sm:$0x7f] %v1161_v13  ;;  %v1172_v34 = vrot.slane %v1030_v24, 3  ;;  %v1741_v24 = vmul.f32 %v4156_v0, %v1704_v6  ;;  %v4547_v29 = vmul.f32 %v4162_v9, %v2104_v2 }
  0xe5   : > { %v1028_v48 = vld [vmem:[#allocation2 + $0xa0] sm:$0xf8]  ;;  %v1031_v3 = vld [vmem:[#allocation2 + $0xb8] sm:$0x3]  ;;  %v2107_v60 = vld [vmem:[#allocation3 + $0x180] sm:$0x7f]  ;;  %v1167_v4 = vsel %vm1140_vm1, %v1165_v33, %v1166_v56  ;;  %v1170_v45 = vsel %vm1140_vm1, %v1168_v57, %v1169_v28  ;;  %v4562_v2 = vmul.f32 %v6012_v15, %v2106_v41 }
  0xe6   : > { %1281 = vst [vmem:[#allocation3 + $0x350] sm:$0x7f] %v1164_v58  ;;  %v1174_v50 = vrot.slane %v1028_v48, 3  ;;  %v1175_v44 = vrot.slane %v1031_v3, 3  ;;  %v1032_v51 = vld [vmem:[#allocation2 + $0xc0] sm:$0xf8]  ;;  %v1173_v5 = vsel %vm1140_vm1, %v1171_v20, %v1172_v34  ;;  %v4544_v48 = vmul.f32 %v6012_v15, %v2103_v37 }
  0xe7   : > { %v1035_v22 = vld [vmem:[#allocation2 + $0xd8] sm:$0x3]  ;;  %1282 = vst [vmem:[#allocation3 + $0x358] sm:$0x7f] %v1167_v4  ;;  %1283 = vst [vmem:[#allocation3 + $0x360] sm:$0x7f] %v1170_v45  ;;  %v4550_v20 = vmul.f32 %v6011_v18, %v2105_v16 }
  0xe8   : > { %v1177_v19 = vrot.slane %v1032_v51, 3  ;;  %v1178_v14 = vrot.slane %v1035_v22, 3  ;;  %v1033_v21 = vld [vmem:[#allocation2 + $0xc8] sm:$0xf8]  ;;  %v1036_v13 = vld [vmem:[#allocation2 + $0xe0] sm:$0x3]  ;;  %v1176_v56 = vsel %vm1140_vm1, %v1174_v50, %v1175_v44 }
  0xe9   : > { %v1705_v58 = vld [vmem:[#allocation3 + $0x190] sm:$0x7f]  ;;  %v1706_v33 = vld [vmem:[#allocation3 + $0x198] sm:$0x7f]  ;;  %1284 = vst [vmem:[#allocation3 + $0x368] sm:$0x7f] %v1173_v5 }
  0xea   : > { %v1180_v57 = vrot.slane %v1033_v21, 3  ;;  %v1181_v28 = vrot.slane %v1036_v13, 3  ;;  %6018 = vst [vmem:[#allocation36_spill] sm:$0xff] %v4544_v48  ;;  %6019 = vst [vmem:[#allocation38_spill] sm:$0xff] %v4547_v29  ;;  %v2108_v34 = vld [vmem:[#allocation3 + $0x188] sm:$0x7f]  ;;  %v1179_v6 = vsel %vm1140_vm1, %v1177_v19, %v1178_v14  ;;  %v1742_v14 = vmul.f32 %v4159_v1, %v1705_v58 }
  0xeb   : > { %6020 = vst [vmem:[#allocation58_spill] sm:$0xff] %v4550_v20  ;;  %v2109_v3 = vld [vmem:[#allocation3 + $0x190] sm:$0x7f]  ;;  %v2110_v4 = vld [vmem:[#allocation3 + $0x198] sm:$0x7f]  ;;  %v6022_v44 = vld [vmem:[#allocation42_spill] sm:$0xff] }
  0xec   : > { %1285 = vst [vmem:[#allocation3 + $0x370] sm:$0x7f] %v1176_v56  ;;  %v6021_v45 = vld [vmem:[#allocation40_spill] sm:$0xff]  ;;  %v4559_v37 = vadd.f32 %v4525_v23, %v6022_v44  ;;  %v1707_v51 = vld [vmem:[#allocation3 + $0x1a0] sm:$0x7f]  ;;  %v1182_v5 = vsel %vm1140_vm1, %v1180_v57, %v1181_v28  ;;  %v1743_v23 = vmul.f32 %v4153_v63, %v1706_v33  ;;  %v4587_v63 = vmul.f32 %v6012_v15, %v2109_v3 }
  0xed   : > { %v4555_v50 = vadd.f32 %v4522_v43, %v6021_v45  ;;  %6023 = vst [vmem:[#allocation40_spill] sm:$0xff] %v4562_v2  ;;  %v1708_v16 = vld [vmem:[#allocation3 + $0x1a8] sm:$0x7f]  ;;  %v1775_v22 = vld [vmem:[#allocation3 + $0x240] sm:$0x7f]  ;;  %v6024_v21 = vld [vmem:[#allocation44_spill] sm:$0xff]  ;;  %v4570_v43 = vmul.f32 %v4162_v9, %v2107_v60  ;;  %v4584_v60 = vmul.f32 %v6011_v18, %v2108_v34  ;;  %v1744_v33 = vmul.f32 %v4156_v0, %v1707_v51 }
  0xee   : > { %1286 = vst [vmem:[#allocation3 + $0x378] sm:$0x7f] %v1179_v6  ;;  %v4567_v19 = vadd.f32 %v4530_v46, %v6024_v21  ;;  %v1776_v13 = vld [vmem:[#allocation3 + $0x248] sm:$0x7f]  ;;  %1287 = vst [vmem:[#allocation3 + $0x380] sm:$0x7f] %v1182_v5  ;;  %v4600_v0 = vadd.f32 %v1743_v23, %v4429_v36 }
  0xef   : > { %6025 = vst [vmem:[#allocation42_spill] sm:$0xff] %v4570_v43  ;;  %v1034_v41 = vld [vmem:[#allocation2 + $0xd0] sm:$0xf8]  ;;  %v1037_v56 = vld [vmem:[#allocation2 + $0xe8] sm:$0x3]  ;;  %v6027_v6 = vld [vmem:[#allocation48_spill] sm:$0xff] }
  0xf0   : > { %v6026_v45 = vld [vmem:[#allocation46_spill] sm:$0xff]  ;;  %v4578_v57 = vadd.f32 %v1740_v17, %v6027_v6  ;;  %6029 = vst [vmem:[#allocation44_spill] sm:$0xff] %v4584_v60  ;;  %v2112_v58 = vld [vmem:[#allocation3 + $0x1a8] sm:$0x7f]  ;;  %v1777_v43 = vld [vmem:[#allocation3 + $0x250] sm:$0x7f] }
  0xf1   : > { %v4575_v44 = vadd.f32 %v1739_v62, %v6026_v45  ;;  %v6028_v28 = vld [vmem:[#allocation50_spill] sm:$0xff]  ;;  %6030 = vst [vmem:[#allocation46_spill] sm:$0xff] %v4587_v63  ;;  %v1745_v62 = vmul.f32 %v4159_v1, %v1708_v16  ;;  %v6031_v5 = vld [vmem:[#allocation16_spill] sm:$0xff]  ;;  %v2181_v6 = vld [vmem:[#allocation3 + $0x248] sm:$0x7f]  ;;  %v1183_v20 = vrot.slane %v1034_v41, 3 }
  0xf2   : > { %v4581_v46 = vadd.f32 %v1741_v24, %v6028_v28  ;;  %v2111_v21 = vld [vmem:[#allocation3 + $0x1a0] sm:$0x7f]  ;;  %v1812_v45 = vmul.f32 %v6031_v5, %v1775_v22  ;;  %v1778_v2 = vld [vmem:[#allocation3 + $0x258] sm:$0x7f]  ;;  %v4593_v24 = vmul.f32 %v4162_v9, %v2110_v4  ;;  %v2182_v60 = vld [vmem:[#allocation3 + $0x250] sm:$0x7f]  ;;  %v4607_v22 = vmul.f32 %v6012_v15, %v2112_v58 }
  0xf3   : > { %v2180_v17 = vld [vmem:[#allocation3 + $0x240] sm:$0x7f]  ;;  %v6033_v34 = vld [vmem:[#allocation17_spill] sm:$0xff]  ;;  %v1184_v29 = vrot.slane %v1037_v56, 3  ;;  %v6034_v48 = vld [vmem:[#allocation52_spill] sm:$0xff]  ;;  %v4603_v1 = vmul.f32 %v6011_v18, %v2111_v21  ;;  %v1815_v41 = vmul.f32 %v6031_v5, %v1778_v2  ;;  %v4616_v36 = vadd.f32 %v1745_v62, %v4461_v53 }
  0xf4   : > { %6032 = vst [vmem:[#allocation48_spill] sm:$0xff] %v4593_v24  ;;  %v1813_v28 = vmul.f32 %v6033_v34, %v1776_v13  ;;  %v4597_v3 = vadd.f32 %v1742_v14, %v6034_v48  ;;  %v6036_v51 = vld [vmem:[#allocation18_spill] sm:$0xff]  ;;  %6037 = vst [vmem:[#allocation16_spill] sm:$0xff] %v4607_v22  ;;  %v6038_v4 = vld [vmem:[#allocation21_spill] sm:$0xff]  ;;  %v4613_v14 = vadd.f32 %v1744_v33, %v4451_v61 }
  0xf5   : > { %6035 = vst [vmem:[#allocation50_spill] sm:$0xff] %v4603_v1  ;;  %v1814_v16 = vmul.f32 %v6036_v51, %v1777_v43  ;;  %v2217_v24 = vmul.f32 %v6038_v4, %v2180_v17  ;;  %v6039_v13 = vld [vmem:[#allocation22_spill] sm:$0xff]  ;;  %v2183_v56 = vld [vmem:[#allocation3 + $0x258] sm:$0x7f]  ;;  %v4619_v23 = vadd.f32 %v1812_v45, %v4492_v26  ;;  %v6040_v43 = vld [vmem:[#allocation23_spill] sm:$0xff]  ;;  %v1185_v53 = vsel %vm1140_vm1, %v1183_v20, %v1184_v29 }
  0xf6   : > { %v2218_v63 = vmul.f32 %v6039_v13, %v2181_v6  ;;  %v1038_v48 = vld [vmem:[#allocation2 + $0xf0] sm:$0xf8]  ;;  %v2219_v21 = vmul.f32 %v6040_v43, %v2182_v60  ;;  %v1041_v58 = vld [vmem:[#allocation2 + $0x108] sm:$0x3]  ;;  %v1039_v22 = vld [vmem:[#allocation2 + $0xf8] sm:$0xf8]  ;;  %v4626_v2 = vadd.f32 %v1813_v28, %v4498_v8 }
  0xf7   : > { %v4623_v17 = vadd.f32 %v2217_v24, %v4494_v7  ;;  %v1779_v61 = vld [vmem:[#allocation3 + $0x260] sm:$0x7f]  ;;  %v4633_v26 = vadd.f32 %v1814_v16, %v4503_v47  ;;  %v4639_v7 = vmul.f32 %v6038_v4, %v2183_v56  ;;  %v1780_v45 = vld [vmem:[#allocation3 + $0x268] sm:$0x7f]  ;;  %1288 = vst [vmem:[#allocation3 + $0x388] sm:$0x7f] %v1185_v53 }
  0xf8   : > { %v4629_v6 = vadd.f32 %v2218_v63, %v4500_v30  ;;  %v2184_v33 = vld [vmem:[#allocation3 + $0x260] sm:$0x7f]  ;;  %v4636_v60 = vadd.f32 %v2219_v21, %v4508_v25  ;;  %v1186_v8 = vrot.slane %v1038_v48, 3  ;;  %v1040_v24 = vld [vmem:[#allocation2 + $0x100] sm:$0xf8]  ;;  %v4642_v63 = vadd.f32 %v1815_v41, %v4516_v42 }
  0xf9   : > { %v1042_v62 = vld [vmem:[#allocation2 + $0x110] sm:$0x3]  ;;  %6041 = vst [vmem:[#allocation17_spill] sm:$0xff] %v4639_v7  ;;  %v1043_v30 = vld [vmem:[#allocation2 + $0x118] sm:$0x3]  ;;  %v1187_v29 = vrot.slane %v1041_v58, 3  ;;  %v1816_v16 = vmul.f32 %v6033_v34, %v1779_v61  ;;  %v4646_v53 = vmul.f32 %v6039_v13, %v2184_v33  ;;  %v1817_v27 = vmul.f32 %v6036_v51, %v1780_v45 }
  0xfa   : > { %v2185_v28 = vld [vmem:[#allocation3 + $0x268] sm:$0x7f]  ;;  %v1189_v20 = vrot.slane %v1039_v22, 3  ;;  %v1190_v1 = vrot.slane %v1042_v62, 3  ;;  %v1044_v47 = vld [vmem:[#allocation2 + $0x120] sm:$0xf8] }
  0xfb   : > { %v1781_v25 = vld [vmem:[#allocation3 + $0x270] sm:$0x7f]  ;;  %v1192_v21 = vrot.slane %v1040_v24, 3  ;;  %v1193_v15 = vrot.slane %v1043_v30, 3  ;;  %v1047_v56 = vld [vmem:[#allocation2 + $0x138] sm:$0x3]  ;;  %v1188_v42 = vsel %vm1140_vm1, %v1186_v8, %v1187_v29 }
  0xfc   : > { %v1195_v18 = vrot.slane %v1044_v47, 3  ;;  %6042 = vst [vmem:[#allocation52_spill] sm:$0xff] %v4646_v53  ;;  %v2186_v48 = vld [vmem:[#allocation3 + $0x270] sm:$0x7f]  ;;  %v1782_v9 = vld [vmem:[#allocation3 + $0x278] sm:$0x7f]  ;;  %v1191_v41 = vsel %vm1140_vm1, %v1189_v20, %v1190_v1 }
  0xfd   : > { %v1196_v58 = vrot.slane %v1047_v56, 3  ;;  %v1045_v22 = vld [vmem:[#allocation2 + $0x128] sm:$0xf8]  ;;  %v1048_v62 = vld [vmem:[#allocation2 + $0x140] sm:$0x3]  ;;  %v1194_v61 = vsel %vm1140_vm1, %v1192_v21, %v1193_v15  ;;  %v6043_v33 = vld [vmem:[#allocation19_spill] sm:$0xff]  ;;  %v4656_v15 = vmul.f32 %v6040_v43, %v2185_v28  ;;  %v4662_v28 = vmul.f32 %v6038_v4, %v2186_v48 }
  0xfe   : > { %1289 = vst [vmem:[#allocation3 + $0x390] sm:$0x7f] %v1188_v42  ;;  %1290 = vst [vmem:[#allocation3 + $0x398] sm:$0x7f] %v1191_v41  ;;  %v1198_v24 = vrot.slane %v1045_v22, 3  ;;  %v1199_v30 = vrot.slane %v1048_v62, 3  ;;  %v2154_v53 = vadd.f32 %v6043_v33, %v4468_v55  ;;  %v1818_v33 = vmul.f32 %v6031_v5, %v1781_v25 }
  0xff   : > { %v1046_v7 = vld [vmem:[#allocation2 + $0x130] sm:$0xf8]  ;;  %v1049_v47 = vld [vmem:[#allocation2 + $0x148] sm:$0x3]  ;;  %v1784_v8 = vld [vmem:[#allocation3 + $0x288] sm:$0x7f]  ;;  %v1197_v1 = vsel %vm1140_vm1, %v1195_v18, %v1196_v58  ;;  %v4669_v48 = vadd.f32 %v1816_v16, %v4519_v49 }
 0x100   : > { %v1783_v59 = vld [vmem:[#allocation3 + $0x280] sm:$0x7f]  ;;  %1291 = vst [vmem:[#allocation3 + $0x3a0] sm:$0x7f] %v1194_v61  ;;  %v1201_v29 = vrot.slane %v1046_v7, 3  ;;  %v1202_v20 = vrot.slane %v1049_v47, 3  ;;  %v1200_v41 = vsel %vm1140_vm1, %v1198_v24, %v1199_v30  ;;  %v1819_v47 = vmul.f32 %v6033_v34, %v1782_v9 }
 0x101   : > { %v1319_v56 = vld [vmem:[#allocation2 + $0x60] sm:$0xf0]  ;;  %v1322_v42 = vld [vmem:[#allocation2 + $0x78] sm:$0x7]  ;;  %6044 = vst [vmem:[#allocation18_spill] sm:$0xff] %v4656_v15  ;;  %6045 = vst [vmem:[#allocation19_spill] sm:$0xff] %v4662_v28  ;;  %v1820_v9 = vmul.f32 %v6036_v51, %v1783_v59  ;;  %v4682_v59 = vadd.f32 %v1818_v33, %v4559_v37 }
 0x102   : > { %v2187_v21 = vld [vmem:[#allocation3 + $0x278] sm:$0x7f]  ;;  %1292 = vst [vmem:[#allocation3 + $0x3a8] sm:$0x7f] %v1197_v1  ;;  %v1458_v22 = vrot.slane %v1319_v56, 4  ;;  %v1459_v55 = vrot.slane %v1322_v42, 4  ;;  %v1203_v18 = vsel %vm1140_vm1, %v1201_v29, %v1202_v20 }
 0x103   : > { %v1320_v62 = vld [vmem:[#allocation2 + $0x68] sm:$0xf0]  ;;  %v1323_v45 = vld [vmem:[#allocation2 + $0x80] sm:$0x7]  ;;  %1293 = vst [vmem:[#allocation3 + $0x3b0] sm:$0x7f] %v1200_v41 }
 0x104   : > { %v1785_v61 = vld [vmem:[#allocation3 + $0x290] sm:$0x7f]  ;;  %v1786_v12 = vld [vmem:[#allocation3 + $0x298] sm:$0x7f]  ;;  %v1461_v7 = vrot.slane %v1320_v62, 4  ;;  %v1462_v58 = vrot.slane %v1323_v45, 4  ;;  %v1460_v24 = vsel %vm1439_vm2, %v1458_v22, %v1459_v55 }
 0x105   : > { %v2188_v1 = vld [vmem:[#allocation3 + $0x280] sm:$0x7f]  ;;  %1294 = vst [vmem:[#allocation3 + $0x3b8] sm:$0x7f] %v1203_v18  ;;  %v1324_v56 = vld [vmem:[#allocation2 + $0x88] sm:$0x7]  ;;  %v1821_v18 = vmul.f32 %v6031_v5, %v1784_v8  ;;  %v1823_v16 = vmul.f32 %v6036_v51, %v1786_v12 }
 0x106   : > { %v1321_v30 = vld [vmem:[#allocation2 + $0x70] sm:$0xf0]  ;;  %v6046_v25 = vld [vmem:[#allocation31_spill] sm:$0xff]  ;;  %1579 = vst [vmem:[#allocation3 + $0x450] sm:$0x7f] %v1460_v24  ;;  %v1463_v41 = vsel %vm1439_vm2, %v1461_v7, %v1462_v58  ;;  %v1465_v20 = vrot.slane %v1324_v56, 4  ;;  %v4677_v7 = vmul.f32 %v6039_v13, %v2187_v21  ;;  %v1822_v24 = vmul.f32 %v6033_v34, %v1785_v61 }
 0x107   : > { %v1325_v42 = vld [vmem:[#allocation2 + $0x90] sm:$0xf0]  ;;  %v2236_v15 = vadd.f32 %v6046_v25, %v2154_v53  ;;  %v1464_v29 = vrot.slane %v1321_v30, 4  ;;  %v1328_v62 = vld [vmem:[#allocation2 + $0xa8] sm:$0x7]  ;;  %v4674_v53 = vadd.f32 %v1817_v27, %v4555_v50  ;;  %v4688_v25 = vadd.f32 %v1819_v47, %v4567_v19 }
 0x108   : > { %v1467_v45 = vrot.slane %v1325_v42, 4  ;;  %v1787_v22 = vld [vmem:[#allocation3 + $0x2a0] sm:$0x7f]  ;;  %1580 = vst [vmem:[#allocation3 + $0x458] sm:$0x7f] %v1463_v41  ;;  %v1468_v55 = vrot.slane %v1328_v62, 4  ;;  %v4691_v61 = vmul.f32 %v6040_v43, %v2188_v1 }
 0x109   : > { %v1326_v28 = vld [vmem:[#allocation2 + $0x98] sm:$0xf0]  ;;  %6047 = vst [vmem:[#allocation31_spill] sm:$0xff] %v4677_v7  ;;  %v2190_v30 = vld [vmem:[#allocation3 + $0x290] sm:$0x7f]  ;;  %v1466_v49 = vsel %vm1439_vm2, %v1464_v29, %v1465_v20  ;;  %v6048_v42 = vld [vmem:[#allocation33_spill] sm:$0xff]  ;;  %v1824_v37 = vmul.f32 %v6031_v5, %v1787_v22  ;;  %v4695_v29 = vadd.f32 %v1820_v9, %v4575_v44  ;;  %v4698_v20 = vadd.f32 %v1821_v18, %v4578_v57 }
 0x10a   : > { %v2189_v58 = vld [vmem:[#allocation3 + $0x288] sm:$0x7f]  ;;  %v1789_v56 = vld [vmem:[#allocation3 + $0x2b0] sm:$0x7f]  ;;  %1581 = vst [vmem:[#allocation3 + $0x460] sm:$0x7f] %v1466_v49  ;;  %v1469_v27 = vsel %vm1439_vm2, %v1467_v45, %v1468_v55  ;;  %v2318_v21 = vadd.f32 %v6048_v42, %v2236_v15  ;;  %v4704_v19 = vmul.f32 %v6039_v13, %v2190_v30  ;;  %v4707_v5 = vadd.f32 %v1822_v24, %v4581_v46 }
 0x10b   : > { %v1788_v8 = vld [vmem:[#allocation3 + $0x2a8] sm:$0x7f]  ;;  %v1329_v50 = vld [vmem:[#allocation2 + $0xb0] sm:$0x7]  ;;  %6049 = vst [vmem:[#allocation33_spill] sm:$0xff] %v4691_v61  ;;  %v1470_v12 = vrot.slane %v1326_v28, 4  ;;  %v4701_v15 = vmul.f32 %v6038_v4, %v2189_v58  ;;  %v1826_v44 = vmul.f32 %v6036_v51, %v1789_v56  ;;  %v4712_v18 = vadd.f32 %v1823_v16, %v4597_v3 }
 0x10c   : > { %v2191_v41 = vld [vmem:[#allocation3 + $0x298] sm:$0x7f]  ;;  %v2192_v33 = vld [vmem:[#allocation3 + $0x2a0] sm:$0x7f]  ;;  %1582 = vst [vmem:[#allocation3 + $0x468] sm:$0x7f] %v1469_v27  ;;  %v1825_v28 = vmul.f32 %v6033_v34, %v1788_v8  ;;  %v4721_v24 = vadd.f32 %v4474_v31, %v2318_v21  ;;  %v4724_v34 = vadd.f32 %v1824_v37, %v4600_v0 }
 0x10d   : > { %6050 = vst [vmem:[#allocation59_spill] sm:$0xff] %v4701_v15  ;;  %6051 = vst [vmem:[#allocation60_spill] sm:$0xff] %v4704_v19  ;;  %v2193_v47 = vld [vmem:[#allocation3 + $0x2a8] sm:$0x7f]  ;;  %v2194_v1 = vld [vmem:[#allocation3 + $0x2b0] sm:$0x7f]  ;;  %v4715_v22 = vmul.f32 %v6040_v43, %v2191_v41  ;;  %v4718_v55 = vmul.f32 %v6038_v4, %v2192_v33 }
 0x10e   : > { %v1856_v62 = vld [vmem:[#allocation3 + $0x348] sm:$0x7f]  ;;  %v1471_v9 = vrot.slane %v1329_v50, 4  ;;  %v1327_v57 = vld [vmem:[#allocation2 + $0xa0] sm:$0xf0]  ;;  %6054 = vst [vmem:[#allocation63_spill] sm:$0xff] %v4721_v24  ;;  %v4727_v51 = vmul.f32 %v6039_v13, %v2193_v47  ;;  %v4733_v50 = vmul.f32 %v6040_v43, %v2194_v1  ;;  %v4740_v47 = vadd.f32 %v1825_v28, %v4613_v14 }
 0x10f   : > { %v2262_v45 = vld [vmem:[#allocation3 + $0x348] sm:$0x7f]  ;;  %6052 = vst [vmem:[#allocation61_spill] sm:$0xff] %v4715_v22  ;;  %6053 = vst [vmem:[#allocation62_spill] sm:$0xff] %v4718_v55  ;;  %v1857_v58 = vld [vmem:[#allocation3 + $0x350] sm:$0x7f] }
 0x110   : > { %v2263_v30 = vld [vmem:[#allocation3 + $0x350] sm:$0x7f]  ;;  %v1330_v46 = vld [vmem:[#allocation2 + $0xb8] sm:$0x7]  ;;  %6055 = vst [vmem:[#allocation64_spill] sm:$0xff] %v4727_v51  ;;  %v1472_v16 = vsel %vm1439_vm2, %v1470_v12, %v1471_v9  ;;  %v1473_v37 = vrot.slane %v1327_v57, 4  ;;  %v4743_v12 = vadd.f32 %v1826_v44, %v4616_v36 }
 0x111   : > { %v1858_v3 = vld [vmem:[#allocation3 + $0x358] sm:$0x7f]  ;;  %v1331_v8 = vld [vmem:[#allocation2 + $0xc0] sm:$0xf0]  ;;  %v6059_v21 = vld [vmem:[#allocation27_spill] sm:$0xff] }
 0x112   : > { %v2264_v49 = vld [vmem:[#allocation3 + $0x358] sm:$0x7f]  ;;  %v6056_v56 = vld [vmem:[#allocation20_spill] sm:$0xff]  ;;  %v4737_v41 = vmul.f32 %v6059_v21, %v2262_v45  ;;  %v1859_v0 = vld [vmem:[#allocation3 + $0x360] sm:$0x7f] }
 0x113   : > { %v2155_v27 = vadd.f32 %v6056_v56, %v4480_v39  ;;  %6057 = vst [vmem:[#allocation20_spill] sm:$0xff] %v4733_v50  ;;  %v6058_v42 = vld [vmem:[#allocation24_spill] sm:$0xff]  ;;  %1583 = vst [vmem:[#allocation3 + $0x470] sm:$0x7f] %v1472_v16  ;;  %v1334_v33 = vld [vmem:[#allocation2 + $0xd8] sm:$0x7] }
 0x114   : > { %v1893_v31 = vmul.f32 %v6058_v42, %v1856_v62  ;;  %v2265_v9 = vld [vmem:[#allocation3 + $0x360] sm:$0x7f]  ;;  %v1474_v39 = vrot.slane %v1330_v46, 4  ;;  %v1476_v56 = vrot.slane %v1331_v8, 4  ;;  %v1332_v1 = vld [vmem:[#allocation2 + $0xc8] sm:$0xf0]  ;;  %v1896_v44 = vmul.f32 %v6058_v42, %v1859_v0 }
 0x115   : > { %v6060_v62 = vld [vmem:[#allocation25_spill] sm:$0xff]  ;;  %v6061_v51 = vld [vmem:[#allocation28_spill] sm:$0xff]  ;;  %v1860_v57 = vld [vmem:[#allocation3 + $0x368] sm:$0x7f]  ;;  %v1477_v24 = vrot.slane %v1334_v33, 4  ;;  %v1479_v33 = vrot.slane %v1332_v1, 4 }
 0x116   : > { %v4746_v50 = vadd.f32 %v1893_v31, %v4619_v23  ;;  %v1894_v45 = vmul.f32 %v6060_v62, %v1857_v58  ;;  %v4750_v55 = vmul.f32 %v6061_v51, %v2263_v30  ;;  %v2266_v16 = vld [vmem:[#allocation3 + $0x368] sm:$0x7f]  ;;  %v6062_v14 = vld [vmem:[#allocation26_spill] sm:$0xff]  ;;  %v6063_v22 = vld [vmem:[#allocation29_spill] sm:$0xff]  ;;  %v1475_v8 = vsel %vm1439_vm2, %v1473_v37, %v1474_v39 }
 0x117   : > { %v1895_v28 = vmul.f32 %v6062_v14, %v1858_v3  ;;  %v4754_v36 = vmul.f32 %v6063_v22, %v2264_v49  ;;  %v1861_v46 = vld [vmem:[#allocation3 + $0x370] sm:$0x7f]  ;;  %v1333_v31 = vld [vmem:[#allocation2 + $0xd0] sm:$0xf0]  ;;  %v1336_v19 = vld [vmem:[#allocation2 + $0xe8] sm:$0x7]  ;;  %v4762_v30 = vmul.f32 %v6059_v21, %v2265_v9  ;;  %v1478_v3 = vsel %vm1439_vm2, %v1476_v56, %v1477_v24 }
 0x118   : > { %v1335_v23 = vld [vmem:[#allocation2 + $0xe0] sm:$0x7]  ;;  %v4759_v58 = vadd.f32 %v1894_v45, %v4626_v2  ;;  %1584 = vst [vmem:[#allocation3 + $0x478] sm:$0x7f] %v1475_v8  ;;  %v1337_v49 = vld [vmem:[#allocation2 + $0xf0] sm:$0xf0]  ;;  %v1897_v0 = vmul.f32 %v6060_v62, %v1860_v57  ;;  %v4768_v24 = vmul.f32 %v6061_v51, %v2266_v16 }
 0x119   : > { %6064 = vst [vmem:[#allocation24_spill] sm:$0xff] %v4762_v30  ;;  %v1340_v15 = vld [vmem:[#allocation2 + $0x108] sm:$0x7]  ;;  %v2267_v61 = vld [vmem:[#allocation3 + $0x370] sm:$0x7f]  ;;  %v1480_v37 = vrot.slane %v1335_v23, 4  ;;  %v4773_v23 = vadd.f32 %v1895_v28, %v4633_v26 }
 0x11a   : > { %v1862_v7 = vld [vmem:[#allocation3 + $0x378] sm:$0x7f]  ;;  %1585 = vst [vmem:[#allocation3 + $0x480] sm:$0x7f] %v1478_v3  ;;  %v1482_v39 = vrot.slane %v1333_v31, 4  ;;  %v1483_v43 = vrot.slane %v1336_v19, 4  ;;  %v4776_v19 = vadd.f32 %v1896_v44, %v4642_v63  ;;  %v4782_v44 = vmul.f32 %v6063_v22, %v2267_v61 }
 0x11b   : > { %v1338_v13 = vld [vmem:[#allocation2 + $0xf8] sm:$0xf0]  ;;  %v1485_v2 = vrot.slane %v1337_v49, 4  ;;  %v1486_v45 = vrot.slane %v1340_v15, 4  ;;  %v1341_v4 = vld [vmem:[#allocation2 + $0x110] sm:$0x7]  ;;  %v1481_v57 = vsel %vm1439_vm2, %v1479_v33, %v1480_v37  ;;  %v4789_v61 = vadd.f32 %v1897_v0, %v4669_v48 }
 0x11c   : > { %v1488_v9 = vrot.slane %v1338_v13, 4  ;;  %v6065_v30 = vld [vmem:[#allocation32_spill] sm:$0xff]  ;;  %6066 = vst [vmem:[#allocation27_spill] sm:$0xff] %v4768_v24  ;;  %v2268_v56 = vld [vmem:[#allocation3 + $0x378] sm:$0x7f]  ;;  %v1484_v40 = vsel %vm1439_vm2, %v1482_v39, %v1483_v43  ;;  %v1489_v3 = vrot.slane %v1341_v4, 4  ;;  %v1898_v13 = vmul.f32 %v6062_v14, %v1861_v46 }
 0x11d   : > { %v2237_v8 = vadd.f32 %v6065_v30, %v2155_v27  ;;  %v1863_v1 = vld [vmem:[#allocation3 + $0x380] sm:$0x7f]  ;;  %1586 = vst [vmem:[#allocation3 + $0x488] sm:$0x7f] %v1481_v57  ;;  %1587 = vst [vmem:[#allocation3 + $0x490] sm:$0x7f] %v1484_v40  ;;  %v1487_v27 = vsel %vm1439_vm2, %v1485_v2, %v1486_v45  ;;  %v1899_v46 = vmul.f32 %v6058_v42, %v1862_v7 }
 0x11e   : > { %v2269_v15 = vld [vmem:[#allocation3 + $0x380] sm:$0x7f]  ;;  %v1339_v16 = vld [vmem:[#allocation2 + $0x100] sm:$0xf0]  ;;  %v1342_v31 = vld [vmem:[#allocation2 + $0x118] sm:$0x7]  ;;  %v1490_v4 = vsel %vm1439_vm2, %v1488_v9, %v1489_v3  ;;  %v4792_v7 = vadd.f32 %v1898_v13, %v4674_v53 }
 0x11f   : > { %v1343_v30 = vld [vmem:[#allocation2 + $0x120] sm:$0xf0]  ;;  %v1864_v33 = vld [vmem:[#allocation3 + $0x388] sm:$0x7f]  ;;  %1588 = vst [vmem:[#allocation3 + $0x498] sm:$0x7f] %v1487_v27  ;;  %v1900_v27 = vmul.f32 %v6060_v62, %v1863_v1  ;;  %v4805_v48 = vmul.f32 %v6061_v51, %v2269_v15  ;;  %v2320_v15 = vadd.f32 %v4737_v41, %v4623_v17 }
 0x120   : > { %v2270_v49 = vld [vmem:[#allocation3 + $0x388] sm:$0x7f]  ;;  %v1491_v43 = vrot.slane %v1339_v16, 4  ;;  %v1492_v26 = vrot.slane %v1342_v31, 4  ;;  %v1494_v63 = vrot.slane %v1343_v30, 4  ;;  %6067 = vst [vmem:[#allocation25_spill] sm:$0xff] %v4782_v44  ;;  %v4799_v44 = vadd.f32 %v1899_v46, %v4682_v59 }
 0x121   : > { %v1346_v28 = vld [vmem:[#allocation2 + $0x138] sm:$0x7]  ;;  %v1865_v40 = vld [vmem:[#allocation3 + $0x390] sm:$0x7f]  ;;  %1589 = vst [vmem:[#allocation3 + $0x4a0] sm:$0x7f] %v1490_v4  ;;  %v4795_v4 = vmul.f32 %v6059_v21, %v2268_v56 }
 0x122   : > { %v1495_v37 = vrot.slane %v1346_v28, 4  ;;  %v1344_v39 = vld [vmem:[#allocation2 + $0x128] sm:$0xf0]  ;;  %v1347_v2 = vld [vmem:[#allocation2 + $0x140] sm:$0x7]  ;;  %v6068_v45 = vld [vmem:[#allocation34_spill] sm:$0xff]  ;;  %v1493_v16 = vsel %vm1439_vm2, %v1491_v43, %v1492_v26  ;;  %v4802_v43 = vadd.f32 %v1900_v27, %v4688_v25  ;;  %v1901_v26 = vmul.f32 %v6062_v14, %v1864_v33 }
 0x123   : > { %v2319_v57 = vadd.f32 %v6068_v45, %v2237_v8  ;;  %v2271_v24 = vld [vmem:[#allocation3 + $0x390] sm:$0x7f]  ;;  %v1866_v9 = vld [vmem:[#allocation3 + $0x398] sm:$0x7f]  ;;  %v1497_v31 = vrot.slane %v1344_v39, 4  ;;  %v1498_v30 = vrot.slane %v1347_v2, 4  ;;  %v1902_v39 = vmul.f32 %v6058_v42, %v1865_v40 }
 0x124   : > { %v2272_v3 = vld [vmem:[#allocation3 + $0x398] sm:$0x7f]  ;;  %v1867_v28 = vld [vmem:[#allocation3 + $0x3a0] sm:$0x7f]  ;;  %1590 = vst [vmem:[#allocation3 + $0x4a8] sm:$0x7f] %v1493_v16  ;;  %v1496_v1 = vsel %vm1439_vm2, %v1494_v63, %v1495_v37  ;;  %v4810_v63 = vmul.f32 %v6063_v22, %v2270_v49  ;;  %v1903_v2 = vmul.f32 %v6060_v62, %v1866_v9 }
 0x125   : > { %v2273_v8 = vld [vmem:[#allocation3 + $0x3a0] sm:$0x7f]  ;;  %v1868_v53 = vld [vmem:[#allocation3 + $0x3a8] sm:$0x7f]  ;;  %1591 = vst [vmem:[#allocation3 + $0x4b0] sm:$0x7f] %v1496_v1  ;;  %v1499_v0 = vsel %vm1439_vm2, %v1497_v31, %v1498_v30  ;;  %v4813_v46 = vadd.f32 %v4486_v38, %v2319_v57  ;;  %v4820_v31 = vadd.f32 %v1901_v26, %v4695_v29  ;;  %v4823_v38 = vmul.f32 %v6059_v21, %v2271_v24 }
 0x126   : > { %v1345_v45 = vld [vmem:[#allocation2 + $0x130] sm:$0xf0]  ;;  %v1348_v56 = vld [vmem:[#allocation2 + $0x148] sm:$0x7]  ;;  %v2274_v37 = vld [vmem:[#allocation3 + $0x3a8] sm:$0x7f]  ;;  %v4826_v57 = vmul.f32 %v6061_v51, %v2272_v3  ;;  %v1904_v17 = vmul.f32 %v6062_v14, %v1867_v28  ;;  %v4830_v9 = vadd.f32 %v1902_v39, %v4698_v20  ;;  %v4833_v30 = vadd.f32 %v1903_v2, %v4707_v5 }
 0x127   : > { %v498_v13 = vld [vmem:[#allocation2 + $0x150] sm:$0x7f]  ;;  %1592 = vst [vmem:[#allocation3 + $0x4b8] sm:$0x7f] %v1499_v0  ;;  %v499_v59 = vld [vmem:[#allocation2 + $0x158] sm:$0x7f]  ;;  %v4836_v29 = vmul.f32 %v6063_v22, %v2273_v8  ;;  %v1905_v24 = vmul.f32 %v6058_v42, %v1868_v53  ;;  %v4844_v28 = vmul.f32 %v6059_v21, %v2274_v37 }
 0x128   : > { %531 = vst [vmem:[#allocation3 + $0xa8] sm:$0x7f] %v498_v13  ;;  %v500_v25 = vld [vmem:[#allocation2 + $0x160] sm:$0x7f]  ;;  %v1500_v16 = vrot.slane %v1345_v45, 4  ;;  %v1501_v49 = vrot.slane %v1348_v56, 4  ;;  %v4841_v0 = vadd.f32 %v1904_v17, %v4712_v18 }
 0x129   : > { %v1869_v27 = vld [vmem:[#allocation3 + $0x3b0] sm:$0x7f]  ;;  %532 = vst [vmem:[#allocation3 + $0xb0] sm:$0x7f] %v499_v59  ;;  %533 = vst [vmem:[#allocation3 + $0xb8] sm:$0x7f] %v500_v25  ;;  %v4852_v26 = vadd.f32 %v1905_v24, %v4724_v34  ;;  %v4862_v34 = vadd.f32 %v4750_v55, %v4629_v6 }
 0x12a   : > { %v2275_v33 = vld [vmem:[#allocation3 + $0x3b0] sm:$0x7f]  ;;  %v1870_v41 = vld [vmem:[#allocation3 + $0x3b8] sm:$0x7f]  ;;  %6069 = vst [vmem:[#allocation28_spill] sm:$0xff] %v4844_v28  ;;  %v1906_v20 = vmul.f32 %v6060_v62, %v1869_v27  ;;  %v6071_v42 = vld [vmem:[#allocation30_spill] sm:$0xff]  ;;  %v1502_v18 = vsel %vm1439_vm2, %v1500_v16, %v1501_v49 }
 0x12b   : > { %v1937_v40 = vld [vmem:[#allocation3 + $0x450] sm:$0x7f]  ;;  %v2276_v1 = vld [vmem:[#allocation3 + $0x3b8] sm:$0x7f]  ;;  %v4848_v56 = vmul.f32 %v6061_v51, %v2275_v33  ;;  %v348_v8 = vld [vmem:[%s4091_s7 + $0x98] sm:$0x7f]  ;;  %v1907_v37 = vmul.f32 %v6062_v14, %v1870_v41 }
 0x12c   : > { %v2344_v45 = vld [vmem:[#allocation3 + $0x450] sm:$0x7f]  ;;  %v347_v3 = vld [vmem:[%s4091_s7 + $0x90] sm:$0x7f]  ;;  %v1974_v53 = vmul.f32 %v6071_v42, %v1937_v40  ;;  %v1940_v25 = vld [vmem:[#allocation3 + $0x468] sm:$0x7f]  ;;  %v4858_v62 = vmul.f32 %v6063_v22, %v2276_v1  ;;  %v4865_v33 = vadd.f32 %v1906_v20, %v4740_v47 }
 0x12d   : > { %6070 = vst [vmem:[#allocation26_spill] sm:$0xff] %v4848_v56  ;;  %v1938_v5 = vld [vmem:[#allocation3 + $0x458] sm:$0x7f]  ;;  %v1939_v59 = vld [vmem:[#allocation3 + $0x460] sm:$0x7f]  ;;  %v368_v39 = vmax.f32 %v347_v3, 0.0  ;;  %v2381_v16 = vmul.f32 %v4440_v52, %v2344_v45  ;;  %v4871_v41 = vadd.f32 %v1907_v37, %v4743_v12  ;;  %v1977_v6 = vmul.f32 %v6071_v42, %v1940_v25 }
 0x12e   : > { %v2345_v13 = vld [vmem:[#allocation3 + $0x458] sm:$0x7f]  ;;  %6072 = vst [vmem:[#allocation29_spill] sm:$0xff] %v4858_v62  ;;  %v2346_v2 = vld [vmem:[#allocation3 + $0x460] sm:$0x7f]  ;;  %v369_v27 = vmax.f32 %v348_v8, 0.0  ;;  %v1995_v17 = vadd.f32 %v1974_v53, %v4746_v50  ;;  %v1975_v49 = vmul.f32 %v4361_v10, %v1938_v5  ;;  %v1976_v24 = vmul.f32 %v4374_v32, %v1939_v59 }
 0x12f   : > { %1593 = vst [vmem:[#allocation3 + $0x4c0] sm:$0x7f] %v1502_v18  ;;  %v1941_v14 = vld [vmem:[#allocation3 + $0x470] sm:$0x7f]  ;;  %v2382_v40 = vmul.f32 %v4445_v11, %v2345_v13  ;;  %v564_v1 = vld [vmem:[#allocation2 + $0x150] sm:$0xfe]  ;;  %v4879_v50 = vmul.f32 %v4448_v35, %v2346_v2  ;;  %v4881_v8 = vadd.f32 %v2381_v16, %v2320_v15  ;;  %v1998_v13 = vadd.f32 %v1977_v6, %v4776_v19 }
 0x130   : > { %v349_v55 = vld [vmem:[%s4091_s7 + $0xa0] sm:$0x7f]  ;;  %v1996_v3 = vadd.f32 %v1975_v49, %v4759_v58  ;;  %v410_v5 = vrot.slane %v368_v39, 6  ;;  %v1997_v12 = vadd.f32 %v1976_v24, %v4773_v23  ;;  %v1978_v53 = vmul.f32 %v4361_v10, %v1941_v14  ;;  %v751_v18 = vld [vmem:[#allocation2 + $0x150] sm:$0xfc]  ;;  %v6074_v37 = vld [vmem:[#allocation37_spill] sm:$0xff] }
 0x131   : > { %v565_v47 = vld [vmem:[#allocation2 + $0x158] sm:$0xfe]  ;;  %v2348_v20 = vld [vmem:[#allocation3 + $0x470] sm:$0x7f]  ;;  %6073 = vst [vmem:[#allocation32_spill] sm:$0xff] %v4881_v8  ;;  %v411_v59 = vrot.slane %v369_v27, 6  ;;  %v4887_v62 = vadd.f32 %v6074_v37, %v1995_v17 }
 0x132   : > { %v2347_v45 = vld [vmem:[#allocation3 + $0x468] sm:$0x7f]  ;;  %v566_v25 = vld [vmem:[#allocation2 + $0x160] sm:$0xfe]  ;;  %v1942_v58 = vld [vmem:[#allocation3 + $0x478] sm:$0x7f]  ;;  %v1999_v16 = vadd.f32 %v1978_v53, %v4789_v61 }
 0x133   : > { %471 = vst [vmem:[#allocation2 + $0x180] sm:$0xfc] %v410_v5  ;;  %474 = vst [vmem:[#allocation2 + $0x198] sm:$0x1] %v410_v5  ;;  %v370_v2 = vmax.f32 %v349_v55, 0.0  ;;  %v630_v49 = vrot.slane %v564_v1, 1  ;;  %v4894_v17 = vmul.f32 %v4440_v52, %v2347_v45 }
 0x134   : > { %v631_v39 = vrot.slane %v565_v47, 1  ;;  %v754_v15 = vld [vmem:[#allocation2 + $0x168] sm:$0x1]  ;;  %472 = vst [vmem:[#allocation2 + $0x188] sm:$0xfc] %v411_v59  ;;  %v632_v23 = vrot.slane %v566_v25, 1  ;;  %v4903_v25 = vmul.f32 %v4445_v11, %v2348_v20 }
 0x135   : > { %475 = vst [vmem:[#allocation2 + $0x1a0] sm:$0x1] %v411_v59  ;;  %v905_v19 = vrot.slane %v751_v18, 2  ;;  %v906_v14 = vrot.slane %v754_v15, 2  ;;  %v752_v27 = vld [vmem:[#allocation2 + $0x158] sm:$0xfc] }
 0x136   : > { %v6075_v24 = vld [vmem:[#allocation39_spill] sm:$0xff]  ;;  %v2349_v37 = vld [vmem:[#allocation3 + $0x478] sm:$0x7f]  ;;  %v1943_v5 = vld [vmem:[#allocation3 + $0x480] sm:$0x7f]  ;;  %v412_v55 = vrot.slane %v370_v2, 6 }
 0x137   : > { %v4891_v6 = vadd.f32 %v6075_v24, %v1996_v3  ;;  %697 = vst [vmem:[#allocation3 + $0x1b0] sm:$0x7f] %v630_v49  ;;  %698 = vst [vmem:[#allocation3 + $0x1b8] sm:$0x7f] %v631_v39  ;;  %v908_v1 = vrot.slane %v752_v27, 2  ;;  %v6076_v47 = vld [vmem:[#allocation41_spill] sm:$0xff]  ;;  %v907_v3 = vsel %vm841_vm0, %v905_v19, %v906_v14 }
 0x138   : > { %v4897_v61 = vadd.f32 %v6076_v47, %v1997_v12  ;;  %v6077_v53 = vld [vmem:[#allocation43_spill] sm:$0xff]  ;;  %699 = vst [vmem:[#allocation3 + $0x1c0] sm:$0x7f] %v632_v23  ;;  %v755_v45 = vld [vmem:[#allocation2 + $0x170] sm:$0x1]  ;;  %v6079_v27 = vld [vmem:[#allocation45_spill] sm:$0xff]  ;;  %v1979_v23 = vmul.f32 %v4374_v32, %v1942_v58  ;;  %v1980_v58 = vmul.f32 %v6071_v42, %v1943_v5 }
 0x139   : > { %v4900_v59 = vadd.f32 %v6077_v53, %v1998_v13  ;;  %v753_v18 = vld [vmem:[#allocation2 + $0x160] sm:$0xfc]  ;;  %v756_v15 = vld [vmem:[#allocation2 + $0x178] sm:$0x1]  ;;  %v2350_v24 = vld [vmem:[#allocation3 + $0x480] sm:$0x7f]  ;;  %v4907_v13 = vadd.f32 %v2382_v40, %v4862_v34  ;;  %v4910_v20 = vadd.f32 %v6079_v27, %v1999_v16  ;;  %v4918_v16 = vmul.f32 %v4448_v35, %v2349_v37 }
 0x13a   : > { %473 = vst [vmem:[#allocation2 + $0x190] sm:$0xfc] %v412_v55  ;;  %476 = vst [vmem:[#allocation2 + $0x1a8] sm:$0x1] %v412_v55  ;;  %v909_v2 = vrot.slane %v755_v45, 2  ;;  %v911_v49 = vrot.slane %v753_v18, 2  ;;  %v2322_v55 = vadd.f32 %v4754_v36, %v4636_v60  ;;  %v2000_v36 = vadd.f32 %v1979_v23, %v4792_v7 }
 0x13b   : > { %996 = vst [vmem:[#allocation3 + $0x2b8] sm:$0x7f] %v907_v3  ;;  %v912_v12 = vrot.slane %v756_v15, 2  ;;  %v1050_v39 = vld [vmem:[#allocation2 + $0x150] sm:$0xf8]  ;;  %6078 = vst [vmem:[#allocation34_spill] sm:$0xff] %v4907_v13 }
 0x13c   : > { %v1944_v19 = vld [vmem:[#allocation3 + $0x488] sm:$0x7f]  ;;  %v1053_v14 = vld [vmem:[#allocation2 + $0x168] sm:$0x3]  ;;  %v1204_v47 = vrot.slane %v1050_v39, 3  ;;  %v910_v45 = vsel %vm841_vm0, %v908_v1, %v909_v2 }
 0x13d   : > { %v1051_v53 = vld [vmem:[#allocation2 + $0x158] sm:$0xf8]  ;;  %v1945_v3 = vld [vmem:[#allocation3 + $0x490] sm:$0x7f]  ;;  %v913_v18 = vsel %vm841_vm0, %v911_v49, %v912_v12  ;;  %v1205_v15 = vrot.slane %v1053_v14, 3  ;;  %v1981_v7 = vmul.f32 %v4361_v10, %v1944_v19 }
 0x13e   : > { %v1054_v34 = vld [vmem:[#allocation2 + $0x170] sm:$0x3]  ;;  %v1207_v40 = vrot.slane %v1051_v53, 3  ;;  %v1052_v56 = vld [vmem:[#allocation2 + $0x160] sm:$0xf8]  ;;  %v4924_v53 = vmul.f32 %v4440_v52, %v2350_v24  ;;  %v4931_v24 = vadd.f32 %v4879_v50, %v2322_v55  ;;  %v6081_v19 = vld [vmem:[#allocation47_spill] sm:$0xff] }
 0x13f   : > { %997 = vst [vmem:[#allocation3 + $0x2c0] sm:$0x7f] %v910_v45  ;;  %998 = vst [vmem:[#allocation3 + $0x2c8] sm:$0x7f] %v913_v18  ;;  %v1208_v39 = vrot.slane %v1054_v34, 3  ;;  %v1210_v28 = vrot.slane %v1052_v56, 3  ;;  %v1206_v1 = vsel %vm1140_vm1, %v1204_v47, %v1205_v15  ;;  %v2001_v56 = vadd.f32 %v1980_v58, %v4799_v44 }
 0x140   : > { %v1055_v27 = vld [vmem:[#allocation2 + $0x178] sm:$0x3]  ;;  %v1349_v60 = vld [vmem:[#allocation2 + $0x150] sm:$0xf0]  ;;  %v1352_v49 = vld [vmem:[#allocation2 + $0x168] sm:$0x7] }
 0x141   : > { %v1211_v2 = vrot.slane %v1055_v27, 3  ;;  %v1503_v12 = vrot.slane %v1349_v60, 4  ;;  %v1350_v14 = vld [vmem:[#allocation2 + $0x158] sm:$0xf0]  ;;  %v1946_v13 = vld [vmem:[#allocation3 + $0x498] sm:$0x7f]  ;;  %v1209_v5 = vsel %vm1140_vm1, %v1207_v40, %v1208_v39  ;;  %v1982_v60 = vmul.f32 %v4374_v32, %v1945_v3 }
 0x142   : > { %v2351_v37 = vld [vmem:[#allocation3 + $0x488] sm:$0x7f]  ;;  %1295 = vst [vmem:[#allocation3 + $0x3c0] sm:$0x7f] %v1206_v1  ;;  %v1504_v45 = vrot.slane %v1352_v49, 4  ;;  %v1506_v18 = vrot.slane %v1350_v14, 4  ;;  %v4936_v49 = vadd.f32 %v6081_v19, %v2000_v36  ;;  %v1983_v14 = vmul.f32 %v6071_v42, %v1946_v13 }
 0x143   : > { %v2352_v23 = vld [vmem:[#allocation3 + $0x490] sm:$0x7f]  ;;  %v1947_v47 = vld [vmem:[#allocation3 + $0x4a0] sm:$0x7f]  ;;  %1296 = vst [vmem:[#allocation3 + $0x3c8] sm:$0x7f] %v1209_v5  ;;  %v1212_v15 = vsel %vm1140_vm1, %v1210_v28, %v1211_v2  ;;  %v4941_v3 = vadd.f32 %v4506_v54, %v4887_v62 }
 0x144   : > { %v1353_v34 = vld [vmem:[#allocation2 + $0x170] sm:$0x7]  ;;  %v1351_v27 = vld [vmem:[#allocation2 + $0x160] sm:$0xf0]  ;;  %6080 = vst [vmem:[#allocation30_spill] sm:$0xff] %v4931_v24  ;;  %v1505_v40 = vsel %vm1439_vm2, %v1503_v12, %v1504_v45  ;;  %v2002_v12 = vadd.f32 %v1981_v7, %v4802_v43  ;;  %v2003_v45 = vadd.f32 %v1982_v60, %v4820_v31  ;;  %v6082_v62 = vld [vmem:[#allocation49_spill] sm:$0xff] }
 0x145   : > { %v1948_v1 = vld [vmem:[#allocation3 + $0x4a8] sm:$0x7f]  ;;  %1297 = vst [vmem:[#allocation3 + $0x3d0] sm:$0x7f] %v1212_v15  ;;  %v1507_v39 = vrot.slane %v1353_v34, 4  ;;  %v1509_v58 = vrot.slane %v1351_v27, 4  ;;  %v1984_v15 = vmul.f32 %v4361_v10, %v1947_v47  ;;  %v4952_v7 = vadd.f32 %v6082_v62, %v2001_v56 }
 0x146   : > { %v1354_v44 = vld [vmem:[#allocation2 + $0x178] sm:$0x7]  ;;  %v2353_v28 = vld [vmem:[#allocation3 + $0x498] sm:$0x7f]  ;;  %v2354_v2 = vld [vmem:[#allocation3 + $0x4a0] sm:$0x7f]  ;;  %v2004_v47 = vadd.f32 %v1983_v14, %v4830_v9 }
 0x147   : > { %1594 = vst [vmem:[#allocation3 + $0x4c8] sm:$0x7f] %v1505_v40  ;;  %v1510_v5 = vrot.slane %v1354_v44, 4  ;;  %v501_v50 = vld [vmem:[#allocation2 + $0x180] sm:$0x7f]  ;;  %v1508_v36 = vsel %vm1439_vm2, %v1506_v18, %v1507_v39  ;;  %v4948_v40 = vmul.f32 %v4445_v11, %v2351_v37  ;;  %v4955_v18 = vmul.f32 %v4448_v35, %v2352_v23 }
 0x148   : > { %v502_v55 = vld [vmem:[#allocation2 + $0x188] sm:$0x7f]  ;;  %534 = vst [vmem:[#allocation3 + $0xc0] sm:$0x7f] %v501_v50  ;;  %v503_v13 = vld [vmem:[#allocation2 + $0x190] sm:$0x7f]  ;;  %v2005_v60 = vadd.f32 %v1984_v15, %v4833_v30  ;;  %v4967_v30 = vmul.f32 %v4440_v52, %v2353_v28  ;;  %v4970_v14 = vmul.f32 %v4445_v11, %v2354_v2 }
 0x149   : > { %535 = vst [vmem:[#allocation3 + $0xc8] sm:$0x7f] %v502_v55  ;;  %v567_v34 = vld [vmem:[#allocation2 + $0x180] sm:$0xfe]  ;;  %v568_v27 = vld [vmem:[#allocation2 + $0x188] sm:$0xfe]  ;;  %v1511_v54 = vsel %vm1439_vm2, %v1509_v58, %v1510_v5  ;;  %v1985_v58 = vmul.f32 %v4374_v32, %v1948_v1 }
 0x14a   : > { %v2355_v44 = vld [vmem:[#allocation3 + $0x4a8] sm:$0x7f]  ;;  %v1949_v19 = vld [vmem:[#allocation3 + $0x4b0] sm:$0x7f]  ;;  %1595 = vst [vmem:[#allocation3 + $0x4d0] sm:$0x7f] %v1508_v36 }
 0x14b   : > { %536 = vst [vmem:[#allocation3 + $0xd0] sm:$0x7f] %v503_v13  ;;  %v633_v43 = vrot.slane %v567_v34, 1  ;;  %v634_v31 = vrot.slane %v568_v27, 1  ;;  %v2356_v37 = vld [vmem:[#allocation3 + $0x4b0] sm:$0x7f]  ;;  %v4978_v28 = vmul.f32 %v4448_v35, %v2355_v44  ;;  %v1986_v2 = vmul.f32 %v6071_v42, %v1949_v19 }
 0x14c   : > { %1596 = vst [vmem:[#allocation3 + $0x4d8] sm:$0x7f] %v1511_v54  ;;  %v569_v39 = vld [vmem:[#allocation2 + $0x190] sm:$0xfe]  ;;  %v757_v50 = vld [vmem:[#allocation2 + $0x180] sm:$0xfc] }
 0x14d   : > { %v760_v55 = vld [vmem:[#allocation2 + $0x198] sm:$0x1]  ;;  %v1950_v5 = vld [vmem:[#allocation3 + $0x4b8] sm:$0x7f]  ;;  %700 = vst [vmem:[#allocation3 + $0x1c8] sm:$0x7f] %v633_v43  ;;  %v2006_v43 = vadd.f32 %v1985_v58, %v4841_v0 }
 0x14e   : > { %701 = vst [vmem:[#allocation3 + $0x1d0] sm:$0x7f] %v634_v31  ;;  %v635_v36 = vrot.slane %v569_v39, 1  ;;  %v914_v56 = vrot.slane %v757_v50, 2  ;;  %v915_v13 = vrot.slane %v760_v55, 2  ;;  %v6083_v34 = vld [vmem:[#allocation51_spill] sm:$0xff]  ;;  %v1987_v44 = vmul.f32 %v4361_v10, %v1950_v5 }
 0x14f   : > { %v4961_v23 = vadd.f32 %v6083_v34, %v2002_v12  ;;  %v6084_v27 = vld [vmem:[#allocation53_spill] sm:$0xff]  ;;  %v761_v54 = vld [vmem:[#allocation2 + $0x1a0] sm:$0x1]  ;;  %v2031_v31 = vld [vmem:[#allocation3 + $0xa8] sm:$0x7f] }
 0x150   : > { %v4964_v9 = vadd.f32 %v6084_v27, %v2003_v45  ;;  %v2357_v15 = vld [vmem:[#allocation3 + $0x4b8] sm:$0x7f]  ;;  %702 = vst [vmem:[#allocation3 + $0x1d8] sm:$0x7f] %v635_v36  ;;  %v916_v62 = vsel %vm841_vm0, %v914_v56, %v915_v13  ;;  %v918_v39 = vrot.slane %v761_v54, 2  ;;  %v6085_v45 = vld [vmem:[#allocation54_spill] sm:$0xff]  ;;  %v4985_v36 = vmul.f32 %v4440_v52, %v2356_v37 }
 0x151   : > { %v758_v1 = vld [vmem:[#allocation2 + $0x188] sm:$0xfc]  ;;  %v759_v50 = vld [vmem:[#allocation2 + $0x190] sm:$0xfc]  ;;  %v4975_v55 = vadd.f32 %v6085_v45, %v2004_v47  ;;  %v2032_v34 = vld [vmem:[#allocation3 + $0xb0] sm:$0x7f]  ;;  %v4991_v42 = vmul.f32 %v4445_v11, %v2357_v15 }
 0x152   : > { %v917_v12 = vrot.slane %v758_v1, 2  ;;  %999 = vst [vmem:[#allocation3 + $0x2d0] sm:$0x7f] %v916_v62  ;;  %v762_v27 = vld [vmem:[#allocation2 + $0x1a8] sm:$0x1]  ;;  %v920_v24 = vrot.slane %v759_v50, 2  ;;  %v2007_v1 = vadd.f32 %v1986_v2, %v4852_v26  ;;  %v2008_v26 = vadd.f32 %v1987_v44, %v4865_v33 }
 0x153   : > { %v6086_v0 = vld [vmem:[#allocation55_spill] sm:$0xff]  ;;  %6087 = vst [vmem:[#allocation37_spill] sm:$0xff] %v4985_v36  ;;  %v2033_v56 = vld [vmem:[#allocation3 + $0xb8] sm:$0x7f]  ;;  %v921_v47 = vrot.slane %v762_v27, 2  ;;  %6088 = vst [vmem:[#allocation39_spill] sm:$0xff] %v4991_v42 }
 0x154   : > { %v4982_v58 = vadd.f32 %v6086_v0, %v2005_v60  ;;  %v919_v13 = vsel %vm841_vm0, %v917_v12, %v918_v39  ;;  %v1951_v19 = vld [vmem:[#allocation3 + $0x4c0] sm:$0x7f]  ;;  %v1056_v60 = vld [vmem:[#allocation2 + $0x180] sm:$0xf8]  ;;  %v6092_v37 = vld [vmem:[#allocation11_spill] sm:$0xff] }
 0x155   : > { %v6089_v54 = vld [vmem:[#allocation10_spill] sm:$0xff]  ;;  %1000 = vst [vmem:[#allocation3 + $0x2d8] sm:$0x7f] %v919_v13  ;;  %v6090_v50 = vld [vmem:[#allocation56_spill] sm:$0xff]  ;;  %v2069_v0 = vmul.f32 %v6092_v37, %v2032_v34  ;;  %v922_v12 = vsel %vm841_vm0, %v920_v24, %v921_v47  ;;  %v1059_v39 = vld [vmem:[#allocation2 + $0x198] sm:$0x3] }
 0x156   : > { %v2068_v62 = vmul.f32 %v6089_v54, %v2031_v31  ;;  %v4995_v45 = vadd.f32 %v6090_v50, %v2006_v43  ;;  %v1213_v27 = vrot.slane %v1056_v60, 3  ;;  %v6093_v10 = vld [vmem:[#allocation12_spill] sm:$0xff]  ;;  %1001 = vst [vmem:[#allocation3 + $0x2e0] sm:$0x7f] %v922_v12  ;;  %v1214_v15 = vrot.slane %v1059_v39, 3  ;;  %v6094_v31 = vld [vmem:[#allocation17_spill] sm:$0xff] }
 0x157   : > { %v2070_v5 = vmul.f32 %v6093_v10, %v2033_v56  ;;  %v1057_v2 = vld [vmem:[#allocation2 + $0x188] sm:$0xf8]  ;;  %v1060_v42 = vld [vmem:[#allocation2 + $0x1a0] sm:$0x3]  ;;  %v2241_v13 = vadd.f32 %v6094_v31, %v4941_v3  ;;  %v1988_v43 = vmul.f32 %v4374_v32, %v1951_v19  ;;  %v1058_v34 = vld [vmem:[#allocation2 + $0x190] sm:$0xf8] }
 0x158   : > { %6091 = vst [vmem:[#allocation41_spill] sm:$0xff] %v4995_v45  ;;  %v1216_v54 = vrot.slane %v1057_v2, 3  ;;  %v1217_v50 = vrot.slane %v1060_v42, 3  ;;  %v1061_v37 = vld [vmem:[#allocation2 + $0x1a8] sm:$0x3]  ;;  %v6095_v24 = vld [vmem:[#allocation35_spill] sm:$0xff]  ;;  %v1215_v33 = vsel %vm1140_vm1, %v1213_v27, %v1214_v15  ;;  %v5009_v3 = vadd.f32 %v2068_v62, %v2007_v1 }
 0x159   : > { %v2160_v47 = vadd.f32 %v6095_v24, %v4891_v6  ;;  %v2358_v60 = vld [vmem:[#allocation3 + $0x4c0] sm:$0x7f]  ;;  %v1219_v56 = vrot.slane %v1058_v34, 3  ;;  %v1220_v44 = vrot.slane %v1061_v37, 3  ;;  %v1355_v12 = vld [vmem:[#allocation2 + $0x180] sm:$0xf0]  ;;  %v2009_v24 = vadd.f32 %v1988_v43, %v4871_v41 }
 0x15a   : > { %v1358_v39 = vld [vmem:[#allocation2 + $0x198] sm:$0x7]  ;;  %v6096_v10 = vld [vmem:[#allocation36_spill] sm:$0xff]  ;;  %1298 = vst [vmem:[#allocation3 + $0x3d8] sm:$0x7f] %v1215_v33  ;;  %v1218_v42 = vsel %vm1140_vm1, %v1216_v54, %v1217_v50  ;;  %v1512_v19 = vrot.slane %v1355_v12, 4 }
 0x15b   : > { %v2161_v45 = vadd.f32 %v6096_v10, %v4897_v61  ;;  %v2113_v32 = vld [vmem:[#allocation3 + $0x1b0] sm:$0x7f]  ;;  %v1513_v2 = vrot.slane %v1358_v39, 4  ;;  %v1356_v31 = vld [vmem:[#allocation2 + $0x188] sm:$0xf0]  ;;  %v1221_v15 = vsel %vm1140_vm1, %v1219_v56, %v1220_v44  ;;  %v2090_v10 = vadd.f32 %v2069_v0, %v2008_v26 }
 0x15c   : > { %v1359_v6 = vld [vmem:[#allocation2 + $0x1a0] sm:$0x7]  ;;  %v2114_v27 = vld [vmem:[#allocation3 + $0x1b8] sm:$0x7f]  ;;  %1299 = vst [vmem:[#allocation3 + $0x3e0] sm:$0x7f] %v1218_v42 }
 0x15d   : > { %v1515_v34 = vrot.slane %v1356_v31, 4  ;;  %v1516_v37 = vrot.slane %v1359_v6, 4  ;;  %v1357_v36 = vld [vmem:[#allocation2 + $0x190] sm:$0xf0]  ;;  %v1360_v61 = vld [vmem:[#allocation2 + $0x1a8] sm:$0x7]  ;;  %v1514_v1 = vsel %vm1439_vm2, %v1512_v19, %v1513_v2 }
 0x15e   : > { %1300 = vst [vmem:[#allocation3 + $0x3e8] sm:$0x7f] %v1221_v15  ;;  %v1518_v62 = vrot.slane %v1357_v36, 4  ;;  %v1519_v33 = vrot.slane %v1360_v61, 4  ;;  %v504_v54 = vld [vmem:[#allocation2 + $0x1b0] sm:$0x7f]  ;;  %v5020_v36 = vmul.f32 %v4448_v35, %v2358_v60 }
 0x15f   : > { %v505_v50 = vld [vmem:[#allocation2 + $0x1b8] sm:$0x7f]  ;;  %v6097_v12 = vld [vmem:[#allocation24_spill] sm:$0xff]  ;;  %v2115_v8 = vld [vmem:[#allocation3 + $0x1c0] sm:$0x7f]  ;;  %v1517_v41 = vsel %vm1439_vm2, %v1515_v34, %v1516_v37  ;;  %v5023_v34 = vadd.f32 %v2070_v5, %v2009_v24 }
 0x160   : > { %v2323_v39 = vadd.f32 %v6097_v12, %v2241_v13  ;;  %1597 = vst [vmem:[#allocation3 + $0x4e0] sm:$0x7f] %v1514_v1  ;;  %537 = vst [vmem:[#allocation3 + $0xd8] sm:$0x7f] %v504_v54  ;;  %v506_v43 = vld [vmem:[#allocation2 + $0x1c0] sm:$0x7f]  ;;  %v1520_v13 = vsel %vm1439_vm2, %v1518_v62, %v1519_v33 }
 0x161   : > { %538 = vst [vmem:[#allocation3 + $0xe0] sm:$0x7f] %v505_v50  ;;  %v570_v56 = vld [vmem:[#allocation2 + $0x1b0] sm:$0xfe]  ;;  %v571_v44 = vld [vmem:[#allocation2 + $0x1b8] sm:$0xfe] }
 0x162   : > { %v6098_v42 = vld [vmem:[#allocation52_spill] sm:$0xff]  ;;  %v6099_v6 = vld [vmem:[#allocation18_spill] sm:$0xff]  ;;  %6100 = vst [vmem:[#allocation43_spill] sm:$0xff] %v5020_v36  ;;  %1598 = vst [vmem:[#allocation3 + $0x4e8] sm:$0x7f] %v1517_v41  ;;  %v636_v0 = vrot.slane %v570_v56, 1  ;;  %v5028_v56 = vadd.f32 %v4894_v17, %v2323_v39 }
 0x163   : > { %v2242_v31 = vadd.f32 %v6098_v42, %v2160_v47  ;;  %v2243_v19 = vadd.f32 %v6099_v6, %v2161_v45  ;;  %539 = vst [vmem:[#allocation3 + $0xe8] sm:$0x7f] %v506_v43  ;;  %v637_v26 = vrot.slane %v571_v44, 1  ;;  %v572_v2 = vld [vmem:[#allocation2 + $0x1c0] sm:$0xfe]  ;;  %v6101_v37 = vld [vmem:[#allocation13_spill] sm:$0xff] }
 0x164   : > { %v763_v15 = vld [vmem:[#allocation2 + $0x1b0] sm:$0xfc]  ;;  %v2150_v61 = vmul.f32 %v6101_v37, %v2113_v32  ;;  %1599 = vst [vmem:[#allocation3 + $0x4f0] sm:$0x7f] %v1520_v13  ;;  %v638_v1 = vrot.slane %v572_v2, 1  ;;  %6103 = vst [vmem:[#allocation45_spill] sm:$0xff] %v5028_v56 }
 0x165   : > { %v766_v47 = vld [vmem:[#allocation2 + $0x1c8] sm:$0x1]  ;;  %v923_v54 = vrot.slane %v763_v15, 2  ;;  %v764_v45 = vld [vmem:[#allocation2 + $0x1b8] sm:$0xfc]  ;;  %v6102_v50 = vld [vmem:[#allocation14_spill] sm:$0xff] }
 0x166   : > { %v2151_v60 = vmul.f32 %v6102_v50, %v2114_v27  ;;  %v2195_v12 = vld [vmem:[#allocation3 + $0x2b8] sm:$0x7f]  ;;  %703 = vst [vmem:[#allocation3 + $0x1e0] sm:$0x7f] %v636_v0  ;;  %704 = vst [vmem:[#allocation3 + $0x1e8] sm:$0x7f] %v637_v26  ;;  %v2171_v17 = vadd.f32 %v2150_v61, %v5009_v3 }
 0x167   : > { %v924_v62 = vrot.slane %v766_v47, 2  ;;  %v767_v33 = vld [vmem:[#allocation2 + $0x1d0] sm:$0x1]  ;;  %v926_v41 = vrot.slane %v764_v45, 2  ;;  %v765_v43 = vld [vmem:[#allocation2 + $0x1c0] sm:$0xfc] }
 0x168   : > { %705 = vst [vmem:[#allocation3 + $0x1f0] sm:$0x7f] %v638_v1  ;;  %v927_v5 = vrot.slane %v767_v33, 2  ;;  %v768_v32 = vld [vmem:[#allocation2 + $0x1d8] sm:$0x1]  ;;  %v929_v24 = vrot.slane %v765_v43, 2 }
 0x169   : > { %v1062_v44 = vld [vmem:[#allocation2 + $0x1b0] sm:$0xf8]  ;;  %v6104_v42 = vld [vmem:[#allocation27_spill] sm:$0xff]  ;;  %v6105_v13 = vld [vmem:[#allocation25_spill] sm:$0xff]  ;;  %v925_v26 = vsel %vm841_vm0, %v923_v54, %v924_v62  ;;  %v930_v37 = vrot.slane %v768_v32, 2 }
 0x16a   : > { %v2324_v6 = vadd.f32 %v6104_v42, %v2242_v31  ;;  %v2325_v2 = vadd.f32 %v6105_v13, %v2243_v19  ;;  %v6106_v27 = vld [vmem:[#allocation15_spill] sm:$0xff]  ;;  %v2196_v0 = vld [vmem:[#allocation3 + $0x2c0] sm:$0x7f]  ;;  %v1065_v47 = vld [vmem:[#allocation2 + $0x1c8] sm:$0x3]  ;;  %v1222_v45 = vrot.slane %v1062_v44, 3  ;;  %v928_v1 = vsel %vm841_vm0, %v926_v41, %v927_v5 }
 0x16b   : > { %v2152_v15 = vmul.f32 %v6106_v27, %v2115_v8  ;;  %v1063_v50 = vld [vmem:[#allocation2 + $0x1b8] sm:$0xf8]  ;;  %1002 = vst [vmem:[#allocation3 + $0x2e8] sm:$0x7f] %v925_v26  ;;  %v1223_v33 = vrot.slane %v1065_v47, 3  ;;  %v2172_v19 = vadd.f32 %v2151_v60, %v2090_v10  ;;  %v931_v8 = vsel %vm841_vm0, %v929_v24, %v930_v37  ;;  %v6107_v44 = vld [vmem:[#allocation21_spill] sm:$0xff] }
 0x16c   : > { %v2197_v39 = vld [vmem:[#allocation3 + $0x2c8] sm:$0x7f]  ;;  %v1066_v43 = vld [vmem:[#allocation2 + $0x1d0] sm:$0x3]  ;;  %v1225_v31 = vrot.slane %v1063_v50, 3  ;;  %v2232_v27 = vmul.f32 %v6107_v44, %v2195_v12 }
 0x16d   : > { %v1064_v42 = vld [vmem:[#allocation2 + $0x1c0] sm:$0xf8]  ;;  %1003 = vst [vmem:[#allocation3 + $0x2f0] sm:$0x7f] %v928_v1  ;;  %v1226_v13 = vrot.slane %v1066_v43, 3  ;;  %v1224_v3 = vsel %vm1140_vm1, %v1222_v45, %v1223_v33  ;;  %v6108_v37 = vld [vmem:[#allocation38_spill] sm:$0xff]  ;;  %v2173_v44 = vadd.f32 %v2152_v15, %v5023_v34  ;;  %v5052_v34 = vadd.f32 %v4918_v16, %v2325_v2 }
 0x16e   : > { %v1067_v54 = vld [vmem:[#allocation2 + $0x1d8] sm:$0x3]  ;;  %v1228_v62 = vrot.slane %v1064_v42, 3  ;;  %v1361_v32 = vld [vmem:[#allocation2 + $0x1b0] sm:$0xf0]  ;;  %v2162_v1 = vadd.f32 %v6108_v37, %v4900_v59 }
 0x16f   : > { %1004 = vst [vmem:[#allocation3 + $0x2f8] sm:$0x7f] %v931_v8  ;;  %v1229_v61 = vrot.slane %v1067_v54, 3  ;;  %v1364_v26 = vld [vmem:[#allocation2 + $0x1c8] sm:$0x7]  ;;  %v1521_v41 = vrot.slane %v1361_v32, 4  ;;  %v1227_v47 = vsel %vm1140_vm1, %v1225_v31, %v1226_v13 }
 0x170   : > { %v1362_v5 = vld [vmem:[#allocation2 + $0x1b8] sm:$0xf0]  ;;  %1301 = vst [vmem:[#allocation3 + $0x3f0] sm:$0x7f] %v1224_v3  ;;  %v1522_v10 = vrot.slane %v1364_v26, 4  ;;  %v6109_v43 = vld [vmem:[#allocation22_spill] sm:$0xff] }
 0x171   : > { %v1365_v60 = vld [vmem:[#allocation2 + $0x1d0] sm:$0x7]  ;;  %v1524_v50 = vrot.slane %v1362_v5, 4  ;;  %v1363_v24 = vld [vmem:[#allocation2 + $0x1c0] sm:$0xf0]  ;;  %v2233_v42 = vmul.f32 %v6109_v43, %v2196_v0  ;;  %v1230_v45 = vsel %vm1140_vm1, %v1228_v62, %v1229_v61  ;;  %v6110_v31 = vld [vmem:[#allocation23_spill] sm:$0xff]  ;;  %v5057_v43 = vadd.f32 %v2232_v27, %v2171_v17 }
 0x172   : > { %v2277_v12 = vld [vmem:[#allocation3 + $0x3c0] sm:$0x7f]  ;;  %1302 = vst [vmem:[#allocation3 + $0x3f8] sm:$0x7f] %v1227_v47  ;;  %v1525_v33 = vrot.slane %v1365_v60, 4  ;;  %v1527_v54 = vrot.slane %v1363_v24, 4  ;;  %v2234_v13 = vmul.f32 %v6110_v31, %v2197_v39  ;;  %v1523_v3 = vsel %vm1439_vm2, %v1521_v41, %v1522_v10 }
 0x173   : > { %v1366_v8 = vld [vmem:[#allocation2 + $0x1d8] sm:$0x7]  ;;  %v507_v32 = vld [vmem:[#allocation2 + $0x1e0] sm:$0x7f]  ;;  %1303 = vst [vmem:[#allocation3 + $0x400] sm:$0x7f] %v1230_v45  ;;  %v5049_v60 = vadd.f32 %v4903_v25, %v2324_v6  ;;  %v5059_v45 = vadd.f32 %v2233_v42, %v2172_v19 }
 0x174   : > { %v1528_v26 = vrot.slane %v1366_v8, 4  ;;  %540 = vst [vmem:[#allocation3 + $0xf0] sm:$0x7f] %v507_v32  ;;  %v508_v59 = vld [vmem:[#allocation2 + $0x1e8] sm:$0x7f]  ;;  %v1526_v0 = vsel %vm1439_vm2, %v1524_v50, %v1525_v33  ;;  %6112 = vst [vmem:[#allocation49_spill] sm:$0xff] %v5052_v34  ;;  %v5064_v8 = vadd.f32 %v2234_v13, %v2173_v44 }
 0x175   : > { %v509_v5 = vld [vmem:[#allocation2 + $0x1f0] sm:$0x7f]  ;;  %1600 = vst [vmem:[#allocation3 + $0x4f8] sm:$0x7f] %v1523_v3  ;;  %541 = vst [vmem:[#allocation3 + $0xf8] sm:$0x7f] %v508_v59 }
 0x176   : > { %542 = vst [vmem:[#allocation3 + $0x100] sm:$0x7f] %v509_v5  ;;  %v573_v62 = vld [vmem:[#allocation2 + $0x1e0] sm:$0xfe]  ;;  %v574_v61 = vld [vmem:[#allocation2 + $0x1e8] sm:$0xfe]  ;;  %v1529_v41 = vsel %vm1439_vm2, %v1527_v54, %v1528_v26 }
 0x177   : > { %v575_v47 = vld [vmem:[#allocation2 + $0x1f0] sm:$0xfe]  ;;  %6111 = vst [vmem:[#allocation47_spill] sm:$0xff] %v5049_v60  ;;  %1601 = vst [vmem:[#allocation3 + $0x500] sm:$0x7f] %v1526_v0  ;;  %v639_v10 = vrot.slane %v573_v62, 1 }
 0x178   : > { %v6113_v15 = vld [vmem:[#allocation58_spill] sm:$0xff]  ;;  %v640_v24 = vrot.slane %v574_v61, 1  ;;  %v641_v50 = vrot.slane %v575_v47, 1  ;;  %v769_v37 = vld [vmem:[#allocation2 + $0x1e0] sm:$0xfc]  ;;  %6114 = vst [vmem:[#allocation51_spill] sm:$0xff] %v5057_v43 }
 0x179   : > { %v2163_v39 = vadd.f32 %v6113_v15, %v4910_v20  ;;  %6115 = vst [vmem:[#allocation53_spill] sm:$0xff] %v5059_v45  ;;  %1602 = vst [vmem:[#allocation3 + $0x508] sm:$0x7f] %v1529_v41  ;;  %v772_v25 = vld [vmem:[#allocation2 + $0x1f8] sm:$0x1]  ;;  %v932_v6 = vrot.slane %v769_v37, 2  ;;  %v5067_v20 = vmul.f32 %v6059_v21, %v2277_v12 }
 0x17a   : > { %v770_v33 = vld [vmem:[#allocation2 + $0x1e8] sm:$0xfc]  ;;  %v6116_v16 = vld [vmem:[#allocation19_spill] sm:$0xff]  ;;  %6117 = vst [vmem:[#allocation54_spill] sm:$0xff] %v5064_v8  ;;  %706 = vst [vmem:[#allocation3 + $0x1f8] sm:$0x7f] %v639_v10 }
 0x17b   : > { %v5062_v2 = vadd.f32 %v6116_v16, %v2162_v1  ;;  %6118 = vst [vmem:[#allocation55_spill] sm:$0xff] %v5067_v20  ;;  %707 = vst [vmem:[#allocation3 + $0x200] sm:$0x7f] %v640_v24  ;;  %v933_v54 = vrot.slane %v772_v25, 2  ;;  %v773_v17 = vld [vmem:[#allocation2 + $0x200] sm:$0x1] }
 0x17c   : > { %708 = vst [vmem:[#allocation3 + $0x208] sm:$0x7f] %v641_v50  ;;  %v935_v27 = vrot.slane %v770_v33, 2  ;;  %v771_v19 = vld [vmem:[#allocation2 + $0x1f0] sm:$0xfc]  ;;  %v936_v42 = vrot.slane %v773_v17, 2 }
 0x17d   : > { %v774_v32 = vld [vmem:[#allocation2 + $0x208] sm:$0x1]  ;;  %v938_v31 = vrot.slane %v771_v19, 2  ;;  %v1068_v3 = vld [vmem:[#allocation2 + $0x1e0] sm:$0xf8]  ;;  %v6119_v26 = vld [vmem:[#allocation31_spill] sm:$0xff]  ;;  %v934_v13 = vsel %vm841_vm0, %v932_v6, %v933_v54 }
 0x17e   : > { %v2245_v59 = vadd.f32 %v6119_v26, %v2163_v39  ;;  %v6120_v1 = vld [vmem:[#allocation40_spill] sm:$0xff]  ;;  %v939_v21 = vrot.slane %v774_v32, 2  ;;  %v1071_v12 = vld [vmem:[#allocation2 + $0x1f8] sm:$0x3]  ;;  %v1231_v5 = vrot.slane %v1068_v3, 3  ;;  %v6121_v62 = vld [vmem:[#allocation42_spill] sm:$0xff]  ;;  %v937_v47 = vsel %vm841_vm0, %v935_v27, %v936_v42 }
 0x17f   : > { %v2164_v44 = vadd.f32 %v6120_v1, %v4936_v49  ;;  %v1069_v0 = vld [vmem:[#allocation2 + $0x1e8] sm:$0xf8]  ;;  %v2165_v61 = vadd.f32 %v6121_v62, %v4952_v7  ;;  %1005 = vst [vmem:[#allocation3 + $0x300] sm:$0x7f] %v934_v13  ;;  %v1232_v15 = vrot.slane %v1071_v12, 3  ;;  %v6122_v39 = vld [vmem:[#allocation44_spill] sm:$0xff] }
 0x180   : > { %v1072_v41 = vld [vmem:[#allocation2 + $0x200] sm:$0x3]  ;;  %v1234_v10 = vrot.slane %v1069_v0, 3  ;;  %v1070_v24 = vld [vmem:[#allocation2 + $0x1f0] sm:$0xf8]  ;;  %v2166_v50 = vadd.f32 %v6122_v39, %v4961_v23  ;;  %v940_v37 = vsel %vm841_vm0, %v938_v31, %v939_v21  ;;  %v6124_v3 = vld [vmem:[#allocation33_spill] sm:$0xff] }
 0x181   : > { %v2278_v49 = vld [vmem:[#allocation3 + $0x3c8] sm:$0x7f]  ;;  %1006 = vst [vmem:[#allocation3 + $0x308] sm:$0x7f] %v937_v47  ;;  %v1235_v25 = vrot.slane %v1072_v41, 3  ;;  %v1237_v33 = vrot.slane %v1070_v24, 3  ;;  %v1233_v17 = vsel %vm1140_vm1, %v1231_v5, %v1232_v15  ;;  %v2246_v23 = vadd.f32 %v6124_v3, %v2164_v44 }
 0x182   : > { %v1073_v6 = vld [vmem:[#allocation2 + $0x208] sm:$0x3]  ;;  %v1367_v16 = vld [vmem:[#allocation2 + $0x1e0] sm:$0xf0]  ;;  %v6123_v7 = vld [vmem:[#allocation46_spill] sm:$0xff]  ;;  %v2327_v3 = vadd.f32 %v4805_v48, %v2245_v59 }
 0x183   : > { %v2167_v54 = vadd.f32 %v6123_v7, %v4964_v9  ;;  %1007 = vst [vmem:[#allocation3 + $0x310] sm:$0x7f] %v940_v37  ;;  %v1238_v27 = vrot.slane %v1073_v6, 3  ;;  %v1370_v19 = vld [vmem:[#allocation2 + $0x1f8] sm:$0x7]  ;;  %v1530_v42 = vrot.slane %v1367_v16, 4  ;;  %v1236_v31 = vsel %vm1140_vm1, %v1234_v10, %v1235_v25 }
 0x184   : > { %v1368_v32 = vld [vmem:[#allocation2 + $0x1e8] sm:$0xf0]  ;;  %v2423_v26 = vld [vmem:[#allocation3 + $0x30] sm:$0x7f]  ;;  %1304 = vst [vmem:[#allocation3 + $0x408] sm:$0x7f] %v1233_v17 }
 0x185   : > { %v2279_v1 = vld [vmem:[#allocation3 + $0x3d0] sm:$0x7f]  ;;  %v1531_v13 = vrot.slane %v1370_v19, 4  ;;  %v1533_v12 = vrot.slane %v1368_v32, 4  ;;  %v1369_v0 = vld [vmem:[#allocation2 + $0x1f0] sm:$0xf0]  ;;  %v1239_v15 = vsel %vm1140_vm1, %v1237_v33, %v1238_v27  ;;  %v5093_v33 = vmul.f32 %v6061_v51, %v2278_v49 }
 0x186   : > { %v1371_v21 = vld [vmem:[#allocation2 + $0x200] sm:$0x7]  ;;  %v6125_v9 = vld [vmem:[#allocation59_spill] sm:$0xff]  ;;  %1305 = vst [vmem:[#allocation3 + $0x410] sm:$0x7f] %v1236_v31  ;;  %v1536_v24 = vrot.slane %v1369_v0, 4 }
 0x187   : > { %v2247_v62 = vadd.f32 %v6125_v9, %v2165_v61  ;;  %v2359_v47 = vld [vmem:[#allocation3 + $0x4c8] sm:$0x7f]  ;;  %v2360_v5 = vld [vmem:[#allocation3 + $0x4d0] sm:$0x7f]  ;;  %v1534_v41 = vrot.slane %v1371_v21, 4  ;;  %v1532_v25 = vsel %vm1439_vm2, %v1530_v42, %v1531_v13  ;;  %v2326_v61 = vadd.f32 %v4795_v4, %v5062_v2  ;;  %v6127_v7 = vld [vmem:[#allocation61_spill] sm:$0xff] }
 0x188   : > { %v1372_v44 = vld [vmem:[#allocation2 + $0x208] sm:$0x7]  ;;  %v6126_v39 = vld [vmem:[#allocation60_spill] sm:$0xff]  ;;  %1306 = vst [vmem:[#allocation3 + $0x418] sm:$0x7f] %v1239_v15  ;;  %v2249_v17 = vadd.f32 %v6127_v7, %v2167_v54  ;;  %6128 = vst [vmem:[#allocation10_spill] sm:$0xff] %v5093_v33  ;;  %v2328_v54 = vadd.f32 %v4810_v63, %v2246_v23  ;;  %v5117_v13 = vmul.f32 %v6063_v22, %v2279_v1 }
 0x189   : > { %v2248_v37 = vadd.f32 %v6126_v39, %v2166_v50  ;;  %v2361_v10 = vld [vmem:[#allocation3 + $0x4d8] sm:$0x7f]  ;;  %v1537_v6 = vrot.slane %v1372_v44, 4  ;;  %1603 = vst [vmem:[#allocation3 + $0x510] sm:$0x7f] %v1532_v25  ;;  %v1535_v27 = vsel %vm1439_vm2, %v1533_v12, %v1534_v41  ;;  %v6129_v19 = vld [vmem:[#allocation7_spill] sm:$0xff]  ;;  %v2329_v31 = vadd.f32 %v4823_v38, %v2247_v62 }
 0x18a   : > { %v3828_v16 = vld [vmem:[%s4128_s14 + $0x1a] ss:$8 sm:$0x7]  ;;  %v5100_v32 = vld [vmem:[%s4128_s14 + $0x1b] ss:$8 sm:$0x7]  ;;  %v5126_v12 = vmul.f32 %v4440_v52, %v2359_v47  ;;  %v5129_v63 = vmul.f32 %v4445_v11, %v2360_v5  ;;  %v5135_v22 = vadd.f32 %v4924_v53, %v2326_v61  ;;  %v5139_v1 = vmul.f32 %v4448_v35, %v2361_v10 }
 0x18b   : > { %v5097_v50 = vrot.slane %v3828_v16, %v6129_v19  ;;  %v5103_v42 = vld [vmem:[%s4128_s14 + $0x1c] ss:$8 sm:$0x7]  ;;  %1604 = vst [vmem:[#allocation3 + $0x518] sm:$0x7f] %v1535_v27  ;;  %v1538_v4 = vsel %vm1439_vm2, %v1536_v24, %v1537_v6  ;;  %v5109_v51 = vrot.slane %v5100_v32, %v6129_v19  ;;  %6132 = vst [vmem:[#allocation12_spill] sm:$0xff] %v5117_v13 }
 0x18c   : > { %v2505_v2 = vld [vmem:[#allocation3 + $0x138] sm:$0x7f]  ;;  %1605 = vst [vmem:[#allocation3 + $0x520] sm:$0x7f] %v1538_v4  ;;  %v5122_v59 = vrot.slane %v5103_v42, %v6129_v19  ;;  %v2330_v21 = vadd.f32 %v4826_v57, %v2248_v37  ;;  %6133 = vst [vmem:[#allocation17_spill] sm:$0xff] %v5126_v12  ;;  %v6138_v47 = vld [vmem:[#allocation8_spill] sm:$0xff]  ;;  %v5157_v35 = vadd.f32 %v4948_v40, %v2327_v3 }
 0x18d   : > { %6130 = vst [vmem:[#allocation56_spill] sm:$0xff] %v5097_v50  ;;  %6131 = vst [vmem:[#allocation11_spill] sm:$0xff] %v5109_v51  ;;  %v5112_v49 = vld [vmem:[%s4128_s14 + $0x1d] ss:$8 sm:$0x7]  ;;  %v2460_v48 = vmul.f32 %v5097_v50, %v2423_v26  ;;  %v2331_v26 = vadd.f32 %v4836_v29, %v2249_v17  ;;  %v2542_v52 = vmul.f32 %v5109_v51, %v2505_v2 }
 0x18e   : > { %6134 = vst [vmem:[#allocation35_spill] sm:$0xff] %v5129_v63  ;;  %v2587_v38 = vld [vmem:[#allocation3 + $0x240] sm:$0x7f]  ;;  %6135 = vst [vmem:[#allocation36_spill] sm:$0xff] %v5135_v22  ;;  %v6137_v0 = vld [vmem:[#allocation57_spill] sm:$0xff]  ;;  %v5145_v11 = vrot.slane %v5112_v49, %v6129_v19  ;;  %v5154_v29 = vrot.slane %v3828_v16, %v6138_v47  ;;  %v5160_v5 = vadd.f32 %v4955_v18, %v2328_v54 }
 0x18f   : > { %v5132_v23 = vld [vmem:[%s4128_s14 + $0x1e] ss:$8 sm:$0x7]  ;;  %6136 = vst [vmem:[#allocation24_spill] sm:$0xff] %v5139_v1  ;;  %v2481_v57 = vadd.f32 %v2460_v48, %v6137_v0  ;;  %v2669_v62 = vld [vmem:[#allocation3 + $0x348] sm:$0x7f]  ;;  %v5163_v15 = vadd.f32 %v4967_v30, %v2329_v31  ;;  %v2624_v24 = vmul.f32 %v5122_v59, %v2587_v38  ;;  %v5174_v40 = vadd.f32 %v4970_v14, %v2330_v21 }
 0x190   : > { %v5148_v9 = vld [vmem:[%s4128_s14 + $0x1f] ss:$8 sm:$0x7]  ;;  %v5151_v53 = vld [vmem:[%s4128_s14 + $0x30] ss:$8 sm:$0x7]  ;;  %v5168_v39 = vrot.slane %v5132_v23, %v6129_v19  ;;  %v5184_v25 = vadd.f32 %v4978_v28, %v2331_v26  ;;  %v2706_v27 = vmul.f32 %v5145_v11, %v2669_v62  ;;  %v5212_v48 = vrot.slane %v5100_v32, %v6138_v47 }
 0x191   : > { %6139 = vst [vmem:[#allocation52_spill] sm:$0xff] %v5154_v29  ;;  %6140 = vst [vmem:[#allocation18_spill] sm:$0xff] %v5157_v35  ;;  %v2424_v41 = vld [vmem:[#allocation3 + $0x38] sm:$0x7f]  ;;  %v2563_v44 = vadd.f32 %v2542_v52, %v2481_v57  ;;  %v2751_v10 = vld [vmem:[#allocation3 + $0x450] sm:$0x7f]  ;;  %v5178_v18 = vrot.slane %v5148_v9, %v6129_v19  ;;  %v5197_v4 = vrot.slane %v5151_v53, %v6129_v19 }
 0x192   : > { %6141 = vst [vmem:[#allocation13_spill] sm:$0xff] %v5160_v5  ;;  %6142 = vst [vmem:[#allocation14_spill] sm:$0xff] %v5163_v15  ;;  %v5171_v37 = vld [vmem:[%s4128_s14 + $0x31] ss:$8 sm:$0x7]  ;;  %v6149_v7 = vld [vmem:[#allocation50_spill] sm:$0xff]  ;;  %v5216_v21 = vrot.slane %v5103_v42, %v6138_v47  ;;  %v2788_v38 = vmul.f32 %v5168_v39, %v2751_v10  ;;  %v5228_v52 = vrot.slane %v5112_v49, %v6138_v47 }
 0x193   : > { %6143 = vst [vmem:[#allocation27_spill] sm:$0xff] %v5168_v39  ;;  %6144 = vst [vmem:[#allocation25_spill] sm:$0xff] %v5174_v40  ;;  %v5181_v30 = vld [vmem:[%s4128_s14 + $0x32] ss:$8 sm:$0x7]  ;;  %v5192_v17 = vadd.f32 %v6149_v7, %v4982_v58  ;;  %v2645_v14 = vadd.f32 %v2624_v24, %v2563_v44  ;;  %v2461_v58 = vmul.f32 %v5154_v29, %v2424_v41 }
 0x194   : > { %6145 = vst [vmem:[#allocation15_spill] sm:$0xff] %v5178_v18  ;;  %6146 = vst [vmem:[#allocation21_spill] sm:$0xff] %v5184_v25  ;;  %v6147_v6 = vld [vmem:[#allocation48_spill] sm:$0xff]  ;;  %v2833_v3 = vld [vmem:[#allocation3 + $0x48] sm:$0x7f]  ;;  %v5221_v0 = vrot.slane %v5181_v30, %v6129_v19  ;;  %v5238_v10 = vrot.slane %v5148_v9, %v6138_v47  ;;  %v5263_v63 = vrot.slane %v5181_v30, %v6138_v47 }
 0x195   : > { %v5188_v61 = vadd.f32 %v6147_v6, %v4975_v55  ;;  %6150 = vst [vmem:[#allocation22_spill] sm:$0xff] %v5192_v17  ;;  %v6151_v2 = vld [vmem:[#allocation9_spill] sm:$0xff]  ;;  %v2915_v54 = vld [vmem:[#allocation3 + $0x150] sm:$0x7f]  ;;  %v5204_v55 = vrot.slane %v5171_v37, %v6129_v19  ;;  %6154 = vst [vmem:[#allocation19_spill] sm:$0xff] %v5212_v48  ;;  %v2870_v62 = vmul.f32 %v5178_v18, %v2833_v3 }
 0x196   : > { %v5200_v28 = vrot.slane %v3828_v16, %v6151_v2  ;;  %v5207_v31 = vld [vmem:[%s4128_s14 + $0x33] ss:$8 sm:$0x7]  ;;  %6155 = vst [vmem:[#allocation31_spill] sm:$0xff] %v5216_v21  ;;  %v2727_v16 = vadd.f32 %v2706_v27, %v2645_v14  ;;  %6156 = vst [vmem:[#allocation40_spill] sm:$0xff] %v5221_v0  ;;  %v5234_v6 = vrot.slane %v5132_v23, %v6138_v47 }
 0x197   : > { %6148 = vst [vmem:[#allocation38_spill] sm:$0xff] %v5188_v61  ;;  %6153 = vst [vmem:[#allocation58_spill] sm:$0xff] %v5204_v55  ;;  %v2997_v26 = vld [vmem:[#allocation3 + $0x258] sm:$0x7f]  ;;  %v3079_v41 = vld [vmem:[#allocation3 + $0x360] sm:$0x7f]  ;;  %v2952_v27 = vmul.f32 %v5197_v4, %v2915_v54  ;;  %v5243_v1 = vrot.slane %v5207_v31, %v6129_v19  ;;  %v5259_v54 = vrot.slane %v5171_v37, %v6138_v47 }
 0x198   : > { %6152 = vst [vmem:[#allocation23_spill] sm:$0xff] %v5200_v28  ;;  %v5224_v57 = vld [vmem:[%s4128_s14 + $0x34] ss:$8 sm:$0x7]  ;;  %6157 = vst [vmem:[#allocation42_spill] sm:$0xff] %v5228_v52  ;;  %v2809_v14 = vadd.f32 %v2788_v38, %v2727_v16  ;;  %v3116_v45 = vmul.f32 %v5221_v0, %v3079_v41  ;;  %v5272_v43 = vrot.slane %v5207_v31, %v6138_v47 }
 0x199   : > { %v6158_v44 = vld [vmem:[#allocation63_spill] sm:$0xff]  ;;  %6159 = vst [vmem:[#allocation44_spill] sm:$0xff] %v5234_v6  ;;  %6160 = vst [vmem:[#allocation46_spill] sm:$0xff] %v5238_v10  ;;  %v2425_v7 = vld [vmem:[#allocation3 + $0x40] sm:$0x7f]  ;;  %v5255_v8 = vrot.slane %v5224_v57, %v6129_v19  ;;  %v5280_v25 = vrot.slane %v5224_v57, %v6138_v47  ;;  %v5285_v41 = vrot.slane %v5100_v32, %v6151_v2 }
 0x19a   : > { %v2482_v24 = vadd.f32 %v2461_v58, %v6158_v44  ;;  %6161 = vst [vmem:[#allocation33_spill] sm:$0xff] %v5243_v1  ;;  %v5246_v3 = vld [vmem:[%s4128_s14 + $0x35] ss:$8 sm:$0x7]  ;;  %v5250_v58 = vrot.slane %v5151_v53, %v6138_v47  ;;  %v3034_v44 = vmul.f32 %v5204_v55, %v2997_v26  ;;  %v2506_v16 = vld [vmem:[#allocation3 + $0x140] sm:$0x7f]  ;;  %v2891_v33 = vadd.f32 %v2870_v62, %v2809_v14 }
 0x19b   : > { %v3161_v13 = vld [vmem:[#allocation3 + $0x468] sm:$0x7f]  ;;  %6163 = vst [vmem:[#allocation60_spill] sm:$0xff] %v5255_v8  ;;  %6164 = vst [vmem:[#allocation61_spill] sm:$0xff] %v5259_v54  ;;  %v3243_v26 = vld [vmem:[#allocation3 + $0x60] sm:$0x7f]  ;;  %v2543_v20 = vmul.f32 %v5212_v48, %v2506_v16  ;;  %v5276_v36 = vrot.slane %v5246_v3, %v6129_v19  ;;  %v2462_v62 = vmul.f32 %v5200_v28, %v2425_v7 }
 0x19c   : > { %6162 = vst [vmem:[#allocation59_spill] sm:$0xff] %v5250_v58  ;;  %v2588_v38 = vld [vmem:[#allocation3 + $0x248] sm:$0x7f]  ;;  %6165 = vst [vmem:[#allocation7_spill] sm:$0xff] %v5263_v63  ;;  %v2670_v17 = vld [vmem:[#allocation3 + $0x350] sm:$0x7f]  ;;  %v2973_v14 = vadd.f32 %v2952_v27, %v2891_v33  ;;  %v3198_v16 = vmul.f32 %v5243_v1, %v3161_v13  ;;  %v3280_v22 = vmul.f32 %v5255_v8, %v3243_v26 }
 0x19d   : > { %v5267_v12 = vld [vmem:[%s4128_s14 + $0x36] ss:$8 sm:$0x7]  ;;  %6166 = vst [vmem:[#allocation57_spill] sm:$0xff] %v5272_v43  ;;  %6167 = vst [vmem:[#allocation8_spill] sm:$0xff] %v5276_v36  ;;  %v2564_v5 = vadd.f32 %v2543_v20, %v2482_v24  ;;  %v2625_v35 = vmul.f32 %v5216_v21, %v2588_v38  ;;  %v5299_v32 = vrot.slane %v5246_v3, %v6138_v47 }
 0x19e   : > { %6168 = vst [vmem:[#allocation48_spill] sm:$0xff] %v5280_v25  ;;  %6169 = vst [vmem:[#allocation50_spill] sm:$0xff] %v5285_v41  ;;  %v3325_v40 = vld [vmem:[#allocation3 + $0x168] sm:$0x7f]  ;;  %v5295_v34 = vrot.slane %v5267_v12, %v6129_v19  ;;  %v2752_v7 = vld [vmem:[#allocation3 + $0x458] sm:$0x7f]  ;;  %v2483_v33 = vadd.f32 %v2462_v62, %v4813_v46  ;;  %v3055_v27 = vadd.f32 %v3034_v44, %v2973_v14 }
 0x19f   : > { %v5289_v15 = vld [vmem:[%s4128_s14 + $0x37] ss:$8 sm:$0x7]  ;;  %v2507_v13 = vld [vmem:[#allocation3 + $0x148] sm:$0x7f]  ;;  %v2646_v60 = vadd.f32 %v2625_v35, %v2564_v5  ;;  %v2707_v20 = vmul.f32 %v5228_v52, %v2670_v17  ;;  %v5305_v24 = vrot.slane %v5267_v12, %v6138_v47  ;;  %v3362_v26 = vmul.f32 %v5276_v36, %v3325_v40 }
 0x1a0   : > { %6170 = vst [vmem:[#allocation9_spill] sm:$0xff] %v5295_v34  ;;  %v2589_v38 = vld [vmem:[#allocation3 + $0x250] sm:$0x7f]  ;;  %v2544_v1 = vmul.f32 %v5285_v41, %v2507_v13  ;;  %v5314_v46 = vrot.slane %v5103_v42, %v6151_v2  ;;  %v5318_v35 = vrot.slane %v5112_v49, %v6151_v2  ;;  %v3137_v5 = vadd.f32 %v3116_v45, %v3055_v27  ;;  %v2671_v14 = vld [vmem:[#allocation3 + $0x358] sm:$0x7f] }
 0x1a1   : > { %v5309_v56 = vld [vmem:[%s4128_s14 + $0x48] ss:$8 sm:$0x7]  ;;  %v5322_v44 = vrot.slane %v5289_v15, %v6129_v19  ;;  %v2728_v40 = vadd.f32 %v2707_v20, %v2646_v60  ;;  %v2789_v62 = vmul.f32 %v5234_v6, %v2752_v7  ;;  %v2916_v36 = vld [vmem:[#allocation3 + $0x158] sm:$0x7f]  ;;  %v5327_v13 = vrot.slane %v5289_v15, %v6138_v47 }
 0x1a2   : > { %v2834_v8 = vld [vmem:[#allocation3 + $0x50] sm:$0x7f]  ;;  %6171 = vst [vmem:[#allocation63_spill] sm:$0xff] %v5314_v46  ;;  %6172 = vst [vmem:[#allocation65_spill] sm:$0xff] %v5318_v35  ;;  %v2565_v42 = vadd.f32 %v2544_v1, %v2483_v33  ;;  %v2626_v41 = vmul.f32 %v5314_v46, %v2589_v38  ;;  %v5332_v45 = vrot.slane %v5132_v23, %v6151_v2  ;;  %v3489_v27 = vld [vmem:[#allocation3 + $0x378] sm:$0x7f] }
 0x1a3   : > { %v3407_v17 = vld [vmem:[#allocation3 + $0x270] sm:$0x7f]  ;;  %6173 = vst [vmem:[#allocation66_spill] sm:$0xff] %v5322_v44  ;;  %v3219_v49 = vadd.f32 %v3198_v16, %v3137_v5  ;;  %v5336_v60 = vrot.slane %v5309_v56, %v6129_v19  ;;  %v2810_v7 = vadd.f32 %v2789_v62, %v2728_v40  ;;  %v2871_v20 = vmul.f32 %v5238_v10, %v2834_v8  ;;  %v2753_v6 = vld [vmem:[#allocation3 + $0x460] sm:$0x7f] }
 0x1a4   : > { %6174 = vst [vmem:[#allocation67_spill] sm:$0xff] %v5332_v45  ;;  %v3444_v0 = vmul.f32 %v5295_v34, %v3407_v17  ;;  %v3571_v61 = vld [vmem:[#allocation3 + $0x480] sm:$0x7f]  ;;  %v2647_v33 = vadd.f32 %v2626_v41, %v2565_v42  ;;  %v2708_v38 = vmul.f32 %v5318_v35, %v2671_v14  ;;  %v5343_v23 = vrot.slane %v5148_v9, %v6151_v2  ;;  %v3080_v46 = vld [vmem:[#allocation3 + $0x368] sm:$0x7f] }
 0x1a5   : > { %6175 = vst [vmem:[#allocation68_spill] sm:$0xff] %v5336_v60  ;;  %v2998_v1 = vld [vmem:[#allocation3 + $0x260] sm:$0x7f]  ;;  %v3301_v16 = vadd.f32 %v3280_v22, %v3219_v49  ;;  %v2892_v5 = vadd.f32 %v2871_v20, %v2810_v7  ;;  %v2953_v19 = vmul.f32 %v5250_v58, %v2916_v36  ;;  %v5348_v8 = vrot.slane %v5309_v56, %v6138_v47  ;;  %v2835_v40 = vld [vmem:[#allocation3 + $0x58] sm:$0x7f] }
 0x1a6   : > { %6176 = vst [vmem:[#allocation69_spill] sm:$0xff] %v5343_v23  ;;  %v2426_v17 = vld [vmem:[#allocation3 + $0x48] sm:$0x7f]  ;;  %v3526_v62 = vmul.f32 %v5322_v44, %v3489_v27  ;;  %v3162_v41 = vld [vmem:[#allocation3 + $0x470] sm:$0x7f]  ;;  %v2729_v42 = vadd.f32 %v2708_v38, %v2647_v33  ;;  %v2790_v14 = vmul.f32 %v5332_v45, %v2753_v6  ;;  %v5354_v9 = vrot.slane %v5151_v53, %v6151_v2 }
 0x1a7   : > { %v3383_v22 = vadd.f32 %v3362_v26, %v3301_v16  ;;  %v3608_v36 = vmul.f32 %v5336_v60, %v3571_v61  ;;  %v2974_v49 = vadd.f32 %v2953_v19, %v2892_v5  ;;  %v3035_v7 = vmul.f32 %v5259_v54, %v2998_v1  ;;  %v3244_v47 = vld [vmem:[#allocation3 + $0x68] sm:$0x7f]  ;;  %v2917_v20 = vld [vmem:[#allocation3 + $0x160] sm:$0x7f]  ;;  %v2508_v33 = vld [vmem:[#allocation3 + $0x150] sm:$0x7f] }
 0x1a8   : > { %6177 = vst [vmem:[#allocation70_spill] sm:$0xff] %v5354_v9  ;;  %v3117_v35 = vmul.f32 %v5263_v63, %v3080_v46  ;;  %v2811_v34 = vadd.f32 %v2790_v14, %v2729_v42  ;;  %v2872_v27 = vmul.f32 %v5343_v23, %v2835_v40  ;;  %v5362_v6 = vrot.slane %v5171_v37, %v6151_v2  ;;  %v3326_v61 = vld [vmem:[#allocation3 + $0x170] sm:$0x7f]  ;;  %v2999_v16 = vld [vmem:[#allocation3 + $0x268] sm:$0x7f] }
 0x1a9   : > { %v3465_v53 = vadd.f32 %v3444_v0, %v3383_v22  ;;  %v3056_v38 = vadd.f32 %v3035_v7, %v2974_v49  ;;  %v3199_v26 = vmul.f32 %v5272_v43, %v3162_v41  ;;  %v2463_v1 = vmul.f32 %v5097_v50, %v2426_v17  ;;  %v2590_v37 = vld [vmem:[#allocation3 + $0x258] sm:$0x7f]  ;;  %v3081_v22 = vld [vmem:[#allocation3 + $0x370] sm:$0x7f]  ;;  %v3490_v23 = vld [vmem:[#allocation3 + $0x380] sm:$0x7f] }
 0x1aa   : > { %6178 = vst [vmem:[#allocation71_spill] sm:$0xff] %v5362_v6  ;;  %v3281_v5 = vmul.f32 %v5280_v25, %v3244_v47  ;;  %v2893_v19 = vadd.f32 %v2872_v27, %v2811_v34  ;;  %v2954_v46 = vmul.f32 %v5354_v9, %v2917_v20  ;;  %v5370_v40 = vrot.slane %v5181_v30, %v6151_v2  ;;  %v3408_v0 = vld [vmem:[#allocation3 + $0x278] sm:$0x7f]  ;;  %v6180_v49 = vld [vmem:[#allocation32_spill] sm:$0xff]  ;;  %v2672_v20 = vld [vmem:[#allocation3 + $0x360] sm:$0x7f] }
 0x1ab   : > { %v3547_v42 = vadd.f32 %v3526_v62, %v3465_v53  ;;  %v3138_v14 = vadd.f32 %v3117_v35, %v3056_v38  ;;  %v2484_v41 = vadd.f32 %v2463_v1, %v6180_v49  ;;  %v2545_v7 = vmul.f32 %v5109_v51, %v2508_v33  ;;  %v3572_v27 = vld [vmem:[#allocation3 + $0x488] sm:$0x7f]  ;;  %v3163_v53 = vld [vmem:[#allocation3 + $0x478] sm:$0x7f]  ;;  %v2427_v33 = vld [vmem:[#allocation3 + $0x50] sm:$0x7f] }
 0x1ac   : > { %6179 = vst [vmem:[#allocation72_spill] sm:$0xff] %v5370_v40  ;;  %v3363_v17 = vmul.f32 %v5299_v32, %v3326_v61  ;;  %v2975_v47 = vadd.f32 %v2954_v46, %v2893_v19  ;;  %v3036_v34 = vmul.f32 %v5362_v6, %v2999_v16  ;;  %v5378_v30 = vrot.slane %v5207_v31, %v6151_v2  ;;  %v2754_v31 = vld [vmem:[#allocation3 + $0x468] sm:$0x7f]  ;;  %v3245_v46 = vld [vmem:[#allocation3 + $0x70] sm:$0x7f] }
 0x1ad   : > { %v3629_v62 = vadd.f32 %v3608_v36, %v3547_v42  ;;  %v3220_v35 = vadd.f32 %v3199_v26, %v3138_v14  ;;  %v2566_v38 = vadd.f32 %v2545_v7, %v2484_v41  ;;  %v2627_v1 = vmul.f32 %v5122_v59, %v2590_v37  ;;  %v2836_v14 = vld [vmem:[#allocation3 + $0x60] sm:$0x7f]  ;;  %v2509_v7 = vld [vmem:[#allocation3 + $0x158] sm:$0x7f] }
 0x1ae   : > { %6181 = vst [vmem:[#allocation32_spill] sm:$0xff] %v5378_v30  ;;  %v3445_v61 = vmul.f32 %v5305_v24, %v3408_v0  ;;  %v3057_v49 = vadd.f32 %v3036_v34, %v2975_v47  ;;  %v3118_v19 = vmul.f32 %v5370_v40, %v3081_v22  ;;  %v5385_v16 = vrot.slane %v5224_v57, %v6151_v2  ;;  %v3327_v34 = vld [vmem:[#allocation3 + $0x178] sm:$0x7f] }
 0x1af   : > { %3650 = vst [vmem:[%s5388_s9] sm:$0x7f] %v3629_v62  ;;  %v3302_v36 = vadd.f32 %v3281_v5, %v3220_v35  ;;  %v3527_v26 = vmul.f32 %v5327_v13, %v3490_v23  ;;  %v2648_v37 = vadd.f32 %v2627_v1, %v2566_v38  ;;  %v2709_v42 = vmul.f32 %v5145_v11, %v2672_v20  ;;  %v2918_v62 = vld [vmem:[#allocation3 + $0x168] sm:$0x7f] }
 0x1b0   : > { %6182 = vst [vmem:[#allocation73_spill] sm:$0xff] %v5385_v16  ;;  %v3609_v0 = vmul.f32 %v5348_v8, %v3572_v27  ;;  %v3139_v22 = vadd.f32 %v3118_v19, %v3057_v49  ;;  %v3200_v41 = vmul.f32 %v5378_v30, %v3163_v53  ;;  %v5397_v57 = vrot.slane %v5246_v3, %v6151_v2  ;;  %v2591_v3 = vld [vmem:[#allocation3 + $0x260] sm:$0x7f]  ;;  %v3000_v19 = vld [vmem:[#allocation3 + $0x270] sm:$0x7f] }
 0x1b1   : > { %v3384_v47 = vadd.f32 %v3363_v17, %v3302_v36  ;;  %v2730_v5 = vadd.f32 %v2709_v42, %v2648_v37  ;;  %v2791_v23 = vmul.f32 %v5168_v39, %v2754_v31  ;;  %v2464_v35 = vmul.f32 %v5154_v29, %v2427_v33  ;;  %v3409_v49 = vld [vmem:[#allocation3 + $0x280] sm:$0x7f] }
 0x1b2   : > { %6183 = vst [vmem:[#allocation74_spill] sm:$0xff] %v5397_v57  ;;  %v3221_v20 = vadd.f32 %v3200_v41, %v3139_v22  ;;  %v3282_v38 = vmul.f32 %v5385_v16, %v3245_v46  ;;  %v5404_v27 = vrot.slane %v5267_v12, %v6151_v2  ;;  %v2873_v53 = vmul.f32 %v5178_v18, %v2836_v14  ;;  %v6185_v36 = vld [vmem:[#allocation34_spill] sm:$0xff]  ;;  %v2673_v22 = vld [vmem:[#allocation3 + $0x368] sm:$0x7f]  ;;  %v2428_v14 = vld [vmem:[#allocation3 + $0x58] sm:$0x7f] }
 0x1b3   : > { %v3466_v1 = vadd.f32 %v3445_v61, %v3384_v47  ;;  %v2812_v17 = vadd.f32 %v2791_v23, %v2730_v5  ;;  %v2485_v37 = vadd.f32 %v2464_v35, %v6185_v36  ;;  %v2546_v31 = vmul.f32 %v5212_v48, %v2509_v7  ;;  %v3491_v61 = vld [vmem:[#allocation3 + $0x388] sm:$0x7f]  ;;  %v3573_v36 = vld [vmem:[#allocation3 + $0x490] sm:$0x7f] }
 0x1b4   : > { %6184 = vst [vmem:[#allocation75_spill] sm:$0xff] %v5404_v27  ;;  %v3303_v42 = vadd.f32 %v3282_v38, %v3221_v20  ;;  %v3364_v33 = vmul.f32 %v5397_v57, %v3327_v34  ;;  %v5412_v46 = vrot.slane %v5289_v15, %v6151_v2  ;;  %v2955_v12 = vmul.f32 %v5197_v4, %v2918_v62  ;;  %v3082_v20 = vld [vmem:[#allocation3 + $0x378] sm:$0x7f]  ;;  %v2755_v62 = vld [vmem:[#allocation3 + $0x470] sm:$0x7f] }
 0x1b5   : > { %v3548_v41 = vadd.f32 %v3527_v26, %v3466_v1  ;;  %v2894_v47 = vadd.f32 %v2873_v53, %v2812_v17  ;;  %v2567_v5 = vadd.f32 %v2546_v31, %v2485_v37  ;;  %v2628_v23 = vmul.f32 %v5216_v21, %v2591_v3  ;;  %v2510_v17 = vld [vmem:[#allocation3 + $0x160] sm:$0x7f]  ;;  %v2837_v31 = vld [vmem:[#allocation3 + $0x68] sm:$0x7f] }
 0x1b6   : > { %6186 = vst [vmem:[#allocation34_spill] sm:$0xff] %v5412_v46  ;;  %v3385_v35 = vadd.f32 %v3364_v33, %v3303_v42  ;;  %v3446_v7 = vmul.f32 %v5404_v27, %v3409_v49  ;;  %v5419_v34 = vrot.slane %v5309_v56, %v6151_v2  ;;  %v3037_v15 = vmul.f32 %v5204_v55, %v3000_v19  ;;  %v3164_v49 = vld [vmem:[#allocation3 + $0x480] sm:$0x7f] }
 0x1b7   : > { %v3630_v38 = vadd.f32 %v3609_v0, %v3548_v41  ;;  %v2976_v26 = vadd.f32 %v2955_v12, %v2894_v47  ;;  %v2649_v1 = vadd.f32 %v2628_v23, %v2567_v5  ;;  %v2710_v53 = vmul.f32 %v5228_v52, %v2673_v22  ;;  %v6188_v2 = vld [vmem:[#allocation38_spill] sm:$0xff]  ;;  %v6191_v0 = vld [vmem:[#allocation40_spill] sm:$0xff]  ;;  %v3246_v12 = vld [vmem:[#allocation3 + $0x78] sm:$0x7f] }
 0x1b8   : > { %6187 = vst [vmem:[#allocation76_spill] sm:$0xff] %v5419_v34  ;;  %v3467_v3 = vadd.f32 %v3446_v7, %v3385_v35  ;;  %v3528_v37 = vmul.f32 %v5412_v46, %v3491_v61  ;;  %v2465_v56 = vmul.f32 %v5200_v28, %v2428_v14  ;;  %v6189_v42 = vld [vmem:[#allocation62_spill] sm:$0xff]  ;;  %v3119_v41 = vmul.f32 %v6191_v0, %v3082_v20  ;;  %v6192_v5 = vld [vmem:[#allocation44_spill] sm:$0xff]  ;;  %v2592_v23 = vld [vmem:[#allocation3 + $0x268] sm:$0x7f] }
 0x1b9   : > { %v5427_v33 = vadd.f32 %v6189_v42, %v6188_v2  ;;  %3651 = vst [vmem:[%s5388_s9 + $0x8] sm:$0x7f] %v3630_v38  ;;  %v3058_v19 = vadd.f32 %v3037_v15, %v2976_v26  ;;  %v2731_v47 = vadd.f32 %v2710_v53, %v2649_v1  ;;  %v2792_v22 = vmul.f32 %v6192_v5, %v2755_v62  ;;  %v3328_v7 = vld [vmem:[#allocation3 + $0x180] sm:$0x7f]  ;;  %v2919_v46 = vld [vmem:[#allocation3 + $0x170] sm:$0x7f] }
 0x1ba   : > { %v3549_v35 = vadd.f32 %v3528_v37, %v3467_v3  ;;  %v3610_v61 = vmul.f32 %v5419_v34, %v3573_v36  ;;  %v6193_v55 = vld [vmem:[#allocation30_spill] sm:$0xff]  ;;  %v6195_v42 = vld [vmem:[#allocation33_spill] sm:$0xff]  ;;  %v3410_v15 = vld [vmem:[#allocation3 + $0x288] sm:$0x7f]  ;;  %v2874_v1 = vmul.f32 %v5238_v10, %v2837_v31 }
 0x1bb   : > { %6190 = vst [vmem:[#allocation38_spill] sm:$0xff] %v5427_v33  ;;  %v2486_v14 = vadd.f32 %v2465_v56, %v6193_v55  ;;  %v6194_v28 = vld [vmem:[#allocation50_spill] sm:$0xff]  ;;  %v3140_v2 = vadd.f32 %v3119_v41, %v3058_v19  ;;  %v3201_v38 = vmul.f32 %v6195_v42, %v3164_v49  ;;  %v3492_v26 = vld [vmem:[#allocation3 + $0x390] sm:$0x7f]  ;;  %v2813_v20 = vadd.f32 %v2792_v22, %v2731_v47  ;;  %v3001_v33 = vld [vmem:[#allocation3 + $0x278] sm:$0x7f] }
 0x1bc   : > { %v2547_v27 = vmul.f32 %v6194_v28, %v2510_v17  ;;  %v2674_v62 = vld [vmem:[#allocation3 + $0x370] sm:$0x7f]  ;;  %v2429_v53 = vld [vmem:[#allocation3 + $0x60] sm:$0x7f]  ;;  %v3631_v3 = vadd.f32 %v3610_v61, %v3549_v35  ;;  %v6197_v0 = vld [vmem:[#allocation63_spill] sm:$0xff]  ;;  %v2956_v42 = vmul.f32 %v5250_v58, %v2919_v46  ;;  %v3529_v35 = vmul.f32 %v5322_v44, %v3492_v26 }
 0x1bd   : > { %v6196_v37 = vld [vmem:[#allocation60_spill] sm:$0xff]  ;;  %v2629_v55 = vmul.f32 %v6197_v0, %v2592_v23  ;;  %v3222_v56 = vadd.f32 %v3201_v38, %v3140_v2  ;;  %v3574_v41 = vld [vmem:[#allocation3 + $0x498] sm:$0x7f]  ;;  %v2895_v49 = vadd.f32 %v2874_v1, %v2813_v20  ;;  %v3083_v47 = vld [vmem:[#allocation3 + $0x380] sm:$0x7f]  ;;  %v3038_v2 = vmul.f32 %v5259_v54, %v3001_v33 }
 0x1be   : > { %v3283_v36 = vmul.f32 %v6196_v37, %v3246_v12  ;;  %v2568_v34 = vadd.f32 %v2547_v27, %v2486_v14  ;;  %v6198_v17 = vld [vmem:[#allocation8_spill] sm:$0xff]  ;;  %v2756_v22 = vld [vmem:[#allocation3 + $0x478] sm:$0x7f]  ;;  %3652 = vst [vmem:[%s5388_s9 + $0x10] sm:$0x7f] %v3631_v3  ;;  %v2466_v46 = vmul.f32 %v5097_v50, %v2429_v53  ;;  %v3611_v1 = vmul.f32 %v5336_v60, %v3574_v41 }
 0x1bf   : > { %v3365_v19 = vmul.f32 %v6198_v17, %v3328_v7  ;;  %v6199_v31 = vld [vmem:[#allocation9_spill] sm:$0xff]  ;;  %v2511_v27 = vld [vmem:[#allocation3 + $0x168] sm:$0x7f]  ;;  %v2977_v23 = vadd.f32 %v2956_v42, %v2895_v49  ;;  %v3247_v38 = vld [vmem:[#allocation3 + $0x80] sm:$0x7f]  ;;  %v3120_v3 = vmul.f32 %v5263_v63, %v3083_v47  ;;  %v2793_v26 = vmul.f32 %v5332_v45, %v2756_v22 }
 0x1c0   : > { %v3447_v28 = vmul.f32 %v6199_v31, %v3410_v15  ;;  %v2650_v61 = vadd.f32 %v2629_v55, %v2568_v34  ;;  %v6200_v12 = vld [vmem:[#allocation65_spill] sm:$0xff]  ;;  %v3304_v14 = vadd.f32 %v3283_v36, %v3222_v56  ;;  %v3165_v7 = vld [vmem:[#allocation3 + $0x488] sm:$0x7f]  ;;  %v2838_v20 = vld [vmem:[#allocation3 + $0x70] sm:$0x7f]  ;;  %v2548_v49 = vmul.f32 %v5109_v51, %v2511_v27 }
 0x1c1   : > { %v2711_v37 = vmul.f32 %v6200_v12, %v2674_v62  ;;  %v2593_v34 = vld [vmem:[#allocation3 + $0x270] sm:$0x7f]  ;;  %v3059_v62 = vadd.f32 %v3038_v2, %v2977_v23  ;;  %v3329_v44 = vld [vmem:[#allocation3 + $0x188] sm:$0x7f]  ;;  %v2920_v42 = vld [vmem:[#allocation3 + $0x178] sm:$0x7f]  ;;  %v3202_v31 = vmul.f32 %v5272_v43, %v3165_v7  ;;  %v3284_v53 = vmul.f32 %v5280_v25, %v3247_v38 }
 0x1c2   : > { %v3386_v55 = vadd.f32 %v3365_v19, %v3304_v14  ;;  %v3411_v36 = vld [vmem:[#allocation3 + $0x290] sm:$0x7f]  ;;  %v6201_v56 = vld [vmem:[#allocation45_spill] sm:$0xff]  ;;  %v3002_v14 = vld [vmem:[#allocation3 + $0x280] sm:$0x7f]  ;;  %v2630_v2 = vmul.f32 %v5122_v59, %v2593_v34  ;;  %v2957_v7 = vmul.f32 %v5354_v9, %v2920_v42 }
 0x1c3   : > { %v2732_v15 = vadd.f32 %v2711_v37, %v2650_v61  ;;  %v2487_v33 = vadd.f32 %v2466_v46, %v6201_v56  ;;  %v6202_v60 = vld [vmem:[#allocation69_spill] sm:$0xff]  ;;  %v2430_v61 = vld [vmem:[#allocation3 + $0x68] sm:$0x7f]  ;;  %v3141_v50 = vadd.f32 %v3120_v3, %v3059_v62  ;;  %v3366_v46 = vmul.f32 %v5299_v32, %v3329_v44  ;;  %v2757_v38 = vld [vmem:[#allocation3 + $0x480] sm:$0x7f] }
 0x1c4   : > { %v2875_v47 = vmul.f32 %v6202_v60, %v2838_v20  ;;  %v2675_v37 = vld [vmem:[#allocation3 + $0x378] sm:$0x7f]  ;;  %v3468_v22 = vadd.f32 %v3447_v28, %v3386_v55  ;;  %v3448_v27 = vmul.f32 %v5305_v24, %v3411_v36  ;;  %v3084_v20 = vld [vmem:[#allocation3 + $0x388] sm:$0x7f]  ;;  %v2512_v3 = vld [vmem:[#allocation3 + $0x170] sm:$0x7f]  ;;  %v3039_v44 = vmul.f32 %v5362_v6, %v3002_v14 }
 0x1c5   : > { %v2814_v41 = vadd.f32 %v2793_v26, %v2732_v15  ;;  %v3493_v19 = vld [vmem:[#allocation3 + $0x398] sm:$0x7f]  ;;  %v2569_v23 = vadd.f32 %v2548_v49, %v2487_v33  ;;  %v3223_v26 = vadd.f32 %v3202_v31, %v3141_v50  ;;  %v2712_v28 = vmul.f32 %v5145_v11, %v2675_v37  ;;  %v3575_v62 = vld [vmem:[#allocation3 + $0x4a0] sm:$0x7f] }
 0x1c6   : > { %v3550_v15 = vadd.f32 %v3529_v35, %v3468_v22  ;;  %v3530_v55 = vmul.f32 %v5327_v13, %v3493_v19  ;;  %v2839_v34 = vld [vmem:[#allocation3 + $0x78] sm:$0x7f]  ;;  %v2467_v36 = vmul.f32 %v5154_v29, %v2430_v61  ;;  %v2794_v50 = vmul.f32 %v5168_v39, %v2757_v38  ;;  %v3248_v22 = vld [vmem:[#allocation3 + $0x88] sm:$0x7f]  ;;  %v2921_v19 = vld [vmem:[#allocation3 + $0x180] sm:$0x7f] }
 0x1c7   : > { %v2896_v56 = vadd.f32 %v2875_v47, %v2814_v41  ;;  %v2651_v25 = vadd.f32 %v2630_v2, %v2569_v23  ;;  %v3305_v42 = vadd.f32 %v3284_v53, %v3223_v26  ;;  %v3166_v41 = vld [vmem:[#allocation3 + $0x490] sm:$0x7f]  ;;  %v2594_v31 = vld [vmem:[#allocation3 + $0x278] sm:$0x7f]  ;;  %v3121_v37 = vmul.f32 %v5370_v40, %v3084_v20  ;;  %v6203_v23 = vld [vmem:[#allocation47_spill] sm:$0xff] }
 0x1c8   : > { %v3632_v49 = vadd.f32 %v3611_v1, %v3550_v15  ;;  %v2488_v2 = vadd.f32 %v2467_v36, %v6203_v23  ;;  %v3612_v61 = vmul.f32 %v5348_v8, %v3575_v62  ;;  %v3330_v1 = vld [vmem:[#allocation3 + $0x190] sm:$0x7f]  ;;  %v3203_v15 = vmul.f32 %v5378_v30, %v3166_v41  ;;  %v3412_v26 = vld [vmem:[#allocation3 + $0x298] sm:$0x7f]  ;;  %v3003_v20 = vld [vmem:[#allocation3 + $0x288] sm:$0x7f] }
 0x1c9   : > { %v2978_v33 = vadd.f32 %v2957_v7, %v2896_v56  ;;  %v2733_v35 = vadd.f32 %v2712_v28, %v2651_v25  ;;  %v2549_v56 = vmul.f32 %v5212_v48, %v2512_v3  ;;  %v3387_v14 = vadd.f32 %v3366_v46, %v3305_v42  ;;  %v2676_v7 = vld [vmem:[#allocation3 + $0x380] sm:$0x7f]  ;;  %v6204_v23 = vld [vmem:[#allocation75_spill] sm:$0xff] }
 0x1ca   : > { %3653 = vst [vmem:[%s5388_s9 + $0x18] sm:$0x7f] %v3632_v49  ;;  %v2876_v25 = vmul.f32 %v5178_v18, %v2839_v34  ;;  %v3285_v3 = vmul.f32 %v5385_v16, %v3248_v22  ;;  %v2958_v62 = vmul.f32 %v5197_v4, %v2921_v19  ;;  %v2758_v49 = vld [vmem:[#allocation3 + $0x488] sm:$0x7f]  ;;  %v3367_v34 = vmul.f32 %v5397_v57, %v3330_v1 }
 0x1cb   : > { %v3060_v47 = vadd.f32 %v3039_v44, %v2978_v33  ;;  %v2815_v53 = vadd.f32 %v2794_v50, %v2733_v35  ;;  %v2570_v28 = vadd.f32 %v2549_v56, %v2488_v2  ;;  %v2631_v33 = vmul.f32 %v5216_v21, %v2594_v31  ;;  %v2431_v44 = vld [vmem:[#allocation3 + $0x70] sm:$0x7f]  ;;  %v6205_v56 = vld [vmem:[#allocation58_spill] sm:$0xff]  ;;  %v2922_v1 = vld [vmem:[#allocation3 + $0x188] sm:$0x7f] }
 0x1cc   : > { %v3469_v36 = vadd.f32 %v3448_v27, %v3387_v14  ;;  %v3085_v35 = vld [vmem:[#allocation3 + $0x390] sm:$0x7f]  ;;  %v2713_v41 = vmul.f32 %v5228_v52, %v2676_v7  ;;  %v3449_v2 = vmul.f32 %v6204_v23, %v3412_v26  ;;  %v3040_v27 = vmul.f32 %v6205_v56, %v3003_v20  ;;  %v2513_v14 = vld [vmem:[#allocation3 + $0x178] sm:$0x7f]  ;;  %v3576_v20 = vld [vmem:[#allocation3 + $0x4a8] sm:$0x7f] }
 0x1cd   : > { %v3142_v38 = vadd.f32 %v3121_v37, %v3060_v47  ;;  %v2897_v46 = vadd.f32 %v2876_v25, %v2815_v53  ;;  %v2652_v50 = vadd.f32 %v2631_v33, %v2570_v28  ;;  %v2840_v47 = vld [vmem:[#allocation3 + $0x80] sm:$0x7f]  ;;  %v3167_v25 = vld [vmem:[#allocation3 + $0x498] sm:$0x7f]  ;;  %v6207_v52 = vld [vmem:[#allocation40_spill] sm:$0xff] }
 0x1ce   : > { %v3551_v37 = vadd.f32 %v3530_v55, %v3469_v36  ;;  %v3494_v53 = vld [vmem:[#allocation3 + $0x3a0] sm:$0x7f]  ;;  %v3122_v55 = vmul.f32 %v6207_v52, %v3085_v35  ;;  %v2877_v26 = vmul.f32 %v5238_v10, %v2840_v47  ;;  %v6208_v56 = vld [vmem:[#allocation49_spill] sm:$0xff]  ;;  %v2959_v35 = vmul.f32 %v5250_v58, %v2922_v1 }
 0x1cf   : > { %v3224_v42 = vadd.f32 %v3203_v15, %v3142_v38  ;;  %v2979_v31 = vadd.f32 %v2958_v62, %v2897_v46  ;;  %v2734_v19 = vadd.f32 %v2713_v41, %v2652_v50  ;;  %v2795_v38 = vmul.f32 %v6192_v5, %v2758_v49  ;;  %v6206_v15 = vld [vmem:[#allocation23_spill] sm:$0xff]  ;;  %v2595_v36 = vld [vmem:[#allocation3 + $0x280] sm:$0x7f]  ;;  %v3249_v62 = vld [vmem:[#allocation3 + $0x90] sm:$0x7f] }
 0x1d0   : > { %v2468_v28 = vmul.f32 %v6206_v15, %v2431_v44  ;;  %v3633_v33 = vadd.f32 %v3612_v61, %v3551_v37  ;;  %v6209_v41 = vld [vmem:[#allocation50_spill] sm:$0xff]  ;;  %v6211_v61 = vld [vmem:[#allocation33_spill] sm:$0xff] }
 0x1d1   : > { %v3306_v22 = vadd.f32 %v3285_v3, %v3224_v42  ;;  %v3061_v7 = vadd.f32 %v3040_v27, %v2979_v31  ;;  %v2816_v3 = vadd.f32 %v2795_v38, %v2734_v19  ;;  %v3004_v42 = vld [vmem:[#allocation3 + $0x290] sm:$0x7f]  ;;  %v2550_v23 = vmul.f32 %v6209_v41, %v2513_v14  ;;  %v6210_v49 = vld [vmem:[#allocation34_spill] sm:$0xff]  ;;  %v2677_v31 = vld [vmem:[#allocation3 + $0x388] sm:$0x7f] }
 0x1d2   : > { %v2489_v50 = vadd.f32 %v2468_v28, %v6208_v56  ;;  %3654 = vst [vmem:[%s5388_s9 + $0x20] sm:$0x7f] %v3633_v33  ;;  %v3531_v5 = vmul.f32 %v6210_v49, %v3494_v53  ;;  %v3204_v37 = vmul.f32 %v6211_v61, %v3167_v25  ;;  %v3331_v27 = vld [vmem:[#allocation3 + $0x198] sm:$0x7f]  ;;  %v2632_v19 = vmul.f32 %v6197_v0, %v2595_v36  ;;  %v2759_v38 = vld [vmem:[#allocation3 + $0x490] sm:$0x7f] }
 0x1d3   : > { %v3388_v46 = vadd.f32 %v3367_v34, %v3306_v22  ;;  %v3143_v44 = vadd.f32 %v3122_v55, %v3061_v7  ;;  %v2898_v34 = vadd.f32 %v2877_v26, %v2816_v3  ;;  %v3086_v22 = vld [vmem:[#allocation3 + $0x398] sm:$0x7f]  ;;  %v6212_v28 = vld [vmem:[#allocation76_spill] sm:$0xff]  ;;  %v3041_v7 = vmul.f32 %v5259_v54, %v3004_v42  ;;  %v3413_v55 = vld [vmem:[#allocation3 + $0x2a0] sm:$0x7f] }
 0x1d4   : > { %v2571_v10 = vadd.f32 %v2550_v23, %v2489_v50  ;;  %v2432_v56 = vld [vmem:[#allocation3 + $0x78] sm:$0x7f]  ;;  %v3613_v14 = vmul.f32 %v6212_v28, %v3576_v20  ;;  %v6213_v41 = vld [vmem:[#allocation60_spill] sm:$0xff]  ;;  %v3168_v58 = vld [vmem:[#allocation3 + $0x4a0] sm:$0x7f]  ;;  %v2714_v26 = vmul.f32 %v6200_v12, %v2677_v31  ;;  %v3368_v36 = vmul.f32 %v6198_v17, %v3331_v27 }
 0x1d5   : > { %v3470_v47 = vadd.f32 %v3449_v2, %v3388_v46  ;;  %v3225_v33 = vadd.f32 %v3204_v37, %v3143_v44  ;;  %v3286_v53 = vmul.f32 %v6213_v41, %v3249_v62  ;;  %v2980_v1 = vadd.f32 %v2959_v35, %v2898_v34  ;;  %v2841_v46 = vld [vmem:[#allocation3 + $0x88] sm:$0x7f]  ;;  %v2514_v50 = vld [vmem:[#allocation3 + $0x180] sm:$0x7f]  ;;  %v2923_v35 = vld [vmem:[#allocation3 + $0x190] sm:$0x7f] }
 0x1d6   : > { %v2653_v2 = vadd.f32 %v2632_v19, %v2571_v10  ;;  %v3123_v3 = vmul.f32 %v5263_v63, %v3086_v22  ;;  %v2796_v20 = vmul.f32 %v5332_v45, %v2759_v38  ;;  %v3495_v44 = vld [vmem:[#allocation3 + $0x3a8] sm:$0x7f]  ;;  %v6215_v31 = vld [vmem:[#allocation9_spill] sm:$0xff]  ;;  %v2878_v27 = vmul.f32 %v6202_v60, %v2841_v46  ;;  %v3577_v22 = vld [vmem:[#allocation3 + $0x4b0] sm:$0x7f] }
 0x1d7   : > { %v3552_v25 = vadd.f32 %v3531_v5, %v3470_v47  ;;  %v3307_v23 = vadd.f32 %v3286_v53, %v3225_v33  ;;  %v3062_v42 = vadd.f32 %v3041_v7, %v2980_v1  ;;  %v3250_v5 = vld [vmem:[#allocation3 + $0x98] sm:$0x7f]  ;;  %v6214_v47 = vld [vmem:[#allocation56_spill] sm:$0xff]  ;;  %v3450_v19 = vmul.f32 %v6215_v31, %v3413_v55  ;;  %v2596_v53 = vld [vmem:[#allocation3 + $0x288] sm:$0x7f] }
 0x1d8   : > { %v2735_v37 = vadd.f32 %v2714_v26, %v2653_v2  ;;  %v2469_v10 = vmul.f32 %v6214_v47, %v2432_v56  ;;  %v3205_v33 = vmul.f32 %v5272_v43, %v3168_v58  ;;  %v3332_v45 = vld [vmem:[#allocation3 + $0x1a0] sm:$0x7f]  ;;  %v6216_v7 = vld [vmem:[#allocation36_spill] sm:$0xff]  ;;  %v2551_v2 = vmul.f32 %v5109_v51, %v2514_v50 }
 0x1d9   : > { %v3634_v62 = vadd.f32 %v3613_v14, %v3552_v25  ;;  %v3389_v34 = vadd.f32 %v3368_v36, %v3307_v23  ;;  %v3144_v38 = vadd.f32 %v3123_v3, %v3062_v42  ;;  %v3005_v25 = vld [vmem:[#allocation3 + $0x298] sm:$0x7f]  ;;  %v6217_v56 = vld [vmem:[#allocation66_spill] sm:$0xff]  ;;  %v6218_v36 = vld [vmem:[#allocation48_spill] sm:$0xff]  ;;  %v2960_v58 = vmul.f32 %v5354_v9, %v2923_v35 }
 0x1da   : > { %v2817_v14 = vadd.f32 %v2796_v20, %v2735_v37  ;;  %v2490_v1 = vadd.f32 %v2469_v10, %v6216_v7  ;;  %v3532_v23 = vmul.f32 %v6217_v56, %v3495_v44  ;;  %v3287_v55 = vmul.f32 %v6218_v36, %v3250_v5  ;;  %v2678_v43 = vld [vmem:[#allocation3 + $0x390] sm:$0x7f]  ;;  %v2433_v46 = vld [vmem:[#allocation3 + $0x80] sm:$0x7f]  ;;  %v3169_v9 = vld [vmem:[#allocation3 + $0x4a8] sm:$0x7f] }
 0x1db   : > { %3655 = vst [vmem:[%s5388_s9 + $0x28] sm:$0x7f] %v3634_v62  ;;  %v3471_v26 = vadd.f32 %v3450_v19, %v3389_v34  ;;  %v3226_v60 = vadd.f32 %v3205_v33, %v3144_v38  ;;  %v3414_v62 = vld [vmem:[#allocation3 + $0x2a8] sm:$0x7f]  ;;  %v3087_v3 = vld [vmem:[#allocation3 + $0x3a0] sm:$0x7f]  ;;  %v2633_v20 = vmul.f32 %v5122_v59, %v2596_v53  ;;  %v3369_v50 = vmul.f32 %v5299_v32, %v3332_v45 }
 0x1dc   : > { %v2899_v63 = vadd.f32 %v2878_v27, %v2817_v14  ;;  %v2572_v42 = vadd.f32 %v2551_v2, %v2490_v1  ;;  %v6219_v10 = vld [vmem:[#allocation68_spill] sm:$0xff]  ;;  %v3042_v44 = vmul.f32 %v5362_v6, %v3005_v25  ;;  %v2760_v34 = vld [vmem:[#allocation3 + $0x498] sm:$0x7f]  ;;  %v2715_v27 = vmul.f32 %v5145_v11, %v2678_v43  ;;  %v2515_v38 = vld [vmem:[#allocation3 + $0x188] sm:$0x7f] }
 0x1dd   : > { %v3553_v37 = vadd.f32 %v3532_v23, %v3471_v26  ;;  %v3614_v7 = vmul.f32 %v6219_v10, %v3577_v22  ;;  %v3308_v5 = vadd.f32 %v3287_v55, %v3226_v60  ;;  %v3496_v19 = vld [vmem:[#allocation3 + $0x3b0] sm:$0x7f]  ;;  %v3451_v53 = vmul.f32 %v5305_v24, %v3414_v62  ;;  %v3578_v25 = vld [vmem:[#allocation3 + $0x4b8] sm:$0x7f]  ;;  %v3251_v60 = vld [vmem:[#allocation3 + $0xa0] sm:$0x7f] }
 0x1de   : > { %v2981_v35 = vadd.f32 %v2960_v58, %v2899_v63  ;;  %v2654_v33 = vadd.f32 %v2633_v20, %v2572_v42  ;;  %v3124_v1 = vmul.f32 %v5370_v40, %v3087_v3  ;;  %v2842_v22 = vld [vmem:[#allocation3 + $0x90] sm:$0x7f]  ;;  %v2470_v45 = vmul.f32 %v5154_v29, %v2433_v46  ;;  %v2924_v42 = vld [vmem:[#allocation3 + $0x198] sm:$0x7f]  ;;  %v6220_v62 = vld [vmem:[#allocation18_spill] sm:$0xff] }
 0x1df   : > { %v3635_v14 = vadd.f32 %v3614_v7, %v3553_v37  ;;  %v3390_v2 = vadd.f32 %v3369_v50, %v3308_v5  ;;  %v2797_v63 = vmul.f32 %v5168_v39, %v2760_v34  ;;  %v2597_v55 = vld [vmem:[#allocation3 + $0x290] sm:$0x7f]  ;;  %v3533_v43 = vmul.f32 %v5327_v13, %v3496_v19  ;;  %v3333_v7 = vld [vmem:[#allocation3 + $0x1a8] sm:$0x7f]  ;;  %v3006_v19 = vld [vmem:[#allocation3 + $0x2a0] sm:$0x7f] }
 0x1e0   : > { %v3063_v26 = vadd.f32 %v3042_v44, %v2981_v35  ;;  %v2736_v23 = vadd.f32 %v2715_v27, %v2654_v33  ;;  %v3206_v58 = vmul.f32 %v5378_v30, %v3169_v9  ;;  %v2491_v20 = vadd.f32 %v2470_v45, %v6220_v62  ;;  %v3415_v50 = vld [vmem:[#allocation3 + $0x2b0] sm:$0x7f]  ;;  %v2679_v35 = vld [vmem:[#allocation3 + $0x398] sm:$0x7f] }
 0x1e1   : > { %3656 = vst [vmem:[%s5388_s9 + $0x30] sm:$0x7f] %v3635_v14  ;;  %v2552_v3 = vmul.f32 %v5212_v48, %v2515_v38  ;;  %v3472_v37 = vadd.f32 %v3451_v53, %v3390_v2  ;;  %v2879_v5 = vmul.f32 %v5178_v18, %v2842_v22  ;;  %v3615_v34 = vmul.f32 %v5348_v8, %v3578_v25  ;;  %v2434_v14 = vld [vmem:[#allocation3 + $0x88] sm:$0x7f]  ;;  %v3497_v38 = vld [vmem:[#allocation3 + $0x3b8] sm:$0x7f] }
 0x1e2   : > { %v3145_v46 = vadd.f32 %v3124_v1, %v3063_v26  ;;  %v2818_v44 = vadd.f32 %v2797_v63, %v2736_v23  ;;  %v3288_v33 = vmul.f32 %v5385_v16, %v3251_v60  ;;  %v2634_v9 = vmul.f32 %v5216_v21, %v2597_v55  ;;  %v2761_v2 = vld [vmem:[#allocation3 + $0x4a0] sm:$0x7f]  ;;  %v6221_v22 = vld [vmem:[#allocation75_spill] sm:$0xff] }
 0x1e3   : > { %v2573_v27 = vadd.f32 %v2552_v3, %v2491_v20  ;;  %v3554_v45 = vadd.f32 %v3533_v43, %v3472_v37  ;;  %v2961_v1 = vmul.f32 %v5197_v4, %v2924_v42  ;;  %v3370_v26 = vmul.f32 %v5397_v57, %v3333_v7  ;;  %v3579_v63 = vld [vmem:[#allocation3 + $0x4c0] sm:$0x7f]  ;;  %v3088_v25 = vld [vmem:[#allocation3 + $0x3a8] sm:$0x7f]  ;;  %v2843_v37 = vld [vmem:[#allocation3 + $0x98] sm:$0x7f] }
 0x1e4   : > { %v3227_v62 = vadd.f32 %v3206_v58, %v3145_v46  ;;  %v2900_v53 = vadd.f32 %v2879_v5, %v2818_v44  ;;  %v3452_v23 = vmul.f32 %v6221_v22, %v3415_v50  ;;  %v6222_v16 = vld [vmem:[#allocation42_spill] sm:$0xff]  ;;  %v2516_v46 = vld [vmem:[#allocation3 + $0x190] sm:$0x7f]  ;;  %v3534_v42 = vmul.f32 %v6210_v49, %v3497_v38  ;;  %v3252_v5 = vld [vmem:[#allocation3 + $0xa8] sm:$0x7f] }
 0x1e5   : > { %v2655_v60 = vadd.f32 %v2634_v9, %v2573_v27  ;;  %v2716_v20 = vmul.f32 %v6222_v16, %v2679_v35  ;;  %v3636_v3 = vadd.f32 %v3615_v34, %v3554_v45  ;;  %v6223_v43 = vld [vmem:[#allocation58_spill] sm:$0xff]  ;;  %v3170_v44 = vld [vmem:[#allocation3 + $0x4b0] sm:$0x7f]  ;;  %v2471_v22 = vmul.f32 %v6206_v15, %v2434_v14  ;;  %v6226_v49 = vld [vmem:[#allocation13_spill] sm:$0xff] }
 0x1e6   : > { %v3309_v55 = vadd.f32 %v3288_v33, %v3227_v62  ;;  %v2982_v21 = vadd.f32 %v2961_v1, %v2900_v53  ;;  %v3043_v58 = vmul.f32 %v6223_v43, %v3006_v19  ;;  %v6224_v57 = vld [vmem:[#allocation44_spill] sm:$0xff]  ;;  %v3616_v35 = vmul.f32 %v6212_v28, %v3579_v63  ;;  %v2925_v9 = vld [vmem:[#allocation3 + $0x1a0] sm:$0x7f]  ;;  %v2598_v19 = vld [vmem:[#allocation3 + $0x298] sm:$0x7f] }
 0x1e7   : > { %v2737_v7 = vadd.f32 %v2716_v20, %v2655_v60  ;;  %v2798_v50 = vmul.f32 %v6224_v57, %v2761_v2  ;;  %3657 = vst [vmem:[%s5388_s9 + $0x38] sm:$0x7f] %v3636_v3  ;;  %v3125_v33 = vmul.f32 %v6207_v52, %v3088_v25  ;;  %v3334_v45 = vld [vmem:[#allocation3 + $0x1b0] sm:$0x7f]  ;;  %v3416_v62 = vld [vmem:[#allocation3 + $0x2b8] sm:$0x7f]  ;;  %v2492_v60 = vadd.f32 %v2471_v22, %v6226_v49 }
 0x1e8   : > { %v3391_v27 = vadd.f32 %v3370_v26, %v3309_v55  ;;  %v3064_v34 = vadd.f32 %v3043_v58, %v2982_v21  ;;  %v6225_v38 = vld [vmem:[#allocation46_spill] sm:$0xff]  ;;  %v3207_v26 = vmul.f32 %v6211_v61, %v3170_v44  ;;  %v3289_v63 = vmul.f32 %v6213_v41, %v3252_v5  ;;  %v3007_v21 = vld [vmem:[#allocation3 + $0x2a8] sm:$0x7f]  ;;  %v2435_v25 = vld [vmem:[#allocation3 + $0x90] sm:$0x7f] }
 0x1e9   : > { %v2819_v53 = vadd.f32 %v2798_v50, %v2737_v7  ;;  %v2880_v1 = vmul.f32 %v6225_v38, %v2843_v37  ;;  %v6227_v20 = vld [vmem:[#allocation50_spill] sm:$0xff]  ;;  %v6228_v28 = vld [vmem:[#allocation59_spill] sm:$0xff]  ;;  %v2635_v37 = vmul.f32 %v6197_v0, %v2598_v19  ;;  %v3371_v22 = vmul.f32 %v6198_v17, %v3334_v45 }
 0x1ea   : > { %v2553_v2 = vmul.f32 %v6227_v20, %v2516_v46  ;;  %v3473_v57 = vadd.f32 %v3452_v23, %v3391_v27  ;;  %v3146_v14 = vadd.f32 %v3125_v33, %v3064_v34  ;;  %v2680_v3 = vld [vmem:[#allocation3 + $0x3a0] sm:$0x7f]  ;;  %v2962_v52 = vmul.f32 %v6228_v28, %v2925_v9  ;;  %v3089_v46 = vld [vmem:[#allocation3 + $0x3b0] sm:$0x7f]  ;;  %v2762_v44 = vld [vmem:[#allocation3 + $0x4a8] sm:$0x7f] }
 0x1eb   : > { %v3498_v55 = vld [vmem:[#allocation3 + $0x3c0] sm:$0x7f]  ;;  %v2901_v58 = vadd.f32 %v2880_v1, %v2819_v53  ;;  %v3453_v23 = vmul.f32 %v6215_v31, %v3416_v62  ;;  %v3580_v27 = vld [vmem:[#allocation3 + $0x4c8] sm:$0x7f]  ;;  %v3044_v34 = vmul.f32 %v5259_v54, %v3007_v21  ;;  %v2717_v53 = vmul.f32 %v6200_v12, %v2680_v3  ;;  %v2517_v9 = vld [vmem:[#allocation3 + $0x198] sm:$0x7f] }
 0x1ec   : > { %v2574_v7 = vadd.f32 %v2553_v2, %v2492_v60  ;;  %v3555_v50 = vadd.f32 %v3534_v42, %v3473_v57  ;;  %v3228_v49 = vadd.f32 %v3207_v26, %v3146_v14  ;;  %v3535_v57 = vmul.f32 %v6217_v56, %v3498_v55  ;;  %v3171_v42 = vld [vmem:[#allocation3 + $0x4b8] sm:$0x7f]  ;;  %v2844_v19 = vld [vmem:[#allocation3 + $0xa0] sm:$0x7f]  ;;  %v6229_v2 = vld [vmem:[#allocation7_spill] sm:$0xff] }
 0x1ed   : > { %v2983_v5 = vadd.f32 %v2962_v52, %v2901_v58  ;;  %v2472_v45 = vmul.f32 %v6214_v47, %v2435_v25  ;;  %v3126_v14 = vmul.f32 %v6229_v2, %v3089_v46  ;;  %v3253_v26 = vld [vmem:[#allocation3 + $0xb0] sm:$0x7f]  ;;  %v6230_v58 = vld [vmem:[#allocation67_spill] sm:$0xff]  ;;  %v2599_v54 = vld [vmem:[#allocation3 + $0x2a0] sm:$0x7f]  ;;  %v3617_v3 = vmul.f32 %v6219_v10, %v3580_v27 }
 0x1ee   : > { %v2656_v33 = vadd.f32 %v2635_v37, %v2574_v7  ;;  %v3637_v1 = vadd.f32 %v3616_v35, %v3555_v50  ;;  %v3310_v60 = vadd.f32 %v3289_v63, %v3228_v49  ;;  %v2799_v21 = vmul.f32 %v6230_v58, %v2762_v44  ;;  %v3335_v35 = vld [vmem:[#allocation3 + $0x1b8] sm:$0x7f]  ;;  %v2926_v63 = vld [vmem:[#allocation3 + $0x1a8] sm:$0x7f]  ;;  %v6231_v37 = vld [vmem:[#allocation14_spill] sm:$0xff] }
 0x1ef   : > { %v3065_v62 = vadd.f32 %v3044_v34, %v2983_v5  ;;  %v2493_v55 = vadd.f32 %v2472_v45, %v6231_v37  ;;  %v2554_v50 = vmul.f32 %v5109_v51, %v2517_v9  ;;  %v6232_v25 = vld [vmem:[#allocation57_spill] sm:$0xff]  ;;  %v3417_v34 = vld [vmem:[#allocation3 + $0x2c0] sm:$0x7f]  ;;  %v2636_v2 = vmul.f32 %v5122_v59, %v2599_v54  ;;  %v2763_v37 = vld [vmem:[#allocation3 + $0x4b0] sm:$0x7f] }
 0x1f0   : > { %v2738_v52 = vadd.f32 %v2717_v53, %v2656_v33  ;;  %3658 = vst [vmem:[%s5388_s9 + $0x40] sm:$0x7f] %v3637_v1  ;;  %v3392_v7 = vadd.f32 %v3371_v22, %v3310_v60  ;;  %v3208_v5 = vmul.f32 %v6232_v25, %v3171_v42  ;;  %v6233_v47 = vld [vmem:[#allocation69_spill] sm:$0xff]  ;;  %v2681_v53 = vld [vmem:[#allocation3 + $0x3a8] sm:$0x7f]  ;;  %v3290_v1 = vmul.f32 %v6218_v36, %v3253_v26 }
 0x1f1   : > { %v3147_v49 = vadd.f32 %v3126_v14, %v3065_v62  ;;  %v2881_v33 = vmul.f32 %v6233_v47, %v2844_v19  ;;  %v3499_v22 = vld [vmem:[#allocation3 + $0x3c8] sm:$0x7f]  ;;  %v3008_v60 = vld [vmem:[#allocation3 + $0x2b0] sm:$0x7f]  ;;  %v2575_v27 = vadd.f32 %v2554_v50, %v2493_v55  ;;  %v2436_v10 = vld [vmem:[#allocation3 + $0x98] sm:$0x7f]  ;;  %v3372_v9 = vmul.f32 %v5299_v32, %v3335_v35 }
 0x1f2   : > { %v2820_v46 = vadd.f32 %v2799_v21, %v2738_v52  ;;  %v3474_v44 = vadd.f32 %v3453_v23, %v3392_v7  ;;  %v6234_v14 = vld [vmem:[#allocation70_spill] sm:$0xff]  ;;  %v3454_v19 = vmul.f32 %v5305_v24, %v3417_v34  ;;  %v3581_v21 = vld [vmem:[#allocation3 + $0x4d0] sm:$0x7f]  ;;  %v3090_v23 = vld [vmem:[#allocation3 + $0x3b8] sm:$0x7f]  ;;  %v2718_v26 = vmul.f32 %v5145_v11, %v2681_v53 }
 0x1f3   : > { %v3229_v45 = vadd.f32 %v3208_v5, %v3147_v49  ;;  %v2963_v42 = vmul.f32 %v6234_v14, %v2926_v63  ;;  %v2657_v7 = vadd.f32 %v2636_v2, %v2575_v27  ;;  %v3536_v55 = vmul.f32 %v5327_v13, %v3499_v22  ;;  %v2845_v35 = vld [vmem:[#allocation3 + $0xa8] sm:$0x7f]  ;;  %v2518_v49 = vld [vmem:[#allocation3 + $0x1a0] sm:$0x7f]  ;;  %v2927_v22 = vld [vmem:[#allocation3 + $0x1b0] sm:$0x7f] }
 0x1f4   : > { %v2902_v62 = vadd.f32 %v2881_v33, %v2820_v46  ;;  %v3556_v52 = vadd.f32 %v3535_v57, %v3474_v44  ;;  %v3045_v50 = vmul.f32 %v5362_v6, %v3008_v60  ;;  %v3172_v63 = vld [vmem:[#allocation3 + $0x4c0] sm:$0x7f]  ;;  %v3254_v46 = vld [vmem:[#allocation3 + $0xb8] sm:$0x7f]  ;;  %v2800_v34 = vmul.f32 %v5168_v39, %v2763_v37  ;;  %v2600_v27 = vld [vmem:[#allocation3 + $0x2a8] sm:$0x7f] }
 0x1f5   : > { %v3311_v51 = vadd.f32 %v3290_v1, %v3229_v45  ;;  %v2739_v57 = vadd.f32 %v2718_v26, %v2657_v7  ;;  %v2473_v33 = vmul.f32 %v5154_v29, %v2436_v10  ;;  %v3618_v53 = vmul.f32 %v5348_v8, %v3581_v21  ;;  %v3336_v60 = vld [vmem:[#allocation3 + $0x1c0] sm:$0x7f]  ;;  %v3418_v45 = vld [vmem:[#allocation3 + $0x2c8] sm:$0x7f]  ;;  %v3009_v26 = vld [vmem:[#allocation3 + $0x2b8] sm:$0x7f] }
 0x1f6   : > { %v2984_v54 = vadd.f32 %v2963_v42, %v2902_v62  ;;  %v3638_v5 = vadd.f32 %v3617_v3, %v3556_v52  ;;  %v3127_v1 = vmul.f32 %v5370_v40, %v3090_v23  ;;  %v2882_v3 = vmul.f32 %v5178_v18, %v2845_v35  ;;  %v6235_v42 = vld [vmem:[#allocation25_spill] sm:$0xff]  ;;  %v2682_v23 = vld [vmem:[#allocation3 + $0x3b0] sm:$0x7f] }
 0x1f7   : > { %v3393_v2 = vadd.f32 %v3372_v9, %v3311_v51  ;;  %v2821_v62 = vadd.f32 %v2800_v34, %v2739_v57  ;;  %v2494_v52 = vadd.f32 %v2473_v33, %v6235_v42  ;;  %v2555_v37 = vmul.f32 %v5212_v48, %v2518_v49  ;;  %v6236_v9 = vld [vmem:[#allocation73_spill] sm:$0xff]  ;;  %v6237_v34 = vld [vmem:[#allocation31_spill] sm:$0xff]  ;;  %v6238_v42 = vld [vmem:[#allocation74_spill] sm:$0xff] }
 0x1f8   : > { %v3066_v44 = vadd.f32 %v3045_v50, %v2984_v54  ;;  %3659 = vst [vmem:[%s5388_s9 + $0x48] sm:$0x7f] %v3638_v5  ;;  %v3209_v51 = vmul.f32 %v5378_v30, %v3172_v63  ;;  %v3291_v21 = vmul.f32 %v6236_v9, %v3254_v46  ;;  %v2437_v54 = vld [vmem:[#allocation3 + $0xa0] sm:$0x7f]  ;;  %v3500_v50 = vld [vmem:[#allocation3 + $0x3d0] sm:$0x7f]  ;;  %v2964_v29 = vmul.f32 %v5197_v4, %v2927_v22 }
 0x1f9   : > { %v3475_v7 = vadd.f32 %v3454_v19, %v3393_v2  ;;  %v2903_v5 = vadd.f32 %v2882_v3, %v2821_v62  ;;  %v2576_v57 = vadd.f32 %v2555_v37, %v2494_v52  ;;  %v2637_v35 = vmul.f32 %v6237_v34, %v2600_v27  ;;  %v6239_v19 = vld [vmem:[#allocation75_spill] sm:$0xff]  ;;  %v2764_v63 = vld [vmem:[#allocation3 + $0x4b8] sm:$0x7f]  ;;  %v6240_v27 = vld [vmem:[#allocation34_spill] sm:$0xff] }
 0x1fa   : > { %v3148_v10 = vadd.f32 %v3127_v1, %v3066_v44  ;;  %v3373_v49 = vmul.f32 %v6238_v42, %v3336_v60  ;;  %v3455_v2 = vmul.f32 %v6239_v19, %v3418_v45  ;;  %v3091_v44 = vld [vmem:[#allocation3 + $0x3c0] sm:$0x7f]  ;;  %v3582_v1 = vld [vmem:[#allocation3 + $0x4d8] sm:$0x7f]  ;;  %v3046_v48 = vmul.f32 %v6223_v43, %v3009_v26  ;;  %v2519_v22 = vld [vmem:[#allocation3 + $0x1a8] sm:$0x7f] }
 0x1fb   : > { %v3557_v18 = vadd.f32 %v3536_v55, %v3475_v7  ;;  %v2985_v46 = vadd.f32 %v2964_v29, %v2903_v5  ;;  %v2658_v39 = vadd.f32 %v2637_v35, %v2576_v57  ;;  %v2719_v62 = vmul.f32 %v6222_v16, %v2682_v23  ;;  %v3173_v37 = vld [vmem:[#allocation3 + $0x4c8] sm:$0x7f]  ;;  %v2846_v7 = vld [vmem:[#allocation3 + $0xb0] sm:$0x7f]  ;;  %v3255_v34 = vld [vmem:[#allocation3 + $0xc0] sm:$0x7f] }
 0x1fc   : > { %v3230_v33 = vadd.f32 %v3209_v51, %v3148_v10  ;;  %v3537_v55 = vmul.f32 %v6240_v27, %v3500_v50  ;;  %v2474_v60 = vmul.f32 %v6206_v15, %v2437_v54  ;;  %v6241_v10 = vld [vmem:[#allocation40_spill] sm:$0xff] }
 0x1fd   : > { %v3639_v3 = vadd.f32 %v3618_v53, %v3557_v18  ;;  %v3067_v45 = vadd.f32 %v3046_v48, %v2985_v46  ;;  %v3128_v51 = vmul.f32 %v6241_v10, %v3091_v44  ;;  %v2740_v29 = vadd.f32 %v2719_v62, %v2658_v39  ;;  %v6242_v5 = vld [vmem:[#allocation44_spill] sm:$0xff]  ;;  %v3337_v18 = vld [vmem:[#allocation3 + $0x1c8] sm:$0x7f]  ;;  %v2928_v53 = vld [vmem:[#allocation3 + $0x1b8] sm:$0x7f] }
 0x1fe   : > { %v3312_v52 = vadd.f32 %v3291_v21, %v3230_v33  ;;  %v2801_v26 = vmul.f32 %v6242_v5, %v2764_v63  ;;  %v2601_v43 = vld [vmem:[#allocation3 + $0x2b0] sm:$0x7f]  ;;  %v6244_v21 = vld [vmem:[#allocation21_spill] sm:$0xff]  ;;  %v2556_v33 = vmul.f32 %v6227_v20, %v2519_v22  ;;  %v3210_v48 = vmul.f32 %v6211_v61, %v3173_v37  ;;  %v2765_v37 = vld [vmem:[#allocation3 + $0x4c0] sm:$0x7f] }
 0x1ff   : > { %3660 = vst [vmem:[%s5388_s9 + $0x50] sm:$0x7f] %v3639_v3  ;;  %v6243_v23 = vld [vmem:[#allocation76_spill] sm:$0xff]  ;;  %v2495_v50 = vadd.f32 %v2474_v60, %v6244_v21  ;;  %v3149_v16 = vadd.f32 %v3128_v51, %v3067_v45  ;;  %v2883_v39 = vmul.f32 %v6225_v38, %v2846_v7  ;;  %v2683_v46 = vld [vmem:[#allocation3 + $0x3b8] sm:$0x7f]  ;;  %v3292_v62 = vmul.f32 %v6213_v41, %v3255_v34 }
 0x200   : > { %v3394_v57 = vadd.f32 %v3373_v49, %v3312_v52  ;;  %v3619_v35 = vmul.f32 %v6243_v23, %v3582_v1  ;;  %v3419_v54 = vld [vmem:[#allocation3 + $0x2d0] sm:$0x7f]  ;;  %v2822_v44 = vadd.f32 %v2801_v26, %v2740_v29  ;;  %v3501_v49 = vld [vmem:[#allocation3 + $0x3d8] sm:$0x7f]  ;;  %v3010_v3 = vld [vmem:[#allocation3 + $0x2c0] sm:$0x7f]  ;;  %v2638_v52 = vmul.f32 %v6197_v0, %v2601_v43 }
 0x201   : > { %v2577_v1 = vadd.f32 %v2556_v33, %v2495_v50  ;;  %v3231_v15 = vadd.f32 %v3210_v48, %v3149_v16  ;;  %v3374_v60 = vmul.f32 %v6198_v17, %v3337_v18  ;;  %v2965_v45 = vmul.f32 %v6228_v28, %v2928_v53  ;;  %v3583_v7 = vld [vmem:[#allocation3 + $0x4e0] sm:$0x7f]  ;;  %v3092_v26 = vld [vmem:[#allocation3 + $0x3c8] sm:$0x7f]  ;;  %v6245_v43 = vld [vmem:[#allocation61_spill] sm:$0xff] }
 0x202   : > { %v3476_v63 = vadd.f32 %v3455_v2, %v3394_v57  ;;  %v2904_v22 = vadd.f32 %v2883_v39, %v2822_v44  ;;  %v3456_v29 = vmul.f32 %v6215_v31, %v3419_v54  ;;  %v2720_v34 = vmul.f32 %v6200_v12, %v2683_v46  ;;  %v2438_v57 = vld [vmem:[#allocation3 + $0xa8] sm:$0x7f]  ;;  %v2847_v33 = vld [vmem:[#allocation3 + $0xb8] sm:$0x7f]  ;;  %v3174_v53 = vld [vmem:[#allocation3 + $0x4d0] sm:$0x7f] }
 0x203   : > { %v2659_v2 = vadd.f32 %v2638_v52, %v2577_v1  ;;  %v3313_v21 = vadd.f32 %v3292_v62, %v3231_v15  ;;  %v3538_v50 = vmul.f32 %v6217_v56, %v3501_v49  ;;  %v3047_v18 = vmul.f32 %v6245_v43, %v3010_v3  ;;  %v3256_v44 = vld [vmem:[#allocation3 + $0xc8] sm:$0x7f]  ;;  %v6246_v39 = vld [vmem:[#allocation38_spill] sm:$0xff]  ;;  %v6248_v46 = vld [vmem:[#allocation68_spill] sm:$0xff] }
 0x204   : > { %v3558_v51 = vadd.f32 %v3537_v55, %v3476_v63  ;;  %v2986_v16 = vadd.f32 %v2965_v45, %v2904_v22  ;;  %v2802_v54 = vmul.f32 %v6230_v58, %v2765_v37  ;;  %v6247_v63 = vld [vmem:[#allocation28_spill] sm:$0xff]  ;;  %v3620_v12 = vmul.f32 %v6248_v46, %v3583_v7  ;;  %v6249_v62 = vld [vmem:[#allocation7_spill] sm:$0xff]  ;;  %v2929_v0 = vld [vmem:[#allocation3 + $0x1c0] sm:$0x7f] }
 0x205   : > { %v2741_v55 = vadd.f32 %v2720_v34, %v2659_v2  ;;  %v2332_v1 = vadd.f32 %v6247_v63, %v6246_v39  ;;  %v3395_v52 = vadd.f32 %v3374_v60, %v3313_v21  ;;  %v3129_v49 = vmul.f32 %v6249_v62, %v3092_v26  ;;  %v2520_v22 = vld [vmem:[#allocation3 + $0x1b0] sm:$0x7f]  ;;  %v3420_v45 = vld [vmem:[#allocation3 + $0x2d8] sm:$0x7f]  ;;  %v3011_v21 = vld [vmem:[#allocation3 + $0x2c8] sm:$0x7f] }
 0x206   : > { %v3640_v48 = vadd.f32 %v3619_v35, %v3558_v51  ;;  %v3068_v15 = vadd.f32 %v3047_v18, %v2986_v16  ;;  %v3338_v3 = vld [vmem:[#allocation3 + $0x1d0] sm:$0x7f]  ;;  %v2884_v51 = vmul.f32 %v6233_v47, %v2847_v33  ;;  %v6250_v2 = vld [vmem:[#allocation37_spill] sm:$0xff]  ;;  %v3211_v60 = vmul.f32 %v6232_v25, %v3174_v53  ;;  %v3502_v16 = vld [vmem:[#allocation3 + $0x3e0] sm:$0x7f] }
 0x207   : > { %v2823_v35 = vadd.f32 %v2802_v54, %v2741_v55  ;;  %v2414_v34 = vadd.f32 %v6250_v2, %v2332_v1  ;;  %v6251_v37 = vld [vmem:[#allocation56_spill] sm:$0xff]  ;;  %v3477_v20 = vadd.f32 %v3456_v29, %v3395_v52  ;;  %v3293_v7 = vmul.f32 %v6218_v36, %v3256_v44  ;;  %v2602_v26 = vld [vmem:[#allocation3 + $0x2b8] sm:$0x7f]  ;;  %v6252_v54 = vld [vmem:[#allocation11_spill] sm:$0xff] }
 0x208   : > { %3661 = vst [vmem:[%s5388_s9 + $0x58] sm:$0x7f] %v3640_v48  ;;  %v2475_v58 = vmul.f32 %v6251_v37, %v2438_v57  ;;  %v3150_v39 = vadd.f32 %v3129_v49, %v3068_v15  ;;  %v2966_v48 = vmul.f32 %v6234_v14, %v2929_v0  ;;  %v3093_v63 = vld [vmem:[#allocation3 + $0x3d0] sm:$0x7f]  ;;  %v2557_v33 = vmul.f32 %v6252_v54, %v2520_v22  ;;  %v2684_v52 = vld [vmem:[#allocation3 + $0x3c0] sm:$0x7f] }
 0x209   : > { %v2905_v18 = vadd.f32 %v2884_v51, %v2823_v35  ;;  %v3559_v47 = vadd.f32 %v3538_v50, %v3477_v20  ;;  %v3375_v57 = vmul.f32 %v5299_v32, %v3338_v3  ;;  %v3457_v29 = vmul.f32 %v5305_v24, %v3420_v45  ;;  %v3584_v53 = vld [vmem:[#allocation3 + $0x4e8] sm:$0x7f]  ;;  %v3175_v49 = vld [vmem:[#allocation3 + $0x4d8] sm:$0x7f]  ;;  %v3257_v2 = vld [vmem:[#allocation3 + $0xd0] sm:$0x7f] }
 0x20a   : > { %v2496_v55 = vadd.f32 %v2475_v58, %v2414_v34  ;;  %v3232_v1 = vadd.f32 %v3211_v60, %v3150_v39  ;;  %v3048_v44 = vmul.f32 %v5362_v6, %v3011_v21  ;;  %v2639_v0 = vmul.f32 %v5122_v59, %v2602_v26  ;;  %v2766_v22 = vld [vmem:[#allocation3 + $0x4c8] sm:$0x7f]  ;;  %v3339_v45 = vld [vmem:[#allocation3 + $0x1d8] sm:$0x7f]  ;;  %v3421_v34 = vld [vmem:[#allocation3 + $0x2e0] sm:$0x7f] }
 0x20b   : > { %v2987_v15 = vadd.f32 %v2966_v48, %v2905_v18  ;;  %v3641_v58 = vadd.f32 %v3620_v12, %v3559_v47  ;;  %v3539_v20 = vmul.f32 %v5327_v13, %v3502_v16  ;;  %v3130_v50 = vmul.f32 %v5370_v40, %v3093_v63  ;;  %v2848_v21 = vld [vmem:[#allocation3 + $0xc0] sm:$0x7f]  ;;  %v6254_v48 = vld [vmem:[#allocation64_spill] sm:$0xff]  ;;  %v3503_v63 = vld [vmem:[#allocation3 + $0x3e8] sm:$0x7f] }
 0x20c   : > { %v2578_v35 = vadd.f32 %v2557_v33, %v2496_v55  ;;  %v3314_v51 = vadd.f32 %v3293_v7, %v3232_v1  ;;  %v2721_v60 = vmul.f32 %v5145_v11, %v2684_v52  ;;  %v6253_v18 = vld [vmem:[#allocation22_spill] sm:$0xff]  ;;  %v2439_v55 = vld [vmem:[#allocation3 + $0xb0] sm:$0x7f]  ;;  %v3621_v12 = vmul.f32 %v5348_v8, %v3584_v53  ;;  %v2930_v52 = vld [vmem:[#allocation3 + $0x1c8] sm:$0x7f] }
 0x20d   : > { %v3069_v3 = vadd.f32 %v3048_v44, %v2987_v15  ;;  %v2251_v6 = vadd.f32 %v6254_v48, %v6253_v18  ;;  %3662 = vst [vmem:[%s5388_s9 + $0x60] sm:$0x7f] %v3641_v58  ;;  %v3212_v47 = vmul.f32 %v5378_v30, %v3175_v49  ;;  %v3294_v7 = vmul.f32 %v6236_v9, %v3257_v2  ;;  %v3585_v33 = vld [vmem:[#allocation3 + $0x4f0] sm:$0x7f]  ;;  %v6255_v15 = vld [vmem:[#allocation27_spill] sm:$0xff] }
 0x20e   : > { %v2660_v39 = vadd.f32 %v2639_v0, %v2578_v35  ;;  %v3396_v26 = vadd.f32 %v3375_v57, %v3314_v51  ;;  %v2803_v44 = vmul.f32 %v6255_v15, %v2766_v22  ;;  %v6256_v35 = vld [vmem:[#allocation26_spill] sm:$0xff]  ;;  %v3376_v18 = vmul.f32 %v6238_v42, %v3339_v45  ;;  %v6257_v58 = vld [vmem:[#allocation15_spill] sm:$0xff]  ;;  %v2521_v51 = vld [vmem:[#allocation3 + $0x1b8] sm:$0x7f] }
 0x20f   : > { %v3151_v16 = vadd.f32 %v3130_v50, %v3069_v3  ;;  %v2333_v0 = vadd.f32 %v6256_v35, %v2251_v6  ;;  %v3458_v57 = vmul.f32 %v6239_v19, %v3421_v34  ;;  %v2885_v53 = vmul.f32 %v6257_v58, %v2848_v21  ;;  %v3012_v2 = vld [vmem:[#allocation3 + $0x2d0] sm:$0x7f]  ;;  %v3094_v50 = vld [vmem:[#allocation3 + $0x3d8] sm:$0x7f]  ;;  %v6258_v3 = vld [vmem:[#allocation39_spill] sm:$0xff] }
 0x210   : > { %v2742_v1 = vadd.f32 %v2721_v60, %v2660_v39  ;;  %v3478_v40 = vadd.f32 %v3457_v29, %v3396_v26  ;;  %v6259_v39 = vld [vmem:[#allocation52_spill] sm:$0xff]  ;;  %v3540_v30 = vmul.f32 %v6240_v27, %v3503_v63  ;;  %v3622_v6 = vmul.f32 %v6243_v23, %v3585_v33  ;;  %v2603_v45 = vld [vmem:[#allocation3 + $0x2c0] sm:$0x7f]  ;;  %v3258_v35 = vld [vmem:[#allocation3 + $0xd8] sm:$0x7f] }
 0x211   : > { %v3233_v49 = vadd.f32 %v3212_v47, %v3151_v16  ;;  %v2415_v9 = vadd.f32 %v6258_v3, %v2333_v0  ;;  %v2476_v60 = vmul.f32 %v6259_v39, %v2439_v55  ;;  %v2967_v29 = vmul.f32 %v5197_v4, %v2930_v52  ;;  %v3176_v21 = vld [vmem:[#allocation3 + $0x4e0] sm:$0x7f]  ;;  %v6262_v63 = vld [vmem:[#allocation41_spill] sm:$0xff]  ;;  %v6263_v33 = vld [vmem:[#allocation16_spill] sm:$0xff] }
 0x212   : > { %v2824_v48 = vadd.f32 %v2803_v44, %v2742_v1  ;;  %v3560_v22 = vadd.f32 %v3539_v20, %v3478_v40  ;;  %v3340_v47 = vld [vmem:[#allocation3 + $0x1e0] sm:$0x7f]  ;;  %v6260_v1 = vld [vmem:[#allocation19_spill] sm:$0xff]  ;;  %v3131_v40 = vmul.f32 %v6241_v10, %v3094_v50  ;;  %v2170_v23 = vadd.f32 %v6263_v33, %v6262_v63  ;;  %v6265_v50 = vld [vmem:[#allocation20_spill] sm:$0xff] }
 0x213   : > { %v3315_v34 = vadd.f32 %v3294_v7, %v3233_v49  ;;  %v2497_v16 = vadd.f32 %v2476_v60, %v2415_v9  ;;  %v2558_v44 = vmul.f32 %v6260_v1, %v2521_v51  ;;  %v6261_v3 = vld [vmem:[#allocation58_spill] sm:$0xff]  ;;  %v2685_v20 = vld [vmem:[#allocation3 + $0x3c8] sm:$0x7f]  ;;  %v3586_v49 = vld [vmem:[#allocation3 + $0x4f8] sm:$0x7f]  ;;  %v3213_v9 = vmul.f32 %v6211_v61, %v3176_v21 }
 0x214   : > { %v2906_v26 = vadd.f32 %v2885_v53, %v2824_v48  ;;  %v3642_v0 = vadd.f32 %v3621_v12, %v3560_v22  ;;  %v3049_v55 = vmul.f32 %v6261_v3, %v3012_v2  ;;  %v3422_v7 = vld [vmem:[#allocation3 + $0x2e8] sm:$0x7f]  ;;  %v3504_v53 = vld [vmem:[#allocation3 + $0x3f0] sm:$0x7f]  ;;  %v3295_v12 = vmul.f32 %v6213_v41, %v3258_v35  ;;  %v2440_v22 = vld [vmem:[#allocation3 + $0xb8] sm:$0x7f] }
 0x215   : > { %v3397_v52 = vadd.f32 %v3376_v18, %v3315_v34  ;;  %v2579_v48 = vadd.f32 %v2558_v44, %v2497_v16  ;;  %v6264_v19 = vld [vmem:[#allocation31_spill] sm:$0xff]  ;;  %v3377_v51 = vmul.f32 %v6198_v17, %v3340_v47  ;;  %v2767_v2 = vld [vmem:[#allocation3 + $0x4d0] sm:$0x7f]  ;;  %v2252_v60 = vadd.f32 %v6265_v50, %v2170_v23  ;;  %v6266_v34 = vld [vmem:[#allocation42_spill] sm:$0xff] }
 0x216   : > { %v2988_v27 = vadd.f32 %v2967_v29, %v2906_v26  ;;  %v2640_v42 = vmul.f32 %v6264_v19, %v2603_v45  ;;  %3663 = vst [vmem:[%s5388_s9 + $0x68] sm:$0x7f] %v3642_v0  ;;  %v2722_v26 = vmul.f32 %v6266_v34, %v2685_v20  ;;  %v2849_v33 = vld [vmem:[#allocation3 + $0xc8] sm:$0x7f]  ;;  %v2931_v16 = vld [vmem:[#allocation3 + $0x1d0] sm:$0x7f]  ;;  %v3459_v45 = vmul.f32 %v6215_v31, %v3422_v7 }
 0x217   : > { %v3479_v63 = vadd.f32 %v3458_v57, %v3397_v52  ;;  %v5648_v44 = vmul.f32 %v6217_v56, %v3504_v53  ;;  %v5651_v21 = vmul.f32 %v6248_v46, %v3586_v49  ;;  %v3013_v35 = vld [vmem:[#allocation3 + $0x2d8] sm:$0x7f]  ;;  %v2441_v20 = vld [vmem:[#allocation3 + $0xc0] sm:$0x7f]  ;;  %v2886_v52 = vmul.f32 %v6225_v38, %v2849_v33  ;;  %v3177_v53 = vld [vmem:[#allocation3 + $0x4e8] sm:$0x7f] }
 0x218   : > { %v3070_v18 = vadd.f32 %v3049_v55, %v2988_v27  ;;  %v2661_v29 = vadd.f32 %v2640_v42, %v2579_v48  ;;  %v6267_v47 = vld [vmem:[#allocation29_spill] sm:$0xff]  ;;  %v2804_v42 = vmul.f32 %v6242_v5, %v2767_v2  ;;  %v3095_v27 = vld [vmem:[#allocation3 + $0x3e0] sm:$0x7f]  ;;  %v2968_v7 = vmul.f32 %v6228_v28, %v2931_v16  ;;  %v6268_v48 = vld [vmem:[#allocation43_spill] sm:$0xff] }
 0x219   : > { %v2334_v0 = vadd.f32 %v6267_v47, %v2252_v60  ;;  %v3561_v23 = vadd.f32 %v3540_v30, %v3479_v63  ;;  %v2522_v55 = vld [vmem:[#allocation3 + $0x1c0] sm:$0x7f]  ;;  %v6269_v46 = vld [vmem:[#allocation23_spill] sm:$0xff] }
 0x21a   : > { %v3152_v50 = vadd.f32 %v3131_v40, %v3070_v18  ;;  %v2743_v57 = vadd.f32 %v2722_v26, %v2661_v29  ;;  %v2477_v56 = vmul.f32 %v6269_v46, %v2440_v22  ;;  %v3050_v40 = vmul.f32 %v6245_v43, %v3013_v35  ;;  %v2604_v63 = vld [vmem:[#allocation3 + $0x2c8] sm:$0x7f]  ;;  %v3259_v29 = vld [vmem:[#allocation3 + $0xe0] sm:$0x7f] }
 0x21b   : > { %v2416_v49 = vadd.f32 %v6268_v48, %v2334_v0  ;;  %v3643_v31 = vadd.f32 %v3622_v6, %v3561_v23  ;;  %v2523_v2 = vld [vmem:[#allocation3 + $0x1c8] sm:$0x7f]  ;;  %v3132_v18 = vmul.f32 %v6249_v62, %v3095_v27  ;;  %v6270_v47 = vld [vmem:[#allocation50_spill] sm:$0xff]  ;;  %v3214_v6 = vmul.f32 %v6232_v25, %v3177_v53  ;;  %v2605_v23 = vld [vmem:[#allocation3 + $0x2d0] sm:$0x7f] }
 0x21c   : > { %v3234_v60 = vadd.f32 %v3213_v9, %v3152_v50  ;;  %v2825_v30 = vadd.f32 %v2804_v42, %v2743_v57  ;;  %v3341_v26 = vld [vmem:[#allocation3 + $0x1e8] sm:$0x7f]  ;;  %v2559_v16 = vmul.f32 %v6270_v47, %v2522_v55  ;;  %v2686_v9 = vld [vmem:[#allocation3 + $0x3d0] sm:$0x7f]  ;;  %v2478_v35 = vmul.f32 %v6251_v37, %v2441_v20  ;;  %v3505_v57 = vld [vmem:[#allocation3 + $0x3f8] sm:$0x7f] }
 0x21d   : > { %v2498_v33 = vadd.f32 %v2477_v56, %v2416_v49  ;;  %v6271_v17 = vld [vmem:[#allocation51_spill] sm:$0xff]  ;;  %3664 = vst [vmem:[%s5388_s9 + $0x70] sm:$0x7f] %v3643_v31  ;;  %v3423_v50 = vld [vmem:[#allocation3 + $0x2f0] sm:$0x7f]  ;;  %v6274_v56 = vld [vmem:[#allocation17_spill] sm:$0xff]  ;;  %v2560_v55 = vmul.f32 %v6252_v54, %v2523_v2  ;;  %v3378_v31 = vmul.f32 %v5299_v32, %v3341_v26 }
 0x21e   : > { %v6272_v28 = vld [vmem:[#allocation55_spill] sm:$0xff]  ;;  %v3316_v0 = vadd.f32 %v3295_v12, %v3234_v60  ;;  %v2907_v22 = vadd.f32 %v2886_v52, %v2825_v30  ;;  %v2768_v12 = vld [vmem:[#allocation3 + $0x4d8] sm:$0x7f]  ;;  %v2850_v52 = vld [vmem:[#allocation3 + $0xd0] sm:$0x7f]  ;;  %v3460_v54 = vmul.f32 %v5305_v24, %v3423_v50 }
 0x21f   : > { %v2335_v41 = vadd.f32 %v6272_v28, %v6271_v17  ;;  %v2580_v42 = vadd.f32 %v2559_v16, %v2498_v33  ;;  %v6273_v27 = vld [vmem:[#allocation63_spill] sm:$0xff]  ;;  %v3296_v28 = vmul.f32 %v6218_v36, %v3259_v29  ;;  %v6275_v37 = vld [vmem:[#allocation65_spill] sm:$0xff]  ;;  %v2642_v33 = vmul.f32 %v5122_v59, %v2605_v23  ;;  %v3587_v23 = vld [vmem:[#allocation3 + $0x500] sm:$0x7f] }
 0x220   : > { %v2641_v48 = vmul.f32 %v6273_v27, %v2604_v63  ;;  %v3398_v62 = vadd.f32 %v3377_v51, %v3316_v0  ;;  %v2989_v17 = vadd.f32 %v2968_v7, %v2907_v22  ;;  %v2723_v20 = vmul.f32 %v6275_v37, %v2686_v9  ;;  %v2932_v60 = vld [vmem:[#allocation3 + $0x1d8] sm:$0x7f]  ;;  %v2769_v7 = vld [vmem:[#allocation3 + $0x4e0] sm:$0x7f]  ;;  %v2442_v2 = vld [vmem:[#allocation3 + $0xc8] sm:$0x7f] }
 0x221   : > { %v2417_v49 = vadd.f32 %v6274_v56, %v2335_v41  ;;  %v2687_v63 = vld [vmem:[#allocation3 + $0x3d8] sm:$0x7f]  ;;  %v5676_v51 = vmul.f32 %v5327_v13, %v3505_v57  ;;  %v6276_v26 = vld [vmem:[#allocation67_spill] sm:$0xff]  ;;  %v3014_v57 = vld [vmem:[#allocation3 + $0x2e0] sm:$0x7f] }
 0x222   : > { %v2662_v53 = vadd.f32 %v2641_v48, %v2580_v42  ;;  %v3480_v16 = vadd.f32 %v3459_v45, %v3398_v62  ;;  %v3071_v41 = vadd.f32 %v3050_v40, %v2989_v17  ;;  %v2805_v0 = vmul.f32 %v6276_v26, %v2768_v12  ;;  %v6277_v22 = vld [vmem:[#allocation69_spill] sm:$0xff]  ;;  %v2524_v40 = vld [vmem:[#allocation3 + $0x1d0] sm:$0x7f]  ;;  %v2933_v17 = vld [vmem:[#allocation3 + $0x1e0] sm:$0x7f] }
 0x223   : > { %v2499_v30 = vadd.f32 %v2478_v35, %v2417_v49  ;;  %v2887_v42 = vmul.f32 %v6277_v22, %v2850_v52  ;;  %v2851_v48 = vld [vmem:[#allocation3 + $0xd8] sm:$0x7f]  ;;  %v2969_v62 = vmul.f32 %v6234_v14, %v2932_v60  ;;  %v2724_v45 = vmul.f32 %v5145_v11, %v2687_v63  ;;  %v6279_v52 = vld [vmem:[#allocation10_spill] sm:$0xff]  ;;  %v3178_v63 = vld [vmem:[#allocation3 + $0x4f0] sm:$0x7f] }
 0x224   : > { %v2744_v29 = vadd.f32 %v2723_v20, %v2662_v53  ;;  %v3562_v35 = vadd.f32 %v5648_v44, %v3480_v16  ;;  %v3153_v59 = vadd.f32 %v3132_v18, %v3071_v41  ;;  %v2806_v49 = vmul.f32 %v6255_v15, %v2769_v7  ;;  %v6278_v12 = vld [vmem:[#allocation53_spill] sm:$0xff]  ;;  %v3260_v16 = vld [vmem:[#allocation3 + $0xe8] sm:$0x7f] }
 0x225   : > { %v2581_v9 = vadd.f32 %v2560_v55, %v2499_v30  ;;  %v2336_v55 = vadd.f32 %v6279_v52, %v6278_v12  ;;  %v2888_v18 = vmul.f32 %v6257_v58, %v2851_v48  ;;  %v2479_v20 = vmul.f32 %v6259_v39, %v2442_v2  ;;  %v2606_v11 = vld [vmem:[#allocation3 + $0x2d8] sm:$0x7f]  ;;  %v3096_v30 = vld [vmem:[#allocation3 + $0x3e8] sm:$0x7f]  ;;  %v3342_v2 = vld [vmem:[#allocation3 + $0x1f0] sm:$0x7f] }
 0x226   : > { %v2826_v50 = vadd.f32 %v2805_v0, %v2744_v29  ;;  %v3644_v53 = vadd.f32 %v5651_v21, %v3562_v35  ;;  %v3235_v44 = vadd.f32 %v3214_v6, %v3153_v59  ;;  %v6280_v41 = vld [vmem:[#allocation35_spill] sm:$0xff]  ;;  %v2561_v15 = vmul.f32 %v6260_v1, %v2524_v40  ;;  %v3097_v48 = vld [vmem:[#allocation3 + $0x3f0] sm:$0x7f]  ;;  %v3179_v35 = vld [vmem:[#allocation3 + $0x4f8] sm:$0x7f] }
 0x227   : > { %v2663_v56 = vadd.f32 %v2642_v33, %v2581_v9  ;;  %v2418_v29 = vadd.f32 %v6280_v41, %v2336_v55  ;;  %v3624_v0 = vmul.f32 %v5348_v8, %v3587_v23  ;;  %v6281_v21 = vld [vmem:[#allocation71_spill] sm:$0xff]  ;;  %v2970_v58 = vmul.f32 %v5197_v4, %v2933_v17  ;;  %v6283_v40 = vld [vmem:[#allocation32_spill] sm:$0xff]  ;;  %v6284_v12 = vld [vmem:[#allocation73_spill] sm:$0xff] }
 0x228   : > { %v2908_v60 = vadd.f32 %v2887_v42, %v2826_v50  ;;  %3665 = vst [vmem:[%s5388_s9 + $0x78] sm:$0x7f] %v3644_v53  ;;  %v3317_v7 = vadd.f32 %v3296_v28, %v3235_v44  ;;  %v3051_v6 = vmul.f32 %v6281_v21, %v3014_v57  ;;  %v3015_v9 = vld [vmem:[#allocation3 + $0x2e8] sm:$0x7f]  ;;  %v3215_v28 = vmul.f32 %v6283_v40, %v3178_v63  ;;  %v2688_v52 = vld [vmem:[#allocation3 + $0x3e0] sm:$0x7f] }
 0x229   : > { %v2745_v33 = vadd.f32 %v2724_v45, %v2663_v56  ;;  %v2500_v59 = vadd.f32 %v2479_v20, %v2418_v29  ;;  %v2643_v45 = vmul.f32 %v6264_v19, %v2606_v11  ;;  %v6282_v56 = vld [vmem:[#allocation72_spill] sm:$0xff]  ;;  %v3297_v23 = vmul.f32 %v6284_v12, %v3260_v16  ;;  %v6285_v44 = vld [vmem:[#allocation74_spill] sm:$0xff]  ;;  %v2525_v41 = vld [vmem:[#allocation3 + $0x1d8] sm:$0x7f] }
 0x22a   : > { %v2990_v39 = vadd.f32 %v2969_v62, %v2908_v60  ;;  %v3399_v50 = vadd.f32 %v3378_v31, %v3317_v7  ;;  %v3133_v1 = vmul.f32 %v6282_v56, %v3096_v30  ;;  %v2443_v57 = vld [vmem:[#allocation3 + $0xd0] sm:$0x7f]  ;;  %v3052_v62 = vmul.f32 %v6261_v3, %v3015_v9  ;;  %v2852_v11 = vld [vmem:[#allocation3 + $0xe0] sm:$0x7f]  ;;  %v2934_v29 = vld [vmem:[#allocation3 + $0x1e8] sm:$0x7f] }
 0x22b   : > { %v2827_v42 = vadd.f32 %v2806_v49, %v2745_v33  ;;  %v2582_v17 = vadd.f32 %v2561_v15, %v2500_v59  ;;  %v2770_v49 = vld [vmem:[#allocation3 + $0x4e8] sm:$0x7f]  ;;  %v3379_v20 = vmul.f32 %v6285_v44, %v3342_v2  ;;  %v3134_v19 = vmul.f32 %v6241_v10, %v3097_v48  ;;  %v3261_v63 = vld [vmem:[#allocation3 + $0xf0] sm:$0x7f] }
 0x22c   : > { %v3072_v55 = vadd.f32 %v3051_v6, %v2990_v39  ;;  %v3481_v53 = vadd.f32 %v3460_v54, %v3399_v50  ;;  %v3216_v31 = vmul.f32 %v6211_v61, %v3179_v35  ;;  %v2725_v33 = vmul.f32 %v6266_v34, %v2688_v52  ;;  %v6286_v54 = vld [vmem:[#allocation54_spill] sm:$0xff]  ;;  %v6287_v15 = vld [vmem:[#allocation12_spill] sm:$0xff]  ;;  %v3424_v61 = vld [vmem:[#allocation3 + $0x2f8] sm:$0x7f] }
 0x22d   : > { %v2909_v4 = vadd.f32 %v2888_v18, %v2827_v42  ;;  %v2664_v16 = vadd.f32 %v2643_v45, %v2582_v17  ;;  %v2807_v3 = vmul.f32 %v6242_v5, %v2770_v49  ;;  %v2337_v7 = vadd.f32 %v6287_v15, %v6286_v54  ;;  %v2607_v34 = vld [vmem:[#allocation3 + $0x2e0] sm:$0x7f]  ;;  %v6288_v48 = vld [vmem:[#allocation60_spill] sm:$0xff]  ;;  %v6290_v52 = vld [vmem:[#allocation59_spill] sm:$0xff] }
 0x22e   : > { %v3154_v60 = vadd.f32 %v3133_v1, %v3072_v55  ;;  %v3563_v18 = vadd.f32 %v5676_v51, %v3481_v53  ;;  %v2480_v10 = vmul.f32 %v6269_v46, %v2443_v57  ;;  %v2889_v2 = vmul.f32 %v6225_v38, %v2852_v11  ;;  %v3016_v35 = vld [vmem:[#allocation3 + $0x2f0] sm:$0x7f]  ;;  %v3506_v1 = vld [vmem:[#allocation3 + $0x400] sm:$0x7f]  ;;  %v6291_v55 = vld [vmem:[#allocation75_spill] sm:$0xff] }
 0x22f   : > { %v2991_v30 = vadd.f32 %v2970_v58, %v2909_v4  ;;  %v3343_v58 = vld [vmem:[#allocation3 + $0x1f8] sm:$0x7f]  ;;  %v2746_v39 = vadd.f32 %v2725_v33, %v2664_v16  ;;  %v3298_v51 = vmul.f32 %v6288_v48, %v3261_v63  ;;  %v6289_v5 = vld [vmem:[#allocation24_spill] sm:$0xff]  ;;  %v2562_v45 = vmul.f32 %v6270_v47, %v2525_v41  ;;  %v3425_v17 = vld [vmem:[#allocation3 + $0x300] sm:$0x7f] }
 0x230   : > { %v3236_v6 = vadd.f32 %v3215_v28, %v3154_v60  ;;  %v3645_v42 = vadd.f32 %v3624_v0, %v3563_v18  ;;  %v2419_v59 = vadd.f32 %v6289_v5, %v2337_v7  ;;  %v2971_v57 = vmul.f32 %v6290_v52, %v2934_v29  ;;  %v3588_v11 = vld [vmem:[#allocation3 + $0x508] sm:$0x7f]  ;;  %v6293_v63 = vld [vmem:[#allocation34_spill] sm:$0xff]  ;;  %v3098_v33 = vld [vmem:[#allocation3 + $0x3f8] sm:$0x7f] }
 0x231   : > { %v3073_v9 = vadd.f32 %v3052_v62, %v2991_v30  ;;  %v2828_v28 = vadd.f32 %v2807_v3, %v2746_v39  ;;  %v3461_v4 = vmul.f32 %v6291_v55, %v3424_v61  ;;  %v6292_v62 = vld [vmem:[#allocation8_spill] sm:$0xff]  ;;  %v2644_v49 = vmul.f32 %v6273_v27, %v2607_v34  ;;  %v3507_v30 = vld [vmem:[#allocation3 + $0x408] sm:$0x7f]  ;;  %v6294_v29 = vld [vmem:[#allocation9_spill] sm:$0xff] }
 0x232   : > { %v3318_v50 = vadd.f32 %v3297_v23, %v3236_v6  ;;  %3666 = vst [vmem:[%s5388_s9 + $0x80] sm:$0x7f] %v3645_v42  ;;  %v3380_v38 = vmul.f32 %v6292_v62, %v3343_v58  ;;  %v2501_v0 = vadd.f32 %v2480_v10, %v2419_v59  ;;  %v3053_v23 = vmul.f32 %v6245_v43, %v3016_v35  ;;  %v3180_v7 = vld [vmem:[#allocation3 + $0x500] sm:$0x7f]  ;;  %v2771_v10 = vld [vmem:[#allocation3 + $0x4f0] sm:$0x7f] }
 0x233   : > { %v3155_v46 = vadd.f32 %v3134_v19, %v3073_v9  ;;  %v2910_v47 = vadd.f32 %v2889_v2, %v2828_v28  ;;  %v2689_v19 = vld [vmem:[#allocation3 + $0x3e8] sm:$0x7f]  ;;  %v3543_v16 = vmul.f32 %v6293_v63, %v3506_v1  ;;  %v3462_v54 = vmul.f32 %v6294_v29, %v3425_v17  ;;  %v3262_v9 = vld [vmem:[#allocation3 + $0xf8] sm:$0x7f]  ;;  %v3589_v35 = vld [vmem:[#allocation3 + $0x510] sm:$0x7f] }
 0x234   : > { %v3400_v53 = vadd.f32 %v3379_v20, %v3318_v50  ;;  %v2583_v41 = vadd.f32 %v2562_v45, %v2501_v0  ;;  %v2853_v27 = vld [vmem:[#allocation3 + $0xe8] sm:$0x7f]  ;;  %v6295_v20 = vld [vmem:[#allocation76_spill] sm:$0xff]  ;;  %v2726_v43 = vmul.f32 %v6275_v37, %v2689_v19  ;;  %v3217_v5 = vmul.f32 %v6232_v25, %v3180_v7  ;;  %v3344_v59 = vld [vmem:[#allocation3 + $0x200] sm:$0x7f] }
 0x235   : > { %v3237_v60 = vadd.f32 %v3216_v31, %v3155_v46  ;;  %v2992_v15 = vadd.f32 %v2971_v57, %v2910_v47  ;;  %v3625_v6 = vmul.f32 %v6295_v20, %v3588_v11  ;;  %v6296_v31 = vld [vmem:[#allocation66_spill] sm:$0xff]  ;;  %v6297_v42 = vld [vmem:[#allocation7_spill] sm:$0xff]  ;;  %v2808_v50 = vmul.f32 %v6276_v26, %v2771_v10  ;;  %v3017_v57 = vld [vmem:[#allocation3 + $0x2f8] sm:$0x7f] }
 0x236   : > { %v3482_v18 = vadd.f32 %v3461_v4, %v3400_v53  ;;  %v3544_v61 = vmul.f32 %v6296_v31, %v3507_v30  ;;  %v2665_v58 = vadd.f32 %v2644_v49, %v2583_v41  ;;  %v3135_v48 = vmul.f32 %v6297_v42, %v3098_v33  ;;  %v3426_v4 = vld [vmem:[#allocation3 + $0x308] sm:$0x7f]  ;;  %v6298_v25 = vld [vmem:[#allocation68_spill] sm:$0xff]  ;;  %v3099_v30 = vld [vmem:[#allocation3 + $0x400] sm:$0x7f] }
 0x237   : > { %v3319_v3 = vadd.f32 %v3298_v51, %v3237_v60  ;;  %v3074_v34 = vadd.f32 %v3053_v23, %v2992_v15  ;;  %v2935_v51 = vld [vmem:[#allocation3 + $0x1f0] sm:$0x7f]  ;;  %v2890_v1 = vmul.f32 %v6277_v22, %v2853_v27  ;;  %v3299_v37 = vmul.f32 %v6218_v36, %v3262_v9  ;;  %v3590_v33 = vld [vmem:[#allocation3 + $0x518] sm:$0x7f] }
 0x238   : > { %v3564_v39 = vadd.f32 %v3543_v16, %v3482_v18  ;;  %v2747_v45 = vadd.f32 %v2726_v43, %v2665_v58  ;;  %v3626_v0 = vmul.f32 %v6298_v25, %v3589_v35  ;;  %v3381_v26 = vmul.f32 %v5299_v32, %v3344_v59  ;;  %v3508_v47 = vld [vmem:[#allocation3 + $0x410] sm:$0x7f]  ;;  %v3263_v16 = vld [vmem:[#allocation3 + $0x100] sm:$0x7f] }
 0x239   : > { %v3401_v2 = vadd.f32 %v3380_v38, %v3319_v3  ;;  %v3156_v52 = vadd.f32 %v3135_v48, %v3074_v34  ;;  %v2972_v38 = vmul.f32 %v6234_v14, %v2935_v51  ;;  %v3054_v22 = vmul.f32 %v6281_v21, %v3017_v57  ;;  %v3181_v14 = vld [vmem:[#allocation3 + $0x508] sm:$0x7f]  ;;  %v3427_v10 = vld [vmem:[#allocation3 + $0x310] sm:$0x7f]  ;;  %v3591_v58 = vld [vmem:[#allocation3 + $0x520] sm:$0x7f] }
 0x23a   : > { %v3646_v46 = vadd.f32 %v3625_v6, %v3564_v39  ;;  %v2829_v62 = vadd.f32 %v2808_v50, %v2747_v45  ;;  %v3463_v36 = vmul.f32 %v5305_v24, %v3426_v4  ;;  %v3136_v18 = vmul.f32 %v6282_v56, %v3099_v30  ;;  %v3345_v21 = vld [vmem:[#allocation3 + $0x208] sm:$0x7f]  ;;  %v3707_v48 = vld [vmem:[%s5388_s9 + $0x38] sm:$0xff] (%p3952_p5)  ;;  %v3709_v51 = vld [vmem:[%s5388_s9 + $0x40] sm:$0xff] (%p3952_p5) }
 0x23b   : > { %v3483_v28 = vadd.f32 %v3462_v54, %v3401_v2  ;;  %v3238_v49 = vadd.f32 %v3217_v5, %v3156_v52  ;;  %v3545_v3 = vmul.f32 %v5327_v13, %v3508_v47  ;;  %v3218_v54 = vmul.f32 %v6283_v40, %v3181_v14  ;;  %v3509_v13 = vld [vmem:[#allocation3 + $0x418] sm:$0x7f]  ;;  %v3703_v34 = vld [vmem:[%s5388_s9 + $0x28] sm:$0xff] (%p3952_p5)  ;;  %v3705_v42 = vld [vmem:[%s5388_s9 + $0x30] sm:$0xff] (%p3952_p5)  ;;  %3708 = vst [vmem:[%s5760_s18 + $0x98] sm:$0xff] (%p3952_p5), %v3707_v48 }
 0x23c   : > { %3667 = vst [vmem:[%s5388_s9 + $0x88] sm:$0x7f] %v3646_v46  ;;  %v2911_v53 = vadd.f32 %v2890_v1, %v2829_v62  ;;  %v3300_v24 = vmul.f32 %v6284_v12, %v3263_v16  ;;  %v3627_v7 = vmul.f32 %v5348_v8, %v3590_v33  ;;  %v3382_v6 = vmul.f32 %v6285_v44, %v3345_v21  ;;  %v3693_v44 = vld [vmem:[%s5388_s9] sm:$0xff] (%p3952_p5)  ;;  %v3711_v35 = vld [vmem:[%s5388_s9 + $0x48] sm:$0xff] (%p3952_p5)  ;;  %v3713_v5 = vld [vmem:[%s5388_s9 + $0x50] sm:$0xff] (%p3952_p5) }
 0x23d   : > { %v3565_v17 = vadd.f32 %v3544_v61, %v3483_v28  ;;  %v3320_v60 = vadd.f32 %v3299_v37, %v3238_v49  ;;  %v3464_v56 = vmul.f32 %v6291_v55, %v3427_v10  ;;  %v3546_v40 = vmul.f32 %v6293_v63, %v3509_v13  ;;  %v3695_v55 = vld [vmem:[%s5388_s9 + $0x8] sm:$0xff] (%p3952_p5)  ;;  %v3697_v63 = vld [vmem:[%s5388_s9 + $0x10] sm:$0xff] (%p3952_p5)  ;;  %v3701_v2 = vld [vmem:[%s5388_s9 + $0x20] sm:$0xff] (%p3952_p5)  ;;  %3694 = vst [vmem:[%s5760_s18] sm:$0xff] (%p3952_p5), %v3693_v44 }
 0x23e   : > { %v2993_v23 = vadd.f32 %v2972_v38, %v2911_v53  ;;  %v3628_v39 = vmul.f32 %v6295_v20, %v3591_v58  ;;  %v3699_v20 = vld [vmem:[%s5388_s9 + $0x18] sm:$0xff] (%p3952_p5)  ;;  %3696 = vst [vmem:[%s5760_s18 + $0x8] sm:$0xff] (%p3952_p5), %v3695_v55  ;;  %3698 = vst [vmem:[%s5760_s18 + $0x10] sm:$0xff] (%p3952_p5), %v3697_v63  ;;  %v3717_v45 = vld [vmem:[%s5388_s9 + $0x60] sm:$0xff] (%p3952_p5) }
 0x23f   : > { %v3647_v11 = vadd.f32 %v3626_v0, %v3565_v17  ;;  %v3402_v19 = vadd.f32 %v3381_v26, %v3320_v60  ;;  %3700 = vst [vmem:[%s5760_s18 + $0x48] sm:$0xff] (%p3952_p5), %v3699_v20  ;;  %3702 = vst [vmem:[%s5760_s18 + $0x50] sm:$0xff] (%p3952_p5), %v3701_v2  ;;  %v3715_v59 = vld [vmem:[%s5388_s9 + $0x58] sm:$0xff] (%p3952_p5)  ;;  %v3719_v50 = vld [vmem:[%s5388_s9 + $0x68] sm:$0xff] (%p3952_p5) }
 0x240   : > { %v3075_v41 = vadd.f32 %v3054_v22, %v2993_v23  ;;  %3704 = vst [vmem:[%s5760_s18 + $0x58] sm:$0xff] (%p3952_p5), %v3703_v34  ;;  %3706 = vst [vmem:[%s5760_s18 + $0x90] sm:$0xff] (%p3952_p5), %v3705_v42  ;;  %v3721_v1 = vld [vmem:[%s5388_s9 + $0x70] sm:$0xff] (%p3952_p5)  ;;  %v3723_v46 = vld [vmem:[%s5388_s9 + $0x78] sm:$0xff] (%p3952_p5) }
 0x241   : > { %3668 = vst [vmem:[%s5388_s9 + $0x90] sm:$0x7f] %v3647_v11  ;;  %v3484_v32 = vadd.f32 %v3463_v36, %v3402_v19  ;;  %3710 = vst [vmem:[%s5760_s18 + $0xa0] sm:$0xff] (%p3952_p5), %v3709_v51  ;;  %v3725_v28 = vld [vmem:[%s5388_s9 + $0x80] sm:$0xff] (%p3952_p5) }
 0x242   : > { %v3157_v29 = vadd.f32 %v3136_v18, %v3075_v41  ;;  %3712 = vst [vmem:[%s5760_s18 + $0xd8] sm:$0xff] (%p3952_p5), %v3711_v35  ;;  %3714 = vst [vmem:[%s5760_s18 + $0xe0] sm:$0xff] (%p3952_p5), %v3713_v5 }
 0x243   : > { %v3566_v15 = vadd.f32 %v3545_v3, %v3484_v32  ;;  %3716 = vst [vmem:[%s5760_s18 + $0xe8] sm:$0xff] (%p3952_p5), %v3715_v59  ;;  %3718 = vst [vmem:[%s5760_s18 + $0x120] sm:$0xff] (%p3952_p5), %v3717_v45  ;;  %v3727_v52 = vld [vmem:[%s5388_s9 + $0x88] sm:$0xff] (%p3952_p5) }
 0x244   : > { %v3239_v27 = vadd.f32 %v3218_v54, %v3157_v29  ;;  %3720 = vst [vmem:[%s5760_s18 + $0x128] sm:$0xff] (%p3952_p5), %v3719_v50  ;;  %3722 = vst [vmem:[%s5760_s18 + $0x130] sm:$0xff] (%p3952_p5), %v3721_v1 }
 0x245   : > { %v3648_v31 = vadd.f32 %v3627_v7, %v3566_v15  ;;  %3724 = vst [vmem:[%s5760_s18 + $0x168] sm:$0xff] (%p3952_p5), %v3723_v46  ;;  %3726 = vst [vmem:[%s5760_s18 + $0x170] sm:$0xff] (%p3952_p5), %v3725_v28 }
 0x246   : > { %v3321_v61 = vadd.f32 %v3300_v24, %v3239_v27  ;;  %3728 = vst [vmem:[%s5760_s18 + $0x178] sm:$0xff] (%p3952_p5), %v3727_v52 }
 0x247   : > { %3669 = vst [vmem:[%s5388_s9 + $0x98] sm:$0x7f] %v3648_v31 }
 0x248   : > { %v3403_v9 = vadd.f32 %v3382_v6, %v3321_v61  ;;  %v3729_v37 = vld [vmem:[%s5388_s9 + $0x90] sm:$0xff] (%p3952_p5) }
 0x249   : > { %3730 = vst [vmem:[%s5760_s18 + $0x1b0] sm:$0xff] (%p3952_p5), %v3729_v37 }
 0x24a   : > { %v3485_v43 = vadd.f32 %v3464_v56, %v3403_v9  ;;  %3677 = sbr.rel (!%p3952_p5) target bundleno = 601 (0x259), region = 78 }
 0x24c   : > { %v3567_v12 = vadd.f32 %v3546_v40, %v3485_v43 }
 0x24e   : > { %v3649_v8 = vadd.f32 %v3628_v39, %v3567_v12  ;;  %v3731_v57 = vld [vmem:[%s5388_s9 + $0x98] sm:$0xff] (%p3952_p5) }
 0x24f   : > { %3732 = vst [vmem:[%s5760_s18 + $0x1b8] sm:$0xff] (%p3952_p5), %v3731_v57 }
 0x250   : > { %3670 = vst [vmem:[%s5388_s9 + $0xa0] sm:$0x7f] %v3649_v8 }
 0x257   : > { %v3733_v4 = vld [vmem:[%s5388_s9 + $0xa0] sm:$0xff] }
 0x258   : > { %3734 = vst [vmem:[%s5760_s18 + $0x1c0] sm:$0xff] %v3733_v4 }
 0x259 PF: > { %p9_p10 = scmp.ge.s32.totalorder %s3935_s13, 5   ;;  %s6299_s9 = smov %s3896_s10 }
 0x25a   : > { %s6300_s10 = smov %s3946_s16  ;;  %s6301_s11 = smov %s3935_s13 }
 0x25b   :  { %11 = sbr.rel (!%p9_p10) target bundleno = 2 (0x2), region = 189 }

</bundles_post_ra>
